<compile_context>
chip_gen: v6e
topology: v6e:2x2x1
jax: 0.10.0
libtpu: 0.0.40
codegen_flags: <defaults>
</compile_context>

<pallas_src>
import functools

import jax
import jax.numpy as jnp
from jax.experimental import pallas as pl
from jax.experimental.pallas import tpu as pltpu


# ----------------------------------------------------------------------------
# Config (static — never passed through jit as pytree leaves)
# ----------------------------------------------------------------------------

GROUPS = 4
STEM_C = 16
# scaled-down analogue of the 4 resnext101 stages: (width, out_c, blocks, stride)
STAGE_CFG = [
    (16, 32, 2, 1),
    (32, 64, 2, 2),
]
NUM_CLASSES = 100
CPAD = 128          # lane-dense channel padding


def _pick_tile(m, cap=256):
    """Largest row-tile <= cap that divides m (multiple of 8/16 preferred)."""
    for t in (cap, 128, 64, 32, 16, 8):
        if t <= m and m % t == 0:
            return t
    return m


# ----------------------------------------------------------------------------
# Pallas kernels
# ----------------------------------------------------------------------------

def _mm_epi_kernel(x_ref, w_ref, scale_ref, shift_ref, o_ref, *, relu):
    # x: (TM, K), w: (K, N) bf16, scale/shift: (1, N) f32 -> o: (TM, N)
    y = jnp.dot(x_ref[...].astype(jnp.bfloat16), w_ref[...],
                preferred_element_type=jnp.float32)
    y = y * scale_ref[...] + shift_ref[...]
    if relu:
        y = jnp.maximum(y, 0.0)
    o_ref[...] = y.astype(o_ref.dtype)


def _mm_epi_res_kernel(x_ref, w_ref, scale_ref, shift_ref, res_ref, o_ref, *,
                       relu):
    # Same as above, plus fused residual add (f32) before the activation.
    y = jnp.dot(x_ref[...].astype(jnp.bfloat16), w_ref[...],
                preferred_element_type=jnp.float32)
    y = y * scale_ref[...] + shift_ref[...] + res_ref[...].astype(jnp.float32)
    if relu:
        y = jnp.maximum(y, 0.0)
    o_ref[...] = y.astype(o_ref.dtype)


def matmul_bn_act(x, w, scale, shift, *, relu, res=None,
                  out_dtype=jnp.bfloat16):
    """Fused (x @ w) * scale + shift [+ res] [-> relu], tiled over rows.

    x: (M, K) (any float dtype; cast to bf16 in-kernel), w: (K, N) with N a
    128-multiple, scale/shift: (N,).  Accumulation/epilogue are f32; the
    output is stored as `out_dtype` (bf16 for intermediate activations).
    """
    M, K = x.shape
    _, N = w.shape
    tm = _pick_tile(M)
    grid = (M // tm,)

    wb = w.astype(jnp.bfloat16)
    scale2 = scale.reshape(1, N).astype(jnp.float32)
    shift2 = shift.reshape(1, N).astype(jnp.float32)

    in_specs = [
        pl.BlockSpec((tm, K), lambda i: (i, 0)),
        pl.BlockSpec((K, N), lambda i: (0, 0)),
        pl.BlockSpec((1, N), lambda i: (0, 0)),
        pl.BlockSpec((1, N), lambda i: (0, 0)),
    ]
    args = [x, wb, scale2, shift2]
    if res is not None:
        in_specs.append(pl.BlockSpec((tm, N), lambda i: (i, 0)))
        args.append(res)
        kernel = functools.partial(_mm_epi_res_kernel, relu=relu)
    else:
        kernel = functools.partial(_mm_epi_kernel, relu=relu)

    return pl.pallas_call(
        kernel,
        out_shape=jax.ShapeDtypeStruct((M, N), out_dtype),
        grid=grid,
        in_specs=in_specs,
        out_specs=pl.BlockSpec((tm, N), lambda i: (i, 0)),
        compiler_params=pltpu.CompilerParams(
            dimension_semantics=("parallel",)),
    )(*args)


def _max3_kernel(a_ref, b_ref, c_ref, o_ref):
    o_ref[...] = jnp.maximum(jnp.maximum(a_ref[...], b_ref[...]), c_ref[...])


def _max3(a, b, c):
    M, C = a.shape
    tm = _pick_tile(M)
    return pl.pallas_call(
        _max3_kernel,
        out_shape=jax.ShapeDtypeStruct((M, C), a.dtype),
        grid=(M // tm,),
        in_specs=[pl.BlockSpec((tm, C), lambda i: (i, 0))] * 3,
        out_specs=pl.BlockSpec((tm, C), lambda i: (i, 0)),
        compiler_params=pltpu.CompilerParams(
            dimension_semantics=("parallel",)),
    )(a, b, c)


def _avgpool_kernel(x_ref, o_ref):
    # x: (N, HW, C) bf16 -> f32 mean over the spatial axis.
    o_ref[...] = jnp.mean(x_ref[...].astype(jnp.float32), axis=1)


def global_avgpool(x_nhwc):
    N, H, W, C = x_nhwc.shape
    x3 = x_nhwc.reshape(N, H * W, C)
    # Tiny (N x HW x 128): one block is well within VMEM.
    return pl.pallas_call(
        _avgpool_kernel,
        out_shape=jax.ShapeDtypeStruct((N, C), jnp.float32),
        grid=(1,),
        in_specs=[pl.BlockSpec((N, H * W, C), lambda i: (0, 0, 0))],
        out_specs=pl.BlockSpec((N, C), lambda i: (0, 0)),
    )(x3)


# ----------------------------------------------------------------------------
# Glue: im2col, channel padding, grouped->dense weight packing, pooling
# ----------------------------------------------------------------------------

def _im2col(x, kh, kw, stride, padding):
    """x: (N,H,W,C) -> (N*Ho*Wo, kh*kw*C). stride/padding are static ints."""
    N, H, W, C = x.shape
    xp = jnp.pad(x, ((0, 0), (padding,) * 2, (padding,) * 2, (0, 0)))
    Ho = (H + 2 * padding - kh) // stride + 1
    Wo = (W + 2 * padding - kw) // stride + 1
    cols = []
    for i in range(kh):
        for j in range(kw):
            cols.append(
                xp[:, i:i + (Ho - 1) * stride + 1:stride,
                      j:j + (Wo - 1) * stride + 1:stride, :])
    p = jnp.stack(cols, axis=3)                       # (N,Ho,Wo,kh*kw,C)
    return p.reshape(N * Ho * Wo, kh * kw * C), Ho, Wo


def _pad1(v):
    n = v.shape[0]
    return jnp.pad(v, (0, CPAD - n)) if n < CPAD else v


def fused_conv_bn(x2d, w, scale, shift, *, relu, res=None,
                  out_dtype=jnp.bfloat16):
    """Dense conv-as-matmul with fused BN(+residual)(+ReLU) epilogue.

    x2d: (M, K) activation/patches (channels zero-padded where applicable).
    w:   (kin, cout) real weight; zero-padded here to (K, CPAD).
    Output: (M, CPAD), lane-dense; padded channels are exactly zero.
    """
    M, K = x2d.shape
    kin, cout = w.shape
    if kin < K:
        w = jnp.pad(w, ((0, K - kin), (0, 0)))
    if cout < CPAD:
        w = jnp.pad(w, ((0, 0), (0, CPAD - cout)))
    return matmul_bn_act(x2d, w, _pad1(scale), _pad1(shift), relu=relu,
                         res=res, out_dtype=out_dtype)


def _grouped_to_dense(wg, cout_pad):
    """(G, kh, kw, cin_g, cout_g) grouped weight -> (kh*kw*G*cin_g, cout_pad)
    block-diagonal dense weight (zero outside group blocks / padded output
    channels) so the grouped conv runs as one full-lane MXU matmul."""
    G, kh, kw, cin_g, cout_g = wg.shape
    cin_total = G * cin_g
    dense = jnp.zeros((kh, kw, cin_total, cout_pad), wg.dtype)
    for g in range(G):
        dense = dense.at[:, :, g * cin_g:(g + 1) * cin_g,
                               g * cout_g:(g + 1) * cout_g].set(wg[g])
    return dense.reshape(kh * kw * cin_total, cout_pad)


def maxpool_3x3_s2(x):
    """3x3/s2/p1 max-pool on (N,H,W,C), decomposed into a 3-tap row pass and a
    3-tap col pass (each a tiled Pallas max kernel)."""
    N, H, W, C = x.shape
    neg = jnp.finfo(x.dtype).min
    Ho = (H + 2 - 3) // 2 + 1
    Wo = (W + 2 - 3) // 2 + 1

    xh = jnp.pad(x, ((0, 0), (1, 1), (0, 0), (0, 0)), constant_values=neg)
    slabs = [xh[:, i:i + (Ho - 1) * 2 + 1:2, :, :].reshape(N * Ho * W, C)
             for i in range(3)]
    r = _max3(*slabs).reshape(N, Ho, W, C)

    rw = jnp.pad(r, ((0, 0), (0, 0), (1, 1), (0, 0)), constant_values=neg)
    slabs = [rw[:, :, j:j + (Wo - 1) * 2 + 1:2, :].reshape(N * Ho * Wo, C)
             for j in range(3)]
    return _max3(*slabs).reshape(N, Ho, Wo, C)


# ----------------------------------------------------------------------------
# Parameter init (deterministic, synthetic)
# ----------------------------------------------------------------------------

def _init_dense(key, cin, cout):
    return jax.random.normal(key, (cin, cout), jnp.float32) * (2.0 / cin) ** 0.5


def _init_conv_hwio(key, kh, kw, cin, cout):
    fan_in = kh * kw * cin
    return (jax.random.normal(key, (kh, kw, cin, cout), jnp.float32)
            * (2.0 / fan_in) ** 0.5)


def _init_grouped(key, g, kh, kw, cin_g, cout_g):
    fan_in = kh * kw * cin_g
    return (jax.random.normal(key, (g, kh, kw, cin_g, cout_g), jnp.float32)
            * (2.0 / fan_in) ** 0.5)


def _init_bn(key, c, eps=1e-5):
    k1, k2 = jax.random.split(key)
    gamma = 1.0 + 0.1 * jax.random.normal(k1, (c,), jnp.float32)
    beta = 0.1 * jax.random.normal(k2, (c,), jnp.float32)
    running_mean = jnp.zeros((c,), jnp.float32)
    running_var = jnp.ones((c,), jnp.float32)
    scale = gamma / jnp.sqrt(running_var + eps)
    shift = beta - running_mean * scale
    return scale, shift


def _init_block(key, in_c, width, out_c, stride):
    keys = jax.random.split(key, 8)
    p = {
        "conv1_w": _init_dense(keys[0], in_c, width),
        "bn1": _init_bn(keys[1], width),
        "conv2_w": _init_grouped(keys[2], GROUPS, 3, 3,
                                 width // GROUPS, width // GROUPS),
        "bn2": _init_bn(keys[3], width),
        "conv3_w": _init_dense(keys[4], width, out_c),
        "bn3": _init_bn(keys[5], out_c),
    }
    if stride != 1 or in_c != out_c:
        p["down_w"] = _init_dense(keys[6], in_c, out_c)
        p["down_bn"] = _init_bn(keys[7], out_c)
    return p


def init_params(key):
    total_blocks = sum(nb for _, _, nb, _ in STAGE_CFG)
    keys = list(jax.random.split(key, 3 + total_blocks))
    params = {
        "stem_w": _init_conv_hwio(keys.pop(0), 3, 3, 3, STEM_C),
        "stem_bn": _init_bn(keys.pop(0), STEM_C),
        "stages": [],
    }
    in_c = STEM_C
    for width, out_c, nblocks, stride in STAGE_CFG:
        blocks = []
        for bi in range(nblocks):
            s = stride if bi == 0 else 1
            blocks.append(_init_block(keys.pop(0), in_c, width, out_c, s))
            in_c = out_c
        params["stages"].append(blocks)
    kw_, kb_ = jax.random.split(keys.pop(0))
    params["fc_w"] = (jax.random.normal(kw_, (in_c, NUM_CLASSES), jnp.float32)
                      * (1.0 / in_c) ** 0.5)
    params["fc_b"] = 0.01 * jax.random.normal(kb_, (NUM_CLASSES,), jnp.float32)
    return params


# ----------------------------------------------------------------------------
# Model forward
# ----------------------------------------------------------------------------

def bottleneck(x, p, stride):
    """Grouped-bottleneck block on channel-padded NHWC activation (C == CPAD)."""
    N, H, W, C = x.shape
    width = p["conv1_w"].shape[1]          # static (shape of a traced array)
    x2 = x.reshape(N * H * W, C)

    # conv1 (1x1) + bn1 + relu  (fused matmul epilogue), bf16 activation out.
    out = fused_conv_bn(x2, p["conv1_w"], *p["bn1"], relu=True)
    out = out.reshape(N, H, W, C)

    # conv2 (grouped 3x3, stride s) + bn2 + relu.  Only the first `width`
    # channels are non-zero, so im2col is built over those lanes only (cuts
    # patch HBM traffic by CPAD/width); groups are packed block-diagonally
    # into one dense weight so the MXU still runs a full 128-lane output.
    patches, Ho, Wo = _im2col(out[..., :width], 3, 3, stride, 1)
    w_dense = _grouped_to_dense(p["conv2_w"], CPAD)
    out = fused_conv_bn(patches, w_dense, *p["bn2"], relu=True)  # (N*Ho*Wo, C)

    # identity / downsample branch
    if "down_w" in p:
        xs = x[:, ::stride, ::stride, :].reshape(N * Ho * Wo, C)
        identity = fused_conv_bn(xs, p["down_w"], *p["down_bn"], relu=False)
    else:
        identity = x2

    # conv3 (1x1) + bn3 + residual add + relu, all fused in one kernel
    out = fused_conv_bn(out, p["conv3_w"], *p["bn3"], relu=True, res=identity)
    return out.reshape(N, Ho, Wo, C)


def resnext_forward(x_nchw, params):
    # PyTorch input is NCHW; convert once to NHWC (bf16) for the kernels.
    x = jnp.transpose(x_nchw, (0, 2, 3, 1)).astype(jnp.bfloat16)
    N = x.shape[0]

    # Stem: 3x3/s1/p1 conv + bn + relu (fused); output channel-padded to 128.
    patches, Ho, Wo = _im2col(x, 3, 3, 1, 1)            # (M, 27) bf16
    stem_w = params["stem_w"].reshape(-1, STEM_C)       # (27, 16)
    x = fused_conv_bn(patches, stem_w, *params["stem_bn"], relu=True)
    x = x.reshape(N, Ho, Wo, CPAD)

    x = maxpool_3x3_s2(x)

    for blocks, (width, out_c, nblocks, stride) in zip(params["stages"],
                                                       STAGE_CFG):
        for bi, blk in enumerate(blocks):
            s = stride if bi == 0 else 1
            x = bottleneck(x, blk, s)

    feat = global_avgpool(x)                            # (N, CPAD) f32

    # Final fc -> 100 classes, computed lane-dense at 128 and sliced.
    ones = jnp.ones((NUM_CLASSES,), jnp.float32)
    logits = fused_conv_bn(feat, params["fc_w"], ones, params["fc_b"],
                           relu=False, out_dtype=jnp.float32)   # (N, 128)
    return logits[:, :NUM_CLASSES]


if __name__ == "__main__":
    key = jax.random.PRNGKey(0)
    k_param, k_x = jax.random.split(key)
    params = init_params(k_param)
    x = jax.random.normal(k_x, (2, 3, 16, 16), jnp.float32)  # NCHW like PyTorch

    fwd = jax.jit(resnext_forward)
    out = fwd(x, params)
    out = jax.block_until_ready(out)

    assert out.shape == (2, NUM_CLASSES), out.shape
    assert out.dtype == jnp.float32
    assert bool(jnp.all(jnp.isfinite(out)))
    print("KERNEL_OK")
</pallas_src>

<mosaic_0001>
module attributes {stable_mosaic.version = 11 : i64} {
  func.func @_mm_epi_kernel(%arg0: i32, %arg1: memref<256x27xbf16, #tpu.memory_space<vmem>>, %arg2: memref<27x128xbf16, #tpu.memory_space<vmem>>, %arg3: memref<1x128xf32, #tpu.memory_space<vmem>>, %arg4: memref<1x128xf32, #tpu.memory_space<vmem>>, %arg5: memref<256x128xbf16, #tpu.memory_space<vmem>>) attributes {dimension_semantics = [#tpu.dimension_semantics<parallel>], iteration_bounds = array<i64: 2>, scalar_prefetch = 0 : i64, scratch_operands = 0 : i64, tpu.core_type = #tpu.core_type<tc>, window_params = [{transform_indices = @transform_0, window_bounds = array<i64: 256, 27>}, {pipeline_mode = #tpu.pipeline_mode<synchronous>, transform_indices = @transform_1, window_bounds = array<i64: 27, 128>}, {pipeline_mode = #tpu.pipeline_mode<synchronous>, transform_indices = @transform_2, window_bounds = array<i64: 1, 128>}, {pipeline_mode = #tpu.pipeline_mode<synchronous>, transform_indices = @transform_3, window_bounds = array<i64: 1, 128>}, {transform_indices = @transform_4, window_bounds = array<i64: 256, 128>}]} {
    %c0 = arith.constant 0 : index
    %c0_0 = arith.constant 0 : index
    %0 = vector.load %arg1[%c0, %c0_0] : memref<256x27xbf16, #tpu.memory_space<vmem>>, vector<256x27xbf16>
    %c0_1 = arith.constant 0 : index
    %c0_2 = arith.constant 0 : index
    %1 = vector.load %arg2[%c0_1, %c0_2] : memref<27x128xbf16, #tpu.memory_space<vmem>>, vector<27x128xbf16>
    %cst = arith.constant dense<0.000000e+00> : vector<256x128xf32>
    %2 = tpu.matmul %0, %1, %cst {dimension_numbers = #tpu.dot_dimension_numbers<[1], [0], [0], [1], [0, 0, 1, 1], [], []>} : vector<256x27xbf16>, vector<27x128xbf16>, vector<256x128xf32> -> vector<256x128xf32>
    %c0_3 = arith.constant 0 : index
    %c0_4 = arith.constant 0 : index
    %3 = vector.load %arg3[%c0_3, %c0_4] : memref<1x128xf32, #tpu.memory_space<vmem>>, vector<1x128xf32>
    %4 = vector.broadcast %3 : vector<1x128xf32> to vector<256x128xf32>
    %5 = arith.mulf %2, %4 : vector<256x128xf32>
    %c0_5 = arith.constant 0 : index
    %c0_6 = arith.constant 0 : index
    %6 = vector.load %arg4[%c0_5, %c0_6] : memref<1x128xf32, #tpu.memory_space<vmem>>, vector<1x128xf32>
    %7 = vector.broadcast %6 : vector<1x128xf32> to vector<256x128xf32>
    %8 = arith.addf %5, %7 : vector<256x128xf32>
    %cst_7 = arith.constant 0.000000e+00 : f32
    %9 = vector.broadcast %cst_7 : f32 to vector<256x128xf32>
    %10 = arith.maximumf %8, %9 : vector<256x128xf32>
    %11 = arith.truncf %10 : vector<256x128xf32> to vector<256x128xbf16>
    %c0_8 = arith.constant 0 : index
    %c0_9 = arith.constant 0 : index
    %12 = vector.load %arg5[%c0_8, %c0_9] : memref<256x128xbf16, #tpu.memory_space<vmem>>, vector<256x128xbf16>
    tpu.vector_store %arg5[%c0_8, %c0_9], %11 {strides = array<i32>} : memref<256x128xbf16, #tpu.memory_space<vmem>>, vector<256x128xbf16>,
    return
  }
  func.func @transform_0(%arg0: i32) -> (i32, i32) {
    %c0_i32 = arith.constant 0 : i32
    %c0_i32_0 = arith.constant 0 : i32
    return %arg0, %c0_i32 : i32, i32
  }
  func.func @transform_1(%arg0: i32) -> (i32, i32) {
    %c0_i32 = arith.constant 0 : i32
    %c0_i32_0 = arith.constant 0 : i32
    %c0_i32_1 = arith.constant 0 : i32
    return %c0_i32, %c0_i32_0 : i32, i32
  }
  func.func @transform_2(%arg0: i32) -> (i32, i32) {
    %c0_i32 = arith.constant 0 : i32
    %c0_i32_0 = arith.constant 0 : i32
    %c0_i32_1 = arith.constant 0 : i32
    return %c0_i32, %c0_i32_0 : i32, i32
  }
  func.func @transform_3(%arg0: i32) -> (i32, i32) {
    %c0_i32 = arith.constant 0 : i32
    %c0_i32_0 = arith.constant 0 : i32
    %c0_i32_1 = arith.constant 0 : i32
    return %c0_i32, %c0_i32_0 : i32, i32
  }
  func.func @transform_4(%arg0: i32) -> (i32, i32) {
    %c0_i32 = arith.constant 0 : i32
    %c0_i32_0 = arith.constant 0 : i32
    return %arg0, %c0_i32 : i32, i32
  }
}

module attributes {stable_mosaic.version = 11 : i64} {
  func.func @_max3_kernel(%arg0: i32, %arg1: memref<256x128xbf16, #tpu.memory_space<vmem>>, %arg2: memref<256x128xbf16, #tpu.memory_space<vmem>>, %arg3: memref<256x128xbf16, #tpu.memory_space<vmem>>, %arg4: memref<256x128xbf16, #tpu.memory_space<vmem>>) attributes {dimension_semantics = [#tpu.dimension_semantics<parallel>], iteration_bounds = array<i64: 1>, scalar_prefetch = 0 : i64, scratch_operands = 0 : i64, tpu.core_type = #tpu.core_type<tc>, window_params = [{transform_indices = @transform_0, window_bounds = array<i64: 256, 128>}, {transform_indices = @transform_1, window_bounds = array<i64: 256, 128>}, {transform_indices = @transform_2, window_bounds = array<i64: 256, 128>}, {transform_indices = @transform_3, window_bounds = array<i64: 256, 128>}]} {
    %c0 = arith.constant 0 : index
    %c0_0 = arith.constant 0 : index
    %0 = vector.load %arg1[%c0, %c0_0] : memref<256x128xbf16, #tpu.memory_space<vmem>>, vector<256x128xbf16>
    %c0_1 = arith.constant 0 : index
    %c0_2 = arith.constant 0 : index
    %1 = vector.load %arg2[%c0_1, %c0_2] : memref<256x128xbf16, #tpu.memory_space<vmem>>, vector<256x128xbf16>
    %2 = arith.maximumf %0, %1 : vector<256x128xbf16>
    %c0_3 = arith.constant 0 : index
    %c0_4 = arith.constant 0 : index
    %3 = vector.load %arg3[%c0_3, %c0_4] : memref<256x128xbf16, #tpu.memory_space<vmem>>, vector<256x128xbf16>
    %4 = arith.maximumf %2, %3 : vector<256x128xbf16>
    %c0_5 = arith.constant 0 : index
    %c0_6 = arith.constant 0 : index
    %5 = vector.load %arg4[%c0_5, %c0_6] : memref<256x128xbf16, #tpu.memory_space<vmem>>, vector<256x128xbf16>
    tpu.vector_store %arg4[%c0_5, %c0_6], %4 {strides = array<i32>} : memref<256x128xbf16, #tpu.memory_space<vmem>>, vector<256x128xbf16>,
    return
  }
  func.func @transform_0(%arg0: i32) -> (i32, i32) {
    %c0_i32 = arith.constant 0 : i32
    %c0_i32_0 = arith.constant 0 : i32
    return %arg0, %c0_i32 : i32, i32
  }
  func.func @transform_1(%arg0: i32) -> (i32, i32) {
    %c0_i32 = arith.constant 0 : i32
    %c0_i32_0 = arith.constant 0 : i32
    return %arg0, %c0_i32 : i32, i32
  }
  func.func @transform_2(%arg0: i32) -> (i32, i32) {
    %c0_i32 = arith.constant 0 : i32
    %c0_i32_0 = arith.constant 0 : i32
    return %arg0, %c0_i32 : i32, i32
  }
  func.func @transform_3(%arg0: i32) -> (i32, i32) {
    %c0_i32 = arith.constant 0 : i32
    %c0_i32_0 = arith.constant 0 : i32
    return %arg0, %c0_i32 : i32, i32
  }
}

module attributes {stable_mosaic.version = 11 : i64} {
  func.func @_max3_kernel(%arg0: i32, %arg1: memref<128x128xbf16, #tpu.memory_space<vmem>>, %arg2: memref<128x128xbf16, #tpu.memory_space<vmem>>, %arg3: memref<128x128xbf16, #tpu.memory_space<vmem>>, %arg4: memref<128x128xbf16, #tpu.memory_space<vmem>>) attributes {dimension_semantics = [#tpu.dimension_semantics<parallel>], iteration_bounds = array<i64: 1>, scalar_prefetch = 0 : i64, scratch_operands = 0 : i64, tpu.core_type = #tpu.core_type<tc>, window_params = [{transform_indices = @transform_0, window_bounds = array<i64: 128, 128>}, {transform_indices = @transform_1, window_bounds = array<i64: 128, 128>}, {transform_indices = @transform_2, window_bounds = array<i64: 128, 128>}, {transform_indices = @transform_3, window_bounds = array<i64: 128, 128>}]} {
    %c0 = arith.constant 0 : index
    %c0_0 = arith.constant 0 : index
    %0 = vector.load %arg1[%c0, %c0_0] : memref<128x128xbf16, #tpu.memory_space<vmem>>, vector<128x128xbf16>
    %c0_1 = arith.constant 0 : index
    %c0_2 = arith.constant 0 : index
    %1 = vector.load %arg2[%c0_1, %c0_2] : memref<128x128xbf16, #tpu.memory_space<vmem>>, vector<128x128xbf16>
    %2 = arith.maximumf %0, %1 : vector<128x128xbf16>
    %c0_3 = arith.constant 0 : index
    %c0_4 = arith.constant 0 : index
    %3 = vector.load %arg3[%c0_3, %c0_4] : memref<128x128xbf16, #tpu.memory_space<vmem>>, vector<128x128xbf16>
    %4 = arith.maximumf %2, %3 : vector<128x128xbf16>
    %c0_5 = arith.constant 0 : index
    %c0_6 = arith.constant 0 : index
    %5 = vector.load %arg4[%c0_5, %c0_6] : memref<128x128xbf16, #tpu.memory_space<vmem>>, vector<128x128xbf16>
    tpu.vector_store %arg4[%c0_5, %c0_6], %4 {strides = array<i32>} : memref<128x128xbf16, #tpu.memory_space<vmem>>, vector<128x128xbf16>,
    return
  }
  func.func @transform_0(%arg0: i32) -> (i32, i32) {
    %c0_i32 = arith.constant 0 : i32
    %c0_i32_0 = arith.constant 0 : i32
    return %arg0, %c0_i32 : i32, i32
  }
  func.func @transform_1(%arg0: i32) -> (i32, i32) {
    %c0_i32 = arith.constant 0 : i32
    %c0_i32_0 = arith.constant 0 : i32
    return %arg0, %c0_i32 : i32, i32
  }
  func.func @transform_2(%arg0: i32) -> (i32, i32) {
    %c0_i32 = arith.constant 0 : i32
    %c0_i32_0 = arith.constant 0 : i32
    return %arg0, %c0_i32 : i32, i32
  }
  func.func @transform_3(%arg0: i32) -> (i32, i32) {
    %c0_i32 = arith.constant 0 : i32
    %c0_i32_0 = arith.constant 0 : i32
    return %arg0, %c0_i32 : i32, i32
  }
}

module attributes {stable_mosaic.version = 11 : i64} {
  func.func @_mm_epi_kernel(%arg0: i32, %arg1: memref<128x128xbf16, #tpu.memory_space<vmem>>, %arg2: memref<128x128xbf16, #tpu.memory_space<vmem>>, %arg3: memref<1x128xf32, #tpu.memory_space<vmem>>, %arg4: memref<1x128xf32, #tpu.memory_space<vmem>>, %arg5: memref<128x128xbf16, #tpu.memory_space<vmem>>) attributes {dimension_semantics = [#tpu.dimension_semantics<parallel>], iteration_bounds = array<i64: 1>, scalar_prefetch = 0 : i64, scratch_operands = 0 : i64, tpu.core_type = #tpu.core_type<tc>, window_params = [{transform_indices = @transform_0, window_bounds = array<i64: 128, 128>}, {pipeline_mode = #tpu.pipeline_mode<synchronous>, transform_indices = @transform_1, window_bounds = array<i64: 128, 128>}, {pipeline_mode = #tpu.pipeline_mode<synchronous>, transform_indices = @transform_2, window_bounds = array<i64: 1, 128>}, {pipeline_mode = #tpu.pipeline_mode<synchronous>, transform_indices = @transform_3, window_bounds = array<i64: 1, 128>}, {transform_indices = @transform_4, window_bounds = array<i64: 128, 128>}]} {
    %c0 = arith.constant 0 : index
    %c0_0 = arith.constant 0 : index
    %0 = vector.load %arg1[%c0, %c0_0] : memref<128x128xbf16, #tpu.memory_space<vmem>>, vector<128x128xbf16>
    %c0_1 = arith.constant 0 : index
    %c0_2 = arith.constant 0 : index
    %1 = vector.load %arg2[%c0_1, %c0_2] : memref<128x128xbf16, #tpu.memory_space<vmem>>, vector<128x128xbf16>
    %cst = arith.constant dense<0.000000e+00> : vector<128x128xf32>
    %2 = tpu.matmul %0, %1, %cst {dimension_numbers = #tpu.dot_dimension_numbers<[1], [0], [0], [1], [0, 0, 1, 1], [], []>} : vector<128x128xbf16>, vector<128x128xbf16>, vector<128x128xf32> -> vector<128x128xf32>
    %c0_3 = arith.constant 0 : index
    %c0_4 = arith.constant 0 : index
    %3 = vector.load %arg3[%c0_3, %c0_4] : memref<1x128xf32, #tpu.memory_space<vmem>>, vector<1x128xf32>
    %4 = vector.broadcast %3 : vector<1x128xf32> to vector<128x128xf32>
    %5 = arith.mulf %2, %4 : vector<128x128xf32>
    %c0_5 = arith.constant 0 : index
    %c0_6 = arith.constant 0 : index
    %6 = vector.load %arg4[%c0_5, %c0_6] : memref<1x128xf32, #tpu.memory_space<vmem>>, vector<1x128xf32>
    %7 = vector.broadcast %6 : vector<1x128xf32> to vector<128x128xf32>
    %8 = arith.addf %5, %7 : vector<128x128xf32>
    %cst_7 = arith.constant 0.000000e+00 : f32
    %9 = vector.broadcast %cst_7 : f32 to vector<128x128xf32>
    %10 = arith.maximumf %8, %9 : vector<128x128xf32>
    %11 = arith.truncf %10 : vector<128x128xf32> to vector<128x128xbf16>
    %c0_8 = arith.constant 0 : index
    %c0_9 = arith.constant 0 : index
    %12 = vector.load %arg5[%c0_8, %c0_9] : memref<128x128xbf16, #tpu.memory_space<vmem>>, vector<128x128xbf16>
    tpu.vector_store %arg5[%c0_8, %c0_9], %11 {strides = array<i32>} : memref<128x128xbf16, #tpu.memory_space<vmem>>, vector<128x128xbf16>,
    return
  }
  func.func @transform_0(%arg0: i32) -> (i32, i32) {
    %c0_i32 = arith.constant 0 : i32
    %c0_i32_0 = arith.constant 0 : i32
    return %arg0, %c0_i32 : i32, i32
  }
  func.func @transform_1(%arg0: i32) -> (i32, i32) {
    %c0_i32 = arith.constant 0 : i32
    %c0_i32_0 = arith.constant 0 : i32
    %c0_i32_1 = arith.constant 0 : i32
    return %c0_i32, %c0_i32_0 : i32, i32
  }
  func.func @transform_2(%arg0: i32) -> (i32, i32) {
    %c0_i32 = arith.constant 0 : i32
    %c0_i32_0 = arith.constant 0 : i32
    %c0_i32_1 = arith.constant 0 : i32
    return %c0_i32, %c0_i32_0 : i32, i32
  }
  func.func @transform_3(%arg0: i32) -> (i32, i32) {
    %c0_i32 = arith.constant 0 : i32
    %c0_i32_0 = arith.constant 0 : i32
    %c0_i32_1 = arith.constant 0 : i32
    return %c0_i32, %c0_i32_0 : i32, i32
  }
  func.func @transform_4(%arg0: i32) -> (i32, i32) {
    %c0_i32 = arith.constant 0 : i32
    %c0_i32_0 = arith.constant 0 : i32
    return %arg0, %c0_i32 : i32, i32
  }
}

module attributes {stable_mosaic.version = 11 : i64} {
  func.func @_mm_epi_kernel(%arg0: i32, %arg1: memref<128x144xbf16, #tpu.memory_space<vmem>>, %arg2: memref<144x128xbf16, #tpu.memory_space<vmem>>, %arg3: memref<1x128xf32, #tpu.memory_space<vmem>>, %arg4: memref<1x128xf32, #tpu.memory_space<vmem>>, %arg5: memref<128x128xbf16, #tpu.memory_space<vmem>>) attributes {dimension_semantics = [#tpu.dimension_semantics<parallel>], iteration_bounds = array<i64: 1>, scalar_prefetch = 0 : i64, scratch_operands = 0 : i64, tpu.core_type = #tpu.core_type<tc>, window_params = [{transform_indices = @transform_0, window_bounds = array<i64: 128, 144>}, {pipeline_mode = #tpu.pipeline_mode<synchronous>, transform_indices = @transform_1, window_bounds = array<i64: 144, 128>}, {pipeline_mode = #tpu.pipeline_mode<synchronous>, transform_indices = @transform_2, window_bounds = array<i64: 1, 128>}, {pipeline_mode = #tpu.pipeline_mode<synchronous>, transform_indices = @transform_3, window_bounds = array<i64: 1, 128>}, {transform_indices = @transform_4, window_bounds = array<i64: 128, 128>}]} {
    %c0 = arith.constant 0 : index
    %c0_0 = arith.constant 0 : index
    %0 = vector.load %arg1[%c0, %c0_0] : memref<128x144xbf16, #tpu.memory_space<vmem>>, vector<128x144xbf16>
    %c0_1 = arith.constant 0 : index
    %c0_2 = arith.constant 0 : index
    %1 = vector.load %arg2[%c0_1, %c0_2] : memref<144x128xbf16, #tpu.memory_space<vmem>>, vector<144x128xbf16>
    %cst = arith.constant dense<0.000000e+00> : vector<128x128xf32>
    %2 = tpu.matmul %0, %1, %cst {dimension_numbers = #tpu.dot_dimension_numbers<[1], [0], [0], [1], [0, 0, 1, 1], [], []>} : vector<128x144xbf16>, vector<144x128xbf16>, vector<128x128xf32> -> vector<128x128xf32>
    %c0_3 = arith.constant 0 : index
    %c0_4 = arith.constant 0 : index
    %3 = vector.load %arg3[%c0_3, %c0_4] : memref<1x128xf32, #tpu.memory_space<vmem>>, vector<1x128xf32>
    %4 = vector.broadcast %3 : vector<1x128xf32> to vector<128x128xf32>
    %5 = arith.mulf %2, %4 : vector<128x128xf32>
    %c0_5 = arith.constant 0 : index
    %c0_6 = arith.constant 0 : index
    %6 = vector.load %arg4[%c0_5, %c0_6] : memref<1x128xf32, #tpu.memory_space<vmem>>, vector<1x128xf32>
    %7 = vector.broadcast %6 : vector<1x128xf32> to vector<128x128xf32>
    %8 = arith.addf %5, %7 : vector<128x128xf32>
    %cst_7 = arith.constant 0.000000e+00 : f32
    %9 = vector.broadcast %cst_7 : f32 to vector<128x128xf32>
    %10 = arith.maximumf %8, %9 : vector<128x128xf32>
    %11 = arith.truncf %10 : vector<128x128xf32> to vector<128x128xbf16>
    %c0_8 = arith.constant 0 : index
    %c0_9 = arith.constant 0 : index
    %12 = vector.load %arg5[%c0_8, %c0_9] : memref<128x128xbf16, #tpu.memory_space<vmem>>, vector<128x128xbf16>
    tpu.vector_store %arg5[%c0_8, %c0_9], %11 {strides = array<i32>} : memref<128x128xbf16, #tpu.memory_space<vmem>>, vector<128x128xbf16>,
    return
  }
  func.func @transform_0(%arg0: i32) -> (i32, i32) {
    %c0_i32 = arith.constant 0 : i32
    %c0_i32_0 = arith.constant 0 : i32
    return %arg0, %c0_i32 : i32, i32
  }
  func.func @transform_1(%arg0: i32) -> (i32, i32) {
    %c0_i32 = arith.constant 0 : i32
    %c0_i32_0 = arith.constant 0 : i32
    %c0_i32_1 = arith.constant 0 : i32
    return %c0_i32, %c0_i32_0 : i32, i32
  }
  func.func @transform_2(%arg0: i32) -> (i32, i32) {
    %c0_i32 = arith.constant 0 : i32
    %c0_i32_0 = arith.constant 0 : i32
    %c0_i32_1 = arith.constant 0 : i32
    return %c0_i32, %c0_i32_0 : i32, i32
  }
  func.func @transform_3(%arg0: i32) -> (i32, i32) {
    %c0_i32 = arith.constant 0 : i32
    %c0_i32_0 = arith.constant 0 : i32
    %c0_i32_1 = arith.constant 0 : i32
    return %c0_i32, %c0_i32_0 : i32, i32
  }
  func.func @transform_4(%arg0: i32) -> (i32, i32) {
    %c0_i32 = arith.constant 0 : i32
    %c0_i32_0 = arith.constant 0 : i32
    return %arg0, %c0_i32 : i32, i32
  }
}

module attributes {stable_mosaic.version = 11 : i64} {
  func.func @_mm_epi_kernel(%arg0: i32, %arg1: memref<128x128xbf16, #tpu.memory_space<vmem>>, %arg2: memref<128x128xbf16, #tpu.memory_space<vmem>>, %arg3: memref<1x128xf32, #tpu.memory_space<vmem>>, %arg4: memref<1x128xf32, #tpu.memory_space<vmem>>, %arg5: memref<128x128xbf16, #tpu.memory_space<vmem>>) attributes {dimension_semantics = [#tpu.dimension_semantics<parallel>], iteration_bounds = array<i64: 1>, scalar_prefetch = 0 : i64, scratch_operands = 0 : i64, tpu.core_type = #tpu.core_type<tc>, window_params = [{transform_indices = @transform_0, window_bounds = array<i64: 128, 128>}, {pipeline_mode = #tpu.pipeline_mode<synchronous>, transform_indices = @transform_1, window_bounds = array<i64: 128, 128>}, {pipeline_mode = #tpu.pipeline_mode<synchronous>, transform_indices = @transform_2, window_bounds = array<i64: 1, 128>}, {pipeline_mode = #tpu.pipeline_mode<synchronous>, transform_indices = @transform_3, window_bounds = array<i64: 1, 128>}, {transform_indices = @transform_4, window_bounds = array<i64: 128, 128>}]} {
    %c0 = arith.constant 0 : index
    %c0_0 = arith.constant 0 : index
    %0 = vector.load %arg1[%c0, %c0_0] : memref<128x128xbf16, #tpu.memory_space<vmem>>, vector<128x128xbf16>
    %c0_1 = arith.constant 0 : index
    %c0_2 = arith.constant 0 : index
    %1 = vector.load %arg2[%c0_1, %c0_2] : memref<128x128xbf16, #tpu.memory_space<vmem>>, vector<128x128xbf16>
    %cst = arith.constant dense<0.000000e+00> : vector<128x128xf32>
    %2 = tpu.matmul %0, %1, %cst {dimension_numbers = #tpu.dot_dimension_numbers<[1], [0], [0], [1], [0, 0, 1, 1], [], []>} : vector<128x128xbf16>, vector<128x128xbf16>, vector<128x128xf32> -> vector<128x128xf32>
    %c0_3 = arith.constant 0 : index
    %c0_4 = arith.constant 0 : index
    %3 = vector.load %arg3[%c0_3, %c0_4] : memref<1x128xf32, #tpu.memory_space<vmem>>, vector<1x128xf32>
    %4 = vector.broadcast %3 : vector<1x128xf32> to vector<128x128xf32>
    %5 = arith.mulf %2, %4 : vector<128x128xf32>
    %c0_5 = arith.constant 0 : index
    %c0_6 = arith.constant 0 : index
    %6 = vector.load %arg4[%c0_5, %c0_6] : memref<1x128xf32, #tpu.memory_space<vmem>>, vector<1x128xf32>
    %7 = vector.broadcast %6 : vector<1x128xf32> to vector<128x128xf32>
    %8 = arith.addf %5, %7 : vector<128x128xf32>
    %9 = arith.truncf %8 : vector<128x128xf32> to vector<128x128xbf16>
    %c0_7 = arith.constant 0 : index
    %c0_8 = arith.constant 0 : index
    %10 = vector.load %arg5[%c0_7, %c0_8] : memref<128x128xbf16, #tpu.memory_space<vmem>>, vector<128x128xbf16>
    tpu.vector_store %arg5[%c0_7, %c0_8], %9 {strides = array<i32>} : memref<128x128xbf16, #tpu.memory_space<vmem>>, vector<128x128xbf16>,
    return
  }
  func.func @transform_0(%arg0: i32) -> (i32, i32) {
    %c0_i32 = arith.constant 0 : i32
    %c0_i32_0 = arith.constant 0 : i32
    return %arg0, %c0_i32 : i32, i32
  }
  func.func @transform_1(%arg0: i32) -> (i32, i32) {
    %c0_i32 = arith.constant 0 : i32
    %c0_i32_0 = arith.constant 0 : i32
    %c0_i32_1 = arith.constant 0 : i32
    return %c0_i32, %c0_i32_0 : i32, i32
  }
  func.func @transform_2(%arg0: i32) -> (i32, i32) {
    %c0_i32 = arith.constant 0 : i32
    %c0_i32_0 = arith.constant 0 : i32
    %c0_i32_1 = arith.constant 0 : i32
    return %c0_i32, %c0_i32_0 : i32, i32
  }
  func.func @transform_3(%arg0: i32) -> (i32, i32) {
    %c0_i32 = arith.constant 0 : i32
    %c0_i32_0 = arith.constant 0 : i32
    %c0_i32_1 = arith.constant 0 : i32
    return %c0_i32, %c0_i32_0 : i32, i32
  }
  func.func @transform_4(%arg0: i32) -> (i32, i32) {
    %c0_i32 = arith.constant 0 : i32
    %c0_i32_0 = arith.constant 0 : i32
    return %arg0, %c0_i32 : i32, i32
  }
}

module attributes {stable_mosaic.version = 11 : i64} {
  func.func @_mm_epi_res_kernel(%arg0: i32, %arg1: memref<128x128xbf16, #tpu.memory_space<vmem>>, %arg2: memref<128x128xbf16, #tpu.memory_space<vmem>>, %arg3: memref<1x128xf32, #tpu.memory_space<vmem>>, %arg4: memref<1x128xf32, #tpu.memory_space<vmem>>, %arg5: memref<128x128xbf16, #tpu.memory_space<vmem>>, %arg6: memref<128x128xbf16, #tpu.memory_space<vmem>>) attributes {dimension_semantics = [#tpu.dimension_semantics<parallel>], iteration_bounds = array<i64: 1>, scalar_prefetch = 0 : i64, scratch_operands = 0 : i64, tpu.core_type = #tpu.core_type<tc>, window_params = [{transform_indices = @transform_0, window_bounds = array<i64: 128, 128>}, {pipeline_mode = #tpu.pipeline_mode<synchronous>, transform_indices = @transform_1, window_bounds = array<i64: 128, 128>}, {pipeline_mode = #tpu.pipeline_mode<synchronous>, transform_indices = @transform_2, window_bounds = array<i64: 1, 128>}, {pipeline_mode = #tpu.pipeline_mode<synchronous>, transform_indices = @transform_3, window_bounds = array<i64: 1, 128>}, {transform_indices = @transform_4, window_bounds = array<i64: 128, 128>}, {transform_indices = @transform_5, window_bounds = array<i64: 128, 128>}]} {
    %c0 = arith.constant 0 : index
    %c0_0 = arith.constant 0 : index
    %0 = vector.load %arg1[%c0, %c0_0] : memref<128x128xbf16, #tpu.memory_space<vmem>>, vector<128x128xbf16>
    %c0_1 = arith.constant 0 : index
    %c0_2 = arith.constant 0 : index
    %1 = vector.load %arg2[%c0_1, %c0_2] : memref<128x128xbf16, #tpu.memory_space<vmem>>, vector<128x128xbf16>
    %cst = arith.constant dense<0.000000e+00> : vector<128x128xf32>
    %2 = tpu.matmul %0, %1, %cst {dimension_numbers = #tpu.dot_dimension_numbers<[1], [0], [0], [1], [0, 0, 1, 1], [], []>} : vector<128x128xbf16>, vector<128x128xbf16>, vector<128x128xf32> -> vector<128x128xf32>
    %c0_3 = arith.constant 0 : index
    %c0_4 = arith.constant 0 : index
    %3 = vector.load %arg3[%c0_3, %c0_4] : memref<1x128xf32, #tpu.memory_space<vmem>>, vector<1x128xf32>
    %4 = vector.broadcast %3 : vector<1x128xf32> to vector<128x128xf32>
    %5 = arith.mulf %2, %4 : vector<128x128xf32>
    %c0_5 = arith.constant 0 : index
    %c0_6 = arith.constant 0 : index
    %6 = vector.load %arg4[%c0_5, %c0_6] : memref<1x128xf32, #tpu.memory_space<vmem>>, vector<1x128xf32>
    %7 = vector.broadcast %6 : vector<1x128xf32> to vector<128x128xf32>
    %8 = arith.addf %5, %7 : vector<128x128xf32>
    %c0_7 = arith.constant 0 : index
    %c0_8 = arith.constant 0 : index
    %9 = vector.load %arg5[%c0_7, %c0_8] : memref<128x128xbf16, #tpu.memory_space<vmem>>, vector<128x128xbf16>
    %10 = arith.extf %9 : vector<128x128xbf16> to vector<128x128xf32>
    %11 = arith.addf %8, %10 : vector<128x128xf32>
    %cst_9 = arith.constant 0.000000e+00 : f32
    %12 = vector.broadcast %cst_9 : f32 to vector<128x128xf32>
    %13 = arith.maximumf %11, %12 : vector<128x128xf32>
    %14 = arith.truncf %13 : vector<128x128xf32> to vector<128x128xbf16>
    %c0_10 = arith.constant 0 : index
    %c0_11 = arith.constant 0 : index
    %15 = vector.load %arg6[%c0_10, %c0_11] : memref<128x128xbf16, #tpu.memory_space<vmem>>, vector<128x128xbf16>
    tpu.vector_store %arg6[%c0_10, %c0_11], %14 {strides = array<i32>} : memref<128x128xbf16, #tpu.memory_space<vmem>>, vector<128x128xbf16>,
    return
  }
  func.func @transform_0(%arg0: i32) -> (i32, i32) {
    %c0_i32 = arith.constant 0 : i32
    %c0_i32_0 = arith.constant 0 : i32
    return %arg0, %c0_i32 : i32, i32
  }
  func.func @transform_1(%arg0: i32) -> (i32, i32) {
    %c0_i32 = arith.constant 0 : i32
    %c0_i32_0 = arith.constant 0 : i32
    %c0_i32_1 = arith.constant 0 : i32
    return %c0_i32, %c0_i32_0 : i32, i32
  }
  func.func @transform_2(%arg0: i32) -> (i32, i32) {
    %c0_i32 = arith.constant 0 : i32
    %c0_i32_0 = arith.constant 0 : i32
    %c0_i32_1 = arith.constant 0 : i32
    return %c0_i32, %c0_i32_0 : i32, i32
  }
  func.func @transform_3(%arg0: i32) -> (i32, i32) {
    %c0_i32 = arith.constant 0 : i32
    %c0_i32_0 = arith.constant 0 : i32
    %c0_i32_1 = arith.constant 0 : i32
    return %c0_i32, %c0_i32_0 : i32, i32
  }
  func.func @transform_4(%arg0: i32) -> (i32, i32) {
    %c0_i32 = arith.constant 0 : i32
    %c0_i32_0 = arith.constant 0 : i32
    return %arg0, %c0_i32 : i32, i32
  }
  func.func @transform_5(%arg0: i32) -> (i32, i32) {
    %c0_i32 = arith.constant 0 : i32
    %c0_i32_0 = arith.constant 0 : i32
    return %arg0, %c0_i32 : i32, i32
  }
}

module attributes {stable_mosaic.version = 11 : i64} {
  func.func @_mm_epi_kernel(%arg0: i32, %arg1: memref<32x288xbf16, #tpu.memory_space<vmem>>, %arg2: memref<288x128xbf16, #tpu.memory_space<vmem>>, %arg3: memref<1x128xf32, #tpu.memory_space<vmem>>, %arg4: memref<1x128xf32, #tpu.memory_space<vmem>>, %arg5: memref<32x128xbf16, #tpu.memory_space<vmem>>) attributes {dimension_semantics = [#tpu.dimension_semantics<parallel>], iteration_bounds = array<i64: 1>, scalar_prefetch = 0 : i64, scratch_operands = 0 : i64, tpu.core_type = #tpu.core_type<tc>, window_params = [{transform_indices = @transform_0, window_bounds = array<i64: 32, 288>}, {pipeline_mode = #tpu.pipeline_mode<synchronous>, transform_indices = @transform_1, window_bounds = array<i64: 288, 128>}, {pipeline_mode = #tpu.pipeline_mode<synchronous>, transform_indices = @transform_2, window_bounds = array<i64: 1, 128>}, {pipeline_mode = #tpu.pipeline_mode<synchronous>, transform_indices = @transform_3, window_bounds = array<i64: 1, 128>}, {transform_indices = @transform_4, window_bounds = array<i64: 32, 128>}]} {
    %c0 = arith.constant 0 : index
    %c0_0 = arith.constant 0 : index
    %0 = vector.load %arg1[%c0, %c0_0] : memref<32x288xbf16, #tpu.memory_space<vmem>>, vector<32x288xbf16>
    %c0_1 = arith.constant 0 : index
    %c0_2 = arith.constant 0 : index
    %1 = vector.load %arg2[%c0_1, %c0_2] : memref<288x128xbf16, #tpu.memory_space<vmem>>, vector<288x128xbf16>
    %cst = arith.constant dense<0.000000e+00> : vector<32x128xf32>
    %2 = tpu.matmul %0, %1, %cst {dimension_numbers = #tpu.dot_dimension_numbers<[1], [0], [0], [1], [0, 0, 1, 1], [], []>} : vector<32x288xbf16>, vector<288x128xbf16>, vector<32x128xf32> -> vector<32x128xf32>
    %c0_3 = arith.constant 0 : index
    %c0_4 = arith.constant 0 : index
    %3 = vector.load %arg3[%c0_3, %c0_4] : memref<1x128xf32, #tpu.memory_space<vmem>>, vector<1x128xf32>
    %4 = vector.broadcast %3 : vector<1x128xf32> to vector<32x128xf32>
    %5 = arith.mulf %2, %4 : vector<32x128xf32>
    %c0_5 = arith.constant 0 : index
    %c0_6 = arith.constant 0 : index
    %6 = vector.load %arg4[%c0_5, %c0_6] : memref<1x128xf32, #tpu.memory_space<vmem>>, vector<1x128xf32>
    %7 = vector.broadcast %6 : vector<1x128xf32> to vector<32x128xf32>
    %8 = arith.addf %5, %7 : vector<32x128xf32>
    %cst_7 = arith.constant 0.000000e+00 : f32
    %9 = vector.broadcast %cst_7 : f32 to vector<32x128xf32>
    %10 = arith.maximumf %8, %9 : vector<32x128xf32>
    %11 = arith.truncf %10 : vector<32x128xf32> to vector<32x128xbf16>
    %c0_8 = arith.constant 0 : index
    %c0_9 = arith.constant 0 : index
    %12 = vector.load %arg5[%c0_8, %c0_9] : memref<32x128xbf16, #tpu.memory_space<vmem>>, vector<32x128xbf16>
    tpu.vector_store %arg5[%c0_8, %c0_9], %11 {strides = array<i32>} : memref<32x128xbf16, #tpu.memory_space<vmem>>, vector<32x128xbf16>,
    return
  }
  func.func @transform_0(%arg0: i32) -> (i32, i32) {
    %c0_i32 = arith.constant 0 : i32
    %c0_i32_0 = arith.constant 0 : i32
    return %arg0, %c0_i32 : i32, i32
  }
  func.func @transform_1(%arg0: i32) -> (i32, i32) {
    %c0_i32 = arith.constant 0 : i32
    %c0_i32_0 = arith.constant 0 : i32
    %c0_i32_1 = arith.constant 0 : i32
    return %c0_i32, %c0_i32_0 : i32, i32
  }
  func.func @transform_2(%arg0: i32) -> (i32, i32) {
    %c0_i32 = arith.constant 0 : i32
    %c0_i32_0 = arith.constant 0 : i32
    %c0_i32_1 = arith.constant 0 : i32
    return %c0_i32, %c0_i32_0 : i32, i32
  }
  func.func @transform_3(%arg0: i32) -> (i32, i32) {
    %c0_i32 = arith.constant 0 : i32
    %c0_i32_0 = arith.constant 0 : i32
    %c0_i32_1 = arith.constant 0 : i32
    return %c0_i32, %c0_i32_0 : i32, i32
  }
  func.func @transform_4(%arg0: i32) -> (i32, i32) {
    %c0_i32 = arith.constant 0 : i32
    %c0_i32_0 = arith.constant 0 : i32
    return %arg0, %c0_i32 : i32, i32
  }
}

module attributes {stable_mosaic.version = 11 : i64} {
  func.func @_mm_epi_res_kernel(%arg0: i32, %arg1: memref<32x128xbf16, #tpu.memory_space<vmem>>, %arg2: memref<128x128xbf16, #tpu.memory_space<vmem>>, %arg3: memref<1x128xf32, #tpu.memory_space<vmem>>, %arg4: memref<1x128xf32, #tpu.memory_space<vmem>>, %arg5: memref<32x128xbf16, #tpu.memory_space<vmem>>, %arg6: memref<32x128xbf16, #tpu.memory_space<vmem>>) attributes {dimension_semantics = [#tpu.dimension_semantics<parallel>], iteration_bounds = array<i64: 1>, scalar_prefetch = 0 : i64, scratch_operands = 0 : i64, tpu.core_type = #tpu.core_type<tc>, window_params = [{transform_indices = @transform_0, window_bounds = array<i64: 32, 128>}, {pipeline_mode = #tpu.pipeline_mode<synchronous>, transform_indices = @transform_1, window_bounds = array<i64: 128, 128>}, {pipeline_mode = #tpu.pipeline_mode<synchronous>, transform_indices = @transform_2, window_bounds = array<i64: 1, 128>}, {pipeline_mode = #tpu.pipeline_mode<synchronous>, transform_indices = @transform_3, window_bounds = array<i64: 1, 128>}, {transform_indices = @transform_4, window_bounds = array<i64: 32, 128>}, {transform_indices = @transform_5, window_bounds = array<i64: 32, 128>}]} {
    %c0 = arith.constant 0 : index
    %c0_0 = arith.constant 0 : index
    %0 = vector.load %arg1[%c0, %c0_0] : memref<32x128xbf16, #tpu.memory_space<vmem>>, vector<32x128xbf16>
    %c0_1 = arith.constant 0 : index
    %c0_2 = arith.constant 0 : index
    %1 = vector.load %arg2[%c0_1, %c0_2] : memref<128x128xbf16, #tpu.memory_space<vmem>>, vector<128x128xbf16>
    %cst = arith.constant dense<0.000000e+00> : vector<32x128xf32>
    %2 = tpu.matmul %0, %1, %cst {dimension_numbers = #tpu.dot_dimension_numbers<[1], [0], [0], [1], [0, 0, 1, 1], [], []>} : vector<32x128xbf16>, vector<128x128xbf16>, vector<32x128xf32> -> vector<32x128xf32>
    %c0_3 = arith.constant 0 : index
    %c0_4 = arith.constant 0 : index
    %3 = vector.load %arg3[%c0_3, %c0_4] : memref<1x128xf32, #tpu.memory_space<vmem>>, vector<1x128xf32>
    %4 = vector.broadcast %3 : vector<1x128xf32> to vector<32x128xf32>
    %5 = arith.mulf %2, %4 : vector<32x128xf32>
    %c0_5 = arith.constant 0 : index
    %c0_6 = arith.constant 0 : index
    %6 = vector.load %arg4[%c0_5, %c0_6] : memref<1x128xf32, #tpu.memory_space<vmem>>, vector<1x128xf32>
    %7 = vector.broadcast %6 : vector<1x128xf32> to vector<32x128xf32>
    %8 = arith.addf %5, %7 : vector<32x128xf32>
    %c0_7 = arith.constant 0 : index
    %c0_8 = arith.constant 0 : index
    %9 = vector.load %arg5[%c0_7, %c0_8] : memref<32x128xbf16, #tpu.memory_space<vmem>>, vector<32x128xbf16>
    %10 = arith.extf %9 : vector<32x128xbf16> to vector<32x128xf32>
    %11 = arith.addf %8, %10 : vector<32x128xf32>
    %cst_9 = arith.constant 0.000000e+00 : f32
    %12 = vector.broadcast %cst_9 : f32 to vector<32x128xf32>
    %13 = arith.maximumf %11, %12 : vector<32x128xf32>
    %14 = arith.truncf %13 : vector<32x128xf32> to vector<32x128xbf16>
    %c0_10 = arith.constant 0 : index
    %c0_11 = arith.constant 0 : index
    %15 = vector.load %arg6[%c0_10, %c0_11] : memref<32x128xbf16, #tpu.memory_space<vmem>>, vector<32x128xbf16>
    tpu.vector_store %arg6[%c0_10, %c0_11], %14 {strides = array<i32>} : memref<32x128xbf16, #tpu.memory_space<vmem>>, vector<32x128xbf16>,
    return
  }
  func.func @transform_0(%arg0: i32) -> (i32, i32) {
    %c0_i32 = arith.constant 0 : i32
    %c0_i32_0 = arith.constant 0 : i32
    return %arg0, %c0_i32 : i32, i32
  }
  func.func @transform_1(%arg0: i32) -> (i32, i32) {
    %c0_i32 = arith.constant 0 : i32
    %c0_i32_0 = arith.constant 0 : i32
    %c0_i32_1 = arith.constant 0 : i32
    return %c0_i32, %c0_i32_0 : i32, i32
  }
  func.func @transform_2(%arg0: i32) -> (i32, i32) {
    %c0_i32 = arith.constant 0 : i32
    %c0_i32_0 = arith.constant 0 : i32
    %c0_i32_1 = arith.constant 0 : i32
    return %c0_i32, %c0_i32_0 : i32, i32
  }
  func.func @transform_3(%arg0: i32) -> (i32, i32) {
    %c0_i32 = arith.constant 0 : i32
    %c0_i32_0 = arith.constant 0 : i32
    %c0_i32_1 = arith.constant 0 : i32
    return %c0_i32, %c0_i32_0 : i32, i32
  }
  func.func @transform_4(%arg0: i32) -> (i32, i32) {
    %c0_i32 = arith.constant 0 : i32
    %c0_i32_0 = arith.constant 0 : i32
    return %arg0, %c0_i32 : i32, i32
  }
  func.func @transform_5(%arg0: i32) -> (i32, i32) {
    %c0_i32 = arith.constant 0 : i32
    %c0_i32_0 = arith.constant 0 : i32
    return %arg0, %c0_i32 : i32, i32
  }
}

module attributes {stable_mosaic.version = 11 : i64} {
  func.func @_mm_epi_kernel(%arg0: i32, %arg1: memref<32x128xbf16, #tpu.memory_space<vmem>>, %arg2: memref<128x128xbf16, #tpu.memory_space<vmem>>, %arg3: memref<1x128xf32, #tpu.memory_space<vmem>>, %arg4: memref<1x128xf32, #tpu.memory_space<vmem>>, %arg5: memref<32x128xbf16, #tpu.memory_space<vmem>>) attributes {dimension_semantics = [#tpu.dimension_semantics<parallel>], iteration_bounds = array<i64: 1>, scalar_prefetch = 0 : i64, scratch_operands = 0 : i64, tpu.core_type = #tpu.core_type<tc>, window_params = [{transform_indices = @transform_0, window_bounds = array<i64: 32, 128>}, {pipeline_mode = #tpu.pipeline_mode<synchronous>, transform_indices = @transform_1, window_bounds = array<i64: 128, 128>}, {pipeline_mode = #tpu.pipeline_mode<synchronous>, transform_indices = @transform_2, window_bounds = array<i64: 1, 128>}, {pipeline_mode = #tpu.pipeline_mode<synchronous>, transform_indices = @transform_3, window_bounds = array<i64: 1, 128>}, {transform_indices = @transform_4, window_bounds = array<i64: 32, 128>}]} {
    %c0 = arith.constant 0 : index
    %c0_0 = arith.constant 0 : index
    %0 = vector.load %arg1[%c0, %c0_0] : memref<32x128xbf16, #tpu.memory_space<vmem>>, vector<32x128xbf16>
    %c0_1 = arith.constant 0 : index
    %c0_2 = arith.constant 0 : index
    %1 = vector.load %arg2[%c0_1, %c0_2] : memref<128x128xbf16, #tpu.memory_space<vmem>>, vector<128x128xbf16>
    %cst = arith.constant dense<0.000000e+00> : vector<32x128xf32>
    %2 = tpu.matmul %0, %1, %cst {dimension_numbers = #tpu.dot_dimension_numbers<[1], [0], [0], [1], [0, 0, 1, 1], [], []>} : vector<32x128xbf16>, vector<128x128xbf16>, vector<32x128xf32> -> vector<32x128xf32>
    %c0_3 = arith.constant 0 : index
    %c0_4 = arith.constant 0 : index
    %3 = vector.load %arg3[%c0_3, %c0_4] : memref<1x128xf32, #tpu.memory_space<vmem>>, vector<1x128xf32>
    %4 = vector.broadcast %3 : vector<1x128xf32> to vector<32x128xf32>
    %5 = arith.mulf %2, %4 : vector<32x128xf32>
    %c0_5 = arith.constant 0 : index
    %c0_6 = arith.constant 0 : index
    %6 = vector.load %arg4[%c0_5, %c0_6] : memref<1x128xf32, #tpu.memory_space<vmem>>, vector<1x128xf32>
    %7 = vector.broadcast %6 : vector<1x128xf32> to vector<32x128xf32>
    %8 = arith.addf %5, %7 : vector<32x128xf32>
    %9 = arith.truncf %8 : vector<32x128xf32> to vector<32x128xbf16>
    %c0_7 = arith.constant 0 : index
    %c0_8 = arith.constant 0 : index
    %10 = vector.load %arg5[%c0_7, %c0_8] : memref<32x128xbf16, #tpu.memory_space<vmem>>, vector<32x128xbf16>
    tpu.vector_store %arg5[%c0_7, %c0_8], %9 {strides = array<i32>} : memref<32x128xbf16, #tpu.memory_space<vmem>>, vector<32x128xbf16>,
    return
  }
  func.func @transform_0(%arg0: i32) -> (i32, i32) {
    %c0_i32 = arith.constant 0 : i32
    %c0_i32_0 = arith.constant 0 : i32
    return %arg0, %c0_i32 : i32, i32
  }
  func.func @transform_1(%arg0: i32) -> (i32, i32) {
    %c0_i32 = arith.constant 0 : i32
    %c0_i32_0 = arith.constant 0 : i32
    %c0_i32_1 = arith.constant 0 : i32
    return %c0_i32, %c0_i32_0 : i32, i32
  }
  func.func @transform_2(%arg0: i32) -> (i32, i32) {
    %c0_i32 = arith.constant 0 : i32
    %c0_i32_0 = arith.constant 0 : i32
    %c0_i32_1 = arith.constant 0 : i32
    return %c0_i32, %c0_i32_0 : i32, i32
  }
  func.func @transform_3(%arg0: i32) -> (i32, i32) {
    %c0_i32 = arith.constant 0 : i32
    %c0_i32_0 = arith.constant 0 : i32
    %c0_i32_1 = arith.constant 0 : i32
    return %c0_i32, %c0_i32_0 : i32, i32
  }
  func.func @transform_4(%arg0: i32) -> (i32, i32) {
    %c0_i32 = arith.constant 0 : i32
    %c0_i32_0 = arith.constant 0 : i32
    return %arg0, %c0_i32 : i32, i32
  }
}

module attributes {stable_mosaic.version = 11 : i64} {
  func.func @_mm_epi_kernel(%arg0: i32, %arg1: memref<32x128xbf16, #tpu.memory_space<vmem>>, %arg2: memref<128x128xbf16, #tpu.memory_space<vmem>>, %arg3: memref<1x128xf32, #tpu.memory_space<vmem>>, %arg4: memref<1x128xf32, #tpu.memory_space<vmem>>, %arg5: memref<32x128xbf16, #tpu.memory_space<vmem>>) attributes {dimension_semantics = [#tpu.dimension_semantics<parallel>], iteration_bounds = array<i64: 1>, scalar_prefetch = 0 : i64, scratch_operands = 0 : i64, tpu.core_type = #tpu.core_type<tc>, window_params = [{transform_indices = @transform_0, window_bounds = array<i64: 32, 128>}, {pipeline_mode = #tpu.pipeline_mode<synchronous>, transform_indices = @transform_1, window_bounds = array<i64: 128, 128>}, {pipeline_mode = #tpu.pipeline_mode<synchronous>, transform_indices = @transform_2, window_bounds = array<i64: 1, 128>}, {pipeline_mode = #tpu.pipeline_mode<synchronous>, transform_indices = @transform_3, window_bounds = array<i64: 1, 128>}, {transform_indices = @transform_4, window_bounds = array<i64: 32, 128>}]} {
    %c0 = arith.constant 0 : index
    %c0_0 = arith.constant 0 : index
    %0 = vector.load %arg1[%c0, %c0_0] : memref<32x128xbf16, #tpu.memory_space<vmem>>, vector<32x128xbf16>
    %c0_1 = arith.constant 0 : index
    %c0_2 = arith.constant 0 : index
    %1 = vector.load %arg2[%c0_1, %c0_2] : memref<128x128xbf16, #tpu.memory_space<vmem>>, vector<128x128xbf16>
    %cst = arith.constant dense<0.000000e+00> : vector<32x128xf32>
    %2 = tpu.matmul %0, %1, %cst {dimension_numbers = #tpu.dot_dimension_numbers<[1], [0], [0], [1], [0, 0, 1, 1], [], []>} : vector<32x128xbf16>, vector<128x128xbf16>, vector<32x128xf32> -> vector<32x128xf32>
    %c0_3 = arith.constant 0 : index
    %c0_4 = arith.constant 0 : index
    %3 = vector.load %arg3[%c0_3, %c0_4] : memref<1x128xf32, #tpu.memory_space<vmem>>, vector<1x128xf32>
    %4 = vector.broadcast %3 : vector<1x128xf32> to vector<32x128xf32>
    %5 = arith.mulf %2, %4 : vector<32x128xf32>
    %c0_5 = arith.constant 0 : index
    %c0_6 = arith.constant 0 : index
    %6 = vector.load %arg4[%c0_5, %c0_6] : memref<1x128xf32, #tpu.memory_space<vmem>>, vector<1x128xf32>
    %7 = vector.broadcast %6 : vector<1x128xf32> to vector<32x128xf32>
    %8 = arith.addf %5, %7 : vector<32x128xf32>
    %cst_7 = arith.constant 0.000000e+00 : f32
    %9 = vector.broadcast %cst_7 : f32 to vector<32x128xf32>
    %10 = arith.maximumf %8, %9 : vector<32x128xf32>
    %11 = arith.truncf %10 : vector<32x128xf32> to vector<32x128xbf16>
    %c0_8 = arith.constant 0 : index
    %c0_9 = arith.constant 0 : index
    %12 = vector.load %arg5[%c0_8, %c0_9] : memref<32x128xbf16, #tpu.memory_space<vmem>>, vector<32x128xbf16>
    tpu.vector_store %arg5[%c0_8, %c0_9], %11 {strides = array<i32>} : memref<32x128xbf16, #tpu.memory_space<vmem>>, vector<32x128xbf16>,
    return
  }
  func.func @transform_0(%arg0: i32) -> (i32, i32) {
    %c0_i32 = arith.constant 0 : i32
    %c0_i32_0 = arith.constant 0 : i32
    return %arg0, %c0_i32 : i32, i32
  }
  func.func @transform_1(%arg0: i32) -> (i32, i32) {
    %c0_i32 = arith.constant 0 : i32
    %c0_i32_0 = arith.constant 0 : i32
    %c0_i32_1 = arith.constant 0 : i32
    return %c0_i32, %c0_i32_0 : i32, i32
  }
  func.func @transform_2(%arg0: i32) -> (i32, i32) {
    %c0_i32 = arith.constant 0 : i32
    %c0_i32_0 = arith.constant 0 : i32
    %c0_i32_1 = arith.constant 0 : i32
    return %c0_i32, %c0_i32_0 : i32, i32
  }
  func.func @transform_3(%arg0: i32) -> (i32, i32) {
    %c0_i32 = arith.constant 0 : i32
    %c0_i32_0 = arith.constant 0 : i32
    %c0_i32_1 = arith.constant 0 : i32
    return %c0_i32, %c0_i32_0 : i32, i32
  }
  func.func @transform_4(%arg0: i32) -> (i32, i32) {
    %c0_i32 = arith.constant 0 : i32
    %c0_i32_0 = arith.constant 0 : i32
    return %arg0, %c0_i32 : i32, i32
  }
}

module attributes {stable_mosaic.version = 11 : i64} {
  func.func @_avgpool_kernel(%arg0: i32, %arg1: memref<2x16x128xbf16, #tpu.memory_space<vmem>>, %arg2: memref<2x128xf32, #tpu.memory_space<vmem>>) attributes {dimension_semantics = [#tpu.dimension_semantics<arbitrary>], iteration_bounds = array<i64: 1>, scalar_prefetch = 0 : i64, scratch_operands = 0 : i64, tpu.core_type = #tpu.core_type<tc>, window_params = [{pipeline_mode = #tpu.pipeline_mode<synchronous>, transform_indices = @transform_0, window_bounds = array<i64: 2, 16, 128>}, {pipeline_mode = #tpu.pipeline_mode<synchronous>, transform_indices = @transform_1, window_bounds = array<i64: 2, 128>}]} {
    %c0 = arith.constant 0 : index
    %c0_0 = arith.constant 0 : index
    %c0_1 = arith.constant 0 : index
    %0 = vector.load %arg1[%c0, %c0_0, %c0_1] : memref<2x16x128xbf16, #tpu.memory_space<vmem>>, vector<2x16x128xbf16>
    %1 = arith.extf %0 : vector<2x16x128xbf16> to vector<2x16x128xf32>
    %cst = arith.constant dense<0.000000e+00> : vector<2x128xf32>
    %2 = vector.multi_reduction <add>, %1, %cst [1] : vector<2x16x128xf32> to vector<2x128xf32>
    %cst_2 = arith.constant 1.600000e+01 : f32
    %3 = vector.broadcast %cst_2 : f32 to vector<2x128xf32>
    %4 = arith.divf %2, %3 : vector<2x128xf32>
    %c0_3 = arith.constant 0 : index
    %c0_4 = arith.constant 0 : index
    %5 = vector.load %arg2[%c0_3, %c0_4] : memref<2x128xf32, #tpu.memory_space<vmem>>, vector<2x128xf32>
    tpu.vector_store %arg2[%c0_3, %c0_4], %4 {strides = array<i32>} : memref<2x128xf32, #tpu.memory_space<vmem>>, vector<2x128xf32>,
    return
  }
  func.func @transform_0(%arg0: i32) -> (i32, i32, i32) {
    %c0_i32 = arith.constant 0 : i32
    %c0_i32_0 = arith.constant 0 : i32
    %c0_i32_1 = arith.constant 0 : i32
    %c0_i32_2 = arith.constant 0 : i32
    return %c0_i32, %c0_i32_0, %c0_i32_1 : i32, i32, i32
  }
  func.func @transform_1(%arg0: i32) -> (i32, i32) {
    %c0_i32 = arith.constant 0 : i32
    %c0_i32_0 = arith.constant 0 : i32
    %c0_i32_1 = arith.constant 0 : i32
    return %c0_i32, %c0_i32_0 : i32, i32
  }
}

module attributes {stable_mosaic.version = 11 : i64} {
  func.func @_mm_epi_kernel(%arg0: i32, %arg1: memref<2x128xf32, #tpu.memory_space<vmem>>, %arg2: memref<128x128xbf16, #tpu.memory_space<vmem>>, %arg3: memref<1x128xf32, #tpu.memory_space<vmem>>, %arg4: memref<1x128xf32, #tpu.memory_space<vmem>>, %arg5: memref<2x128xf32, #tpu.memory_space<vmem>>) attributes {dimension_semantics = [#tpu.dimension_semantics<parallel>], iteration_bounds = array<i64: 1>, scalar_prefetch = 0 : i64, scratch_operands = 0 : i64, tpu.core_type = #tpu.core_type<tc>, window_params = [{transform_indices = @transform_0, window_bounds = array<i64: 2, 128>}, {pipeline_mode = #tpu.pipeline_mode<synchronous>, transform_indices = @transform_1, window_bounds = array<i64: 128, 128>}, {pipeline_mode = #tpu.pipeline_mode<synchronous>, transform_indices = @transform_2, window_bounds = array<i64: 1, 128>}, {pipeline_mode = #tpu.pipeline_mode<synchronous>, transform_indices = @transform_3, window_bounds = array<i64: 1, 128>}, {transform_indices = @transform_4, window_bounds = array<i64: 2, 128>}]} {
    %c0 = arith.constant 0 : index
    %c0_0 = arith.constant 0 : index
    %0 = vector.load %arg1[%c0, %c0_0] : memref<2x128xf32, #tpu.memory_space<vmem>>, vector<2x128xf32>
    %1 = arith.truncf %0 : vector<2x128xf32> to vector<2x128xbf16>
    %c0_1 = arith.constant 0 : index
    %c0_2 = arith.constant 0 : index
    %2 = vector.load %arg2[%c0_1, %c0_2] : memref<128x128xbf16, #tpu.memory_space<vmem>>, vector<128x128xbf16>
    %cst = arith.constant dense<0.000000e+00> : vector<2x128xf32>
    %3 = tpu.matmul %1, %2, %cst {dimension_numbers = #tpu.dot_dimension_numbers<[1], [0], [0], [1], [0, 0, 1, 1], [], []>} : vector<2x128xbf16>, vector<128x128xbf16>, vector<2x128xf32> -> vector<2x128xf32>
    %c0_3 = arith.constant 0 : index
    %c0_4 = arith.constant 0 : index
    %4 = vector.load %arg3[%c0_3, %c0_4] : memref<1x128xf32, #tpu.memory_space<vmem>>, vector<1x128xf32>
    %5 = vector.broadcast %4 : vector<1x128xf32> to vector<2x128xf32>
    %6 = arith.mulf %3, %5 : vector<2x128xf32>
    %c0_5 = arith.constant 0 : index
    %c0_6 = arith.constant 0 : index
    %7 = vector.load %arg4[%c0_5, %c0_6] : memref<1x128xf32, #tpu.memory_space<vmem>>, vector<1x128xf32>
    %8 = vector.broadcast %7 : vector<1x128xf32> to vector<2x128xf32>
    %9 = arith.addf %6, %8 : vector<2x128xf32>
    %c0_7 = arith.constant 0 : index
    %c0_8 = arith.constant 0 : index
    %10 = vector.load %arg5[%c0_7, %c0_8] : memref<2x128xf32, #tpu.memory_space<vmem>>, vector<2x128xf32>
    tpu.vector_store %arg5[%c0_7, %c0_8], %9 {strides = array<i32>} : memref<2x128xf32, #tpu.memory_space<vmem>>, vector<2x128xf32>,
    return
  }
  func.func @transform_0(%arg0: i32) -> (i32, i32) {
    %c0_i32 = arith.constant 0 : i32
    %c0_i32_0 = arith.constant 0 : i32
    return %arg0, %c0_i32 : i32, i32
  }
  func.func @transform_1(%arg0: i32) -> (i32, i32) {
    %c0_i32 = arith.constant 0 : i32
    %c0_i32_0 = arith.constant 0 : i32
    %c0_i32_1 = arith.constant 0 : i32
    return %c0_i32, %c0_i32_0 : i32, i32
  }
  func.func @transform_2(%arg0: i32) -> (i32, i32) {
    %c0_i32 = arith.constant 0 : i32
    %c0_i32_0 = arith.constant 0 : i32
    %c0_i32_1 = arith.constant 0 : i32
    return %c0_i32, %c0_i32_0 : i32, i32
  }
  func.func @transform_3(%arg0: i32) -> (i32, i32) {
    %c0_i32 = arith.constant 0 : i32
    %c0_i32_0 = arith.constant 0 : i32
    %c0_i32_1 = arith.constant 0 : i32
    return %c0_i32, %c0_i32_0 : i32, i32
  }
  func.func @transform_4(%arg0: i32) -> (i32, i32) {
    %c0_i32 = arith.constant 0 : i32
    %c0_i32_0 = arith.constant 0 : i32
    return %arg0, %c0_i32 : i32, i32
  }
}

</mosaic_0001>

<bundles_post_ra>
// kernel: resnext_forward.20
= control target key start
LH: loop header
LB: loop body
LE: loop exit
PB: predicated region body
PF: predicated region fallthrough
CT: control target
= control target key end

     0   :  { %s677_s0 = inlined_call_operand.vmem [shape: bf16[256,128], index: 0, kind: input, shape index: {}]   ;;  %s678_s1 = inlined_call_operand.vmem [shape: bf16[256,128], index: 1, kind: input, shape index: {}]   ;;  %s679_s2 = inlined_call_operand.vmem [shape: bf16[256,128], index: 2, kind: input, shape index: {}]   ;;  %s680_s3 = inlined_call_operand.vmem [shape: bf16[256,128], index: 3, kind: output, shape index: {}]  }
   0x1   :  { %v14_v0 = vld [vmem:[%s677_s0] sm:$0xf]  ;;  %v15_v1 = vld [vmem:[%s677_s0 + $0x4] sm:$0xf]  ;;  %v16_v8 = vld [vmem:[%s677_s0 + $0x8] sm:$0xf] }
   0x2   :  { %v46_v2 = vld [vmem:[%s678_s1] sm:$0xf]  ;;  %v47_v3 = vld [vmem:[%s678_s1 + $0x4] sm:$0xf]  ;;  %v17_v9 = vld [vmem:[%s677_s0 + $0xc] sm:$0xf] }
   0x3   :  { %v78_v4 = vmax.bf16 %v46_v2, %v14_v0  ;;  %v110_v5 = vld [vmem:[%s679_s2] sm:$0xf]  ;;  %v111_v6 = vld [vmem:[%s679_s2 + $0x4] sm:$0xf]  ;;  %v79_v7 = vmax.bf16 %v47_v3, %v15_v1  ;;  %v48_v10 = vld [vmem:[%s678_s1 + $0x8] sm:$0xf] }
   0x4   :  { %v49_v12 = vld [vmem:[%s678_s1 + $0xc] sm:$0xf]  ;;  %v80_v13 = vmax.bf16 %v48_v10, %v16_v8  ;;  %v112_v14 = vld [vmem:[%s679_s2 + $0x8] sm:$0xf]  ;;  %v18_v18 = vld [vmem:[%s677_s0 + $0x10] sm:$0xf] }
   0x5   :  { %v142_v11 = vmax.bf16 %v110_v5, %v78_v4  ;;  %v113_v15 = vld [vmem:[%s679_s2 + $0xc] sm:$0xf]  ;;  %v143_v16 = vmax.bf16 %v111_v6, %v79_v7  ;;  %v81_v17 = vmax.bf16 %v49_v12, %v17_v9  ;;  %v19_v19 = vld [vmem:[%s677_s0 + $0x14] sm:$0xf]  ;;  %v50_v20 = vld [vmem:[%s678_s1 + $0x10] sm:$0xf] }
   0x6   :  { %v144_v21 = vmax.bf16 %v112_v14, %v80_v13  ;;  %v51_v22 = vld [vmem:[%s678_s1 + $0x14] sm:$0xf]  ;;  %v82_v23 = vmax.bf16 %v50_v20, %v18_v18  ;;  %v114_v24 = vld [vmem:[%s679_s2 + $0x10] sm:$0xf]  ;;  %v20_v29 = vld [vmem:[%s677_s0 + $0x18] sm:$0xf] }
   0x7   :  { %v115_v25 = vld [vmem:[%s679_s2 + $0x14] sm:$0xf]  ;;  %v290_v26 = vcombine.low %v142_v11, %v143_v16  ;;  %v145_v27 = vmax.bf16 %v113_v15, %v81_v17  ;;  %v83_v28 = vmax.bf16 %v51_v22, %v19_v19  ;;  %v21_v30 = vld [vmem:[%s677_s0 + $0x1c] sm:$0xf]  ;;  %v52_v31 = vld [vmem:[%s678_s1 + $0x18] sm:$0xf] }
   0x8   :  { %v146_v32 = vmax.bf16 %v114_v24, %v82_v23  ;;  %v53_v33 = vld [vmem:[%s678_s1 + $0x1c] sm:$0xf]  ;;  %v84_v34 = vmax.bf16 %v52_v31, %v20_v29  ;;  %v116_v35 = vld [vmem:[%s679_s2 + $0x18] sm:$0xf]  ;;  %v22_v40 = vld [vmem:[%s677_s0 + $0x20] sm:$0xf] }
   0x9   :  { %v117_v36 = vld [vmem:[%s679_s2 + $0x1c] sm:$0xf]  ;;  %214 = vst [vmem:[%s680_s3] sm:$0xff] %v290_v26   ;;  %v291_v37 = vcombine.low %v144_v21, %v145_v27  ;;  %v147_v38 = vmax.bf16 %v115_v25, %v83_v28  ;;  %v85_v39 = vmax.bf16 %v53_v33, %v21_v30  ;;  %v23_v41 = vld [vmem:[%s677_s0 + $0x24] sm:$0xf]  ;;  %v54_v42 = vld [vmem:[%s678_s1 + $0x20] sm:$0xf] }
   0xa   :  { %v148_v43 = vmax.bf16 %v116_v35, %v84_v34  ;;  %v55_v44 = vld [vmem:[%s678_s1 + $0x24] sm:$0xf]  ;;  %v86_v45 = vmax.bf16 %v54_v42, %v22_v40  ;;  %v118_v46 = vld [vmem:[%s679_s2 + $0x20] sm:$0xf]  ;;  %v24_v51 = vld [vmem:[%s677_s0 + $0x28] sm:$0xf] }
   0xb   :  { %v119_v47 = vld [vmem:[%s679_s2 + $0x24] sm:$0xf]  ;;  %292 = vst [vmem:[%s680_s3 + $0x8] sm:$0xff] %v291_v37   ;;  %v293_v48 = vcombine.low %v146_v32, %v147_v38  ;;  %v149_v49 = vmax.bf16 %v117_v36, %v85_v39  ;;  %v87_v50 = vmax.bf16 %v55_v44, %v23_v41  ;;  %v25_v52 = vld [vmem:[%s677_s0 + $0x2c] sm:$0xf] }
   0xc   :  { %v56_v53 = vld [vmem:[%s678_s1 + $0x28] sm:$0xf]  ;;  %v150_v54 = vmax.bf16 %v118_v46, %v86_v45  ;;  %v57_v55 = vld [vmem:[%s678_s1 + $0x2c] sm:$0xf]  ;;  %v26_v62 = vld [vmem:[%s677_s0 + $0x30] sm:$0xf] }
   0xd   :  { %v88_v56 = vmax.bf16 %v56_v53, %v24_v51  ;;  %v120_v57 = vld [vmem:[%s679_s2 + $0x28] sm:$0xf]  ;;  %v121_v58 = vld [vmem:[%s679_s2 + $0x2c] sm:$0xf]  ;;  %294 = vst [vmem:[%s680_s3 + $0x10] sm:$0xff] %v293_v48   ;;  %v295_v59 = vcombine.low %v148_v43, %v149_v49  ;;  %v151_v60 = vmax.bf16 %v119_v47, %v87_v50  ;;  %v89_v61 = vmax.bf16 %v57_v55, %v25_v52 }
   0xe   :  { %v27_v63 = vld [vmem:[%s677_s0 + $0x34] sm:$0xf]  ;;  %v58_v0 = vld [vmem:[%s678_s1 + $0x30] sm:$0xf]  ;;  %v28_v9 = vld [vmem:[%s677_s0 + $0x38] sm:$0xf] }
   0xf   :  { %v152_v1 = vmax.bf16 %v120_v57, %v88_v56  ;;  %v59_v2 = vld [vmem:[%s678_s1 + $0x34] sm:$0xf]  ;;  %v90_v3 = vmax.bf16 %v58_v0, %v26_v62  ;;  %v122_v4 = vld [vmem:[%s679_s2 + $0x30] sm:$0xf]  ;;  %296 = vst [vmem:[%s680_s3 + $0x18] sm:$0xff] %v295_v59   ;;  %v297_v6 = vcombine.low %v150_v54, %v151_v60  ;;  %v153_v7 = vmax.bf16 %v121_v58, %v89_v61 }
  0x10   :  { %v123_v5 = vld [vmem:[%s679_s2 + $0x34] sm:$0xf]  ;;  %v91_v8 = vmax.bf16 %v59_v2, %v27_v63  ;;  %v29_v10 = vld [vmem:[%s677_s0 + $0x3c] sm:$0xf]  ;;  %v60_v11 = vld [vmem:[%s678_s1 + $0x38] sm:$0xf] }
  0x11   :  { %v154_v12 = vmax.bf16 %v122_v4, %v90_v3  ;;  %v61_v13 = vld [vmem:[%s678_s1 + $0x3c] sm:$0xf]  ;;  %v92_v14 = vmax.bf16 %v60_v11, %v28_v9  ;;  %v124_v15 = vld [vmem:[%s679_s2 + $0x38] sm:$0xf]  ;;  %298 = vst [vmem:[%s680_s3 + $0x20] sm:$0xff] %v297_v6   ;;  %v299_v17 = vcombine.low %v152_v1, %v153_v7 }
  0x12   :  { %v125_v16 = vld [vmem:[%s679_s2 + $0x3c] sm:$0xf]  ;;  %v155_v18 = vmax.bf16 %v123_v5, %v91_v8  ;;  %v93_v19 = vmax.bf16 %v61_v13, %v29_v10  ;;  %v30_v20 = vld [vmem:[%s677_s0 + $0x40] sm:$0xf]  ;;  %v31_v21 = vld [vmem:[%s677_s0 + $0x44] sm:$0xf] }
  0x13   :  { %v62_v22 = vld [vmem:[%s678_s1 + $0x40] sm:$0xf]  ;;  %v156_v23 = vmax.bf16 %v124_v15, %v92_v14  ;;  %v63_v24 = vld [vmem:[%s678_s1 + $0x44] sm:$0xf]  ;;  %300 = vst [vmem:[%s680_s3 + $0x28] sm:$0xff] %v299_v17  }
  0x14   :  { %v94_v25 = vmax.bf16 %v62_v22, %v30_v20  ;;  %v126_v26 = vld [vmem:[%s679_s2 + $0x40] sm:$0xf]  ;;  %v127_v27 = vld [vmem:[%s679_s2 + $0x44] sm:$0xf]  ;;  %v301_v28 = vcombine.low %v154_v12, %v155_v18  ;;  %v157_v29 = vmax.bf16 %v125_v16, %v93_v19  ;;  %v95_v30 = vmax.bf16 %v63_v24, %v31_v21  ;;  %v32_v31 = vld [vmem:[%s677_s0 + $0x48] sm:$0xf] }
  0x15   :  { %v33_v32 = vld [vmem:[%s677_s0 + $0x4c] sm:$0xf]  ;;  %v64_v33 = vld [vmem:[%s678_s1 + $0x48] sm:$0xf]  ;;  %v34_v42 = vld [vmem:[%s677_s0 + $0x50] sm:$0xf] }
  0x16   :  { %v158_v34 = vmax.bf16 %v126_v26, %v94_v25  ;;  %v65_v35 = vld [vmem:[%s678_s1 + $0x4c] sm:$0xf]  ;;  %v96_v36 = vmax.bf16 %v64_v33, %v32_v31  ;;  %v128_v37 = vld [vmem:[%s679_s2 + $0x48] sm:$0xf]  ;;  %302 = vst [vmem:[%s680_s3 + $0x30] sm:$0xff] %v301_v28   ;;  %v303_v39 = vcombine.low %v156_v23, %v157_v29  ;;  %v159_v40 = vmax.bf16 %v127_v27, %v95_v30 }
  0x17   :  { %v129_v38 = vld [vmem:[%s679_s2 + $0x4c] sm:$0xf]  ;;  %v97_v41 = vmax.bf16 %v65_v35, %v33_v32  ;;  %v35_v43 = vld [vmem:[%s677_s0 + $0x54] sm:$0xf]  ;;  %v66_v44 = vld [vmem:[%s678_s1 + $0x50] sm:$0xf] }
  0x18   :  { %v160_v45 = vmax.bf16 %v128_v37, %v96_v36  ;;  %v67_v46 = vld [vmem:[%s678_s1 + $0x54] sm:$0xf]  ;;  %v98_v47 = vmax.bf16 %v66_v44, %v34_v42  ;;  %v130_v48 = vld [vmem:[%s679_s2 + $0x50] sm:$0xf]  ;;  %304 = vst [vmem:[%s680_s3 + $0x38] sm:$0xff] %v303_v39   ;;  %v305_v50 = vcombine.low %v158_v34, %v159_v40 }
  0x19   :  { %v131_v49 = vld [vmem:[%s679_s2 + $0x54] sm:$0xf]  ;;  %v161_v51 = vmax.bf16 %v129_v38, %v97_v41  ;;  %v99_v52 = vmax.bf16 %v67_v46, %v35_v43  ;;  %v36_v53 = vld [vmem:[%s677_s0 + $0x58] sm:$0xf]  ;;  %v37_v54 = vld [vmem:[%s677_s0 + $0x5c] sm:$0xf] }
  0x1a   :  { %v68_v55 = vld [vmem:[%s678_s1 + $0x58] sm:$0xf]  ;;  %v162_v56 = vmax.bf16 %v130_v48, %v98_v47  ;;  %v69_v57 = vld [vmem:[%s678_s1 + $0x5c] sm:$0xf]  ;;  %306 = vst [vmem:[%s680_s3 + $0x40] sm:$0xff] %v305_v50  }
  0x1b   :  { %v100_v58 = vmax.bf16 %v68_v55, %v36_v53  ;;  %v132_v59 = vld [vmem:[%s679_s2 + $0x58] sm:$0xf]  ;;  %v133_v60 = vld [vmem:[%s679_s2 + $0x5c] sm:$0xf]  ;;  %v307_v61 = vcombine.low %v160_v45, %v161_v51  ;;  %v163_v62 = vmax.bf16 %v131_v49, %v99_v52  ;;  %v101_v63 = vmax.bf16 %v69_v57, %v37_v54  ;;  %v38_v0 = vld [vmem:[%s677_s0 + $0x60] sm:$0xf] }
  0x1c   :  { %v39_v1 = vld [vmem:[%s677_s0 + $0x64] sm:$0xf]  ;;  %v70_v2 = vld [vmem:[%s678_s1 + $0x60] sm:$0xf]  ;;  %v40_v11 = vld [vmem:[%s677_s0 + $0x68] sm:$0xf] }
  0x1d   :  { %v164_v3 = vmax.bf16 %v132_v59, %v100_v58  ;;  %v71_v4 = vld [vmem:[%s678_s1 + $0x64] sm:$0xf]  ;;  %v102_v5 = vmax.bf16 %v70_v2, %v38_v0  ;;  %v134_v6 = vld [vmem:[%s679_s2 + $0x60] sm:$0xf]  ;;  %308 = vst [vmem:[%s680_s3 + $0x48] sm:$0xff] %v307_v61   ;;  %v309_v8 = vcombine.low %v162_v56, %v163_v62  ;;  %v165_v9 = vmax.bf16 %v133_v60, %v101_v63 }
  0x1e   :  { %v135_v7 = vld [vmem:[%s679_s2 + $0x64] sm:$0xf]  ;;  %v103_v10 = vmax.bf16 %v71_v4, %v39_v1  ;;  %v41_v12 = vld [vmem:[%s677_s0 + $0x6c] sm:$0xf]  ;;  %v72_v13 = vld [vmem:[%s678_s1 + $0x68] sm:$0xf] }
  0x1f   :  { %v166_v14 = vmax.bf16 %v134_v6, %v102_v5  ;;  %v73_v15 = vld [vmem:[%s678_s1 + $0x6c] sm:$0xf]  ;;  %v104_v16 = vmax.bf16 %v72_v13, %v40_v11  ;;  %v136_v17 = vld [vmem:[%s679_s2 + $0x68] sm:$0xf]  ;;  %310 = vst [vmem:[%s680_s3 + $0x50] sm:$0xff] %v309_v8   ;;  %v311_v19 = vcombine.low %v164_v3, %v165_v9 }
  0x20   :  { %v137_v18 = vld [vmem:[%s679_s2 + $0x6c] sm:$0xf]  ;;  %v167_v20 = vmax.bf16 %v135_v7, %v103_v10  ;;  %v105_v21 = vmax.bf16 %v73_v15, %v41_v12  ;;  %v42_v22 = vld [vmem:[%s677_s0 + $0x70] sm:$0xf]  ;;  %v43_v23 = vld [vmem:[%s677_s0 + $0x74] sm:$0xf] }
  0x21   :  { %v74_v24 = vld [vmem:[%s678_s1 + $0x70] sm:$0xf]  ;;  %v168_v25 = vmax.bf16 %v136_v17, %v104_v16  ;;  %v75_v26 = vld [vmem:[%s678_s1 + $0x74] sm:$0xf]  ;;  %312 = vst [vmem:[%s680_s3 + $0x58] sm:$0xff] %v311_v19  }
  0x22   :  { %v106_v27 = vmax.bf16 %v74_v24, %v42_v22  ;;  %v138_v28 = vld [vmem:[%s679_s2 + $0x70] sm:$0xf]  ;;  %v139_v29 = vld [vmem:[%s679_s2 + $0x74] sm:$0xf]  ;;  %v313_v30 = vcombine.low %v166_v14, %v167_v20  ;;  %v169_v31 = vmax.bf16 %v137_v18, %v105_v21  ;;  %v107_v32 = vmax.bf16 %v75_v26, %v43_v23  ;;  %v44_v33 = vld [vmem:[%s677_s0 + $0x78] sm:$0xf] }
  0x23   :  { %v45_v34 = vld [vmem:[%s677_s0 + $0x7c] sm:$0xf]  ;;  %v76_v35 = vld [vmem:[%s678_s1 + $0x78] sm:$0xf] }
  0x24   :  { %v170_v36 = vmax.bf16 %v138_v28, %v106_v27  ;;  %v77_v37 = vld [vmem:[%s678_s1 + $0x7c] sm:$0xf]  ;;  %v108_v38 = vmax.bf16 %v76_v35, %v44_v33  ;;  %v140_v39 = vld [vmem:[%s679_s2 + $0x78] sm:$0xf]  ;;  %314 = vst [vmem:[%s680_s3 + $0x60] sm:$0xff] %v313_v30   ;;  %v315_v41 = vcombine.low %v168_v25, %v169_v31  ;;  %v171_v42 = vmax.bf16 %v139_v29, %v107_v32 }
  0x25   :  { %v141_v40 = vld [vmem:[%s679_s2 + $0x7c] sm:$0xf]  ;;  %v109_v43 = vmax.bf16 %v77_v37, %v45_v34 }
  0x26   :  { %v172_v44 = vmax.bf16 %v140_v39, %v108_v38  ;;  %316 = vst [vmem:[%s680_s3 + $0x68] sm:$0xff] %v315_v41   ;;  %v317_v45 = vcombine.low %v170_v36, %v171_v42 }
  0x27   :  { %v173_v46 = vmax.bf16 %v141_v40, %v109_v43 }
  0x28   :  { %318 = vst [vmem:[%s680_s3 + $0x70] sm:$0xff] %v317_v45  }
  0x29   :  { %v319_v47 = vcombine.low %v172_v44, %v173_v46 }
  0x2b   :  { %320 = vst [vmem:[%s680_s3 + $0x78] sm:$0xff] %v319_v47  }

// kernel: resnext_forward.19
= control target key start
LH: loop header
LB: loop body
LE: loop exit
PB: predicated region body
PF: predicated region fallthrough
CT: control target
= control target key end

     0   :  { %s1197_s15 = smov 0   ;;  %s1353_s0 = inlined_call_operand.vmem [shape: bf16[512,27], index: 0, kind: input, shape index: {}]   ;;  %s1354_s1 = inlined_call_operand.vmem [shape: bf16[27,128], index: 1, kind: input, shape index: {}]   ;;  %s1355_s2 = inlined_call_operand.vmem [shape: f32[1,128], index: 2, kind: input, shape index: {}]   ;;  %s1356_s3 = inlined_call_operand.vmem [shape: f32[1,128], index: 3, kind: input, shape index: {}]   ;;  %s1357_s4 = inlined_call_operand.vmem [shape: bf16[512,128], index: 4, kind: output, shape index: {}]  }
   0x1 LB: > { %s872_s16 = sadd.s32 4294967295, %s1169_s15   ;;  %p876_p0 = scmp.ge.s32.totalorder %s1169_s15, 1  ;;  %s1169_s15 = sphi %s1197_s15, %s14_s15  }
   0x2   : > { %p163_p1 = scmp.lt.s32.totalorder %s1169_s15, 3 }
   0x4   : > { %p164_p2 = pnand %p876_p0, %p163_p1 }
   0x5   : > { %s877_s19 = sshll.u32 (!%p164_p2), %s872_s16, 5 }
   0x6   : > { %167 = sbr.rel (%p164_p2) target bundleno = 256 (0x100), region = 36  ;;  %p190_p3 = scmp.lt.s32.totalorder (!%p164_p2), %s877_s19, 63 }
   0xb   : > { %v1145_v0 = vld [vmem:[%s1354_s1 + $0x8] sm:$0x3f]   ;;  %vm378_vm0 = vcmask 1044480   ;;  %vm379_vm1 = vcmask 1045504   ;;  %v1171_v1 = vmov 65535   ;;  %v1146_v5 = vld [vmem:[%s1354_s1] sm:$0xff]  }
   0xc   : > { %v380_v2 = vsel %vm378_vm0, 4294967295, %v1171_v1  ;;  %s1359_s19 = smov (!%p190_p3, %s877_s19), 63  ;;  %vm329_vm2 = vcmask 220160   ;;  %v1256_v22 = vld [vmem:[%s1355_s2] ss:$0 sm:$0xff] }
   0xd   : > { %v381_v3 = vsel %vm379_vm1, %v380_v2, 0  ;;  %s878_s22 = sshll.u32 %s1359_s19, 2  ;;  %v1263_v27 = vld [vmem:[%s1356_s3] ss:$0 sm:$0xff] }
   0xe   : > { %v383_v4 = vand.u32 %v1145_v0, %v381_v3  ;;  %s1219_s25 = scalar_lea.vmem %s1353_s0, %s878_s22  ;;  %s1286_s6 = scalar_lea.vmem %s1357_s4, %s878_s22 }
   0xf   : > { %v1147_v6 = vld [vmem:[%s1219_s25] sm:$0xff]   ;;  %v1149_v8 = vld [vmem:[%s1219_s25 + $0x8] sm:$0xff]   ;;  %v1151_v10 = vld [vmem:[%s1219_s25 + $0x10] sm:$0xff]  }
  0x10   : > { %1096 = vmatprep.subr.bf16.mxu0 %v383_v4  ;;  %1132 = vmatprep.subr.bf16.mxu1 %v383_v4  ;;  %v1148_v7 = vld [vmem:[%s1219_s25 + $0x40] sm:$0xff]   ;;  %v1150_v9 = vld [vmem:[%s1219_s25 + $0x48] sm:$0xff]   ;;  %v1152_v11 = vld [vmem:[%s1219_s25 + $0x50] sm:$0xff]  }
  0x11   : > { %1097 = vmatpush3.bf16.msra.mxu0 %v383_v4  ;;  %1134 = vmatpush3.bf16.msra.mxu1 %v383_v4  ;;  %v1153_v12 = vld [vmem:[%s1219_s25 + $0x18] sm:$0xff]   ;;  %v1155_v14 = vld [vmem:[%s1219_s25 + $0x20] sm:$0xff]   ;;  %v1157_v16 = vld [vmem:[%s1219_s25 + $0x28] sm:$0xff]  }
  0x12   : > { %1098 = vmatprep.subr.bf16.mxu0 %v1146_v5  ;;  %1133 = vmatprep.subr.bf16.mxu1 %v1146_v5  ;;  %v1154_v13 = vld [vmem:[%s1219_s25 + $0x58] sm:$0xff]   ;;  %v1156_v15 = vld [vmem:[%s1219_s25 + $0x60] sm:$0xff]   ;;  %v1158_v17 = vld [vmem:[%s1219_s25 + $0x68] sm:$0xff]  }
  0x13   : > { %1100 = vmatprep.mubr.msk.bf16.mxu0 %vm329_vm2, %v1147_v6  ;;  %1116 = vmatprep.mubr.msk.bf16.mxu1 %vm329_vm2, %v1148_v7  ;;  %v1159_v18 = vld [vmem:[%s1219_s25 + $0x30] sm:$0xff]   ;;  %v1161_v20 = vld [vmem:[%s1219_s25 + $0x38] sm:$0xff]  }
  0x14   : > { %v1160_v19 = vld [vmem:[%s1219_s25 + $0x70] sm:$0xff]   ;;  %v1162_v21 = vld [vmem:[%s1219_s25 + $0x78] sm:$0xff]  }
  0x15   : > { %1099 = vmatpush3.bf16.msra.mxu0 %v1146_v5  ;;  %1135 = vmatpush3.bf16.msra.mxu1 %v1146_v5 }
  0x18   : > { %1101 = vmatmul.mubr.msk.bf16.vlgmr.msra.gmra.mxu0 %vm329_vm2, %v1149_v8  ;;  %1117 = vmatmul.mubr.msk.bf16.vlgmr.msra.gmra.mxu1 %vm329_vm2, %v1150_v9 }
  0x19   : > { %1104 = vmatprep.mubr.msk.bf16.mxu0 %vm329_vm2, %v1151_v10  ;;  %1120 = vmatprep.mubr.msk.bf16.mxu1 %vm329_vm2, %v1152_v11 }
  0x20   : > { %1105 = vmatmul.mubr.msk.bf16.gmra.mxu0 %vm329_vm2, %v1153_v12  ;;  %1121 = vmatmul.mubr.msk.bf16.gmra.mxu1 %vm329_vm2, %v1154_v13 }
  0x21   : > { %1108 = vmatprep.mubr.msk.bf16.mxu0 %vm329_vm2, %v1155_v14  ;;  %1124 = vmatprep.mubr.msk.bf16.mxu1 %vm329_vm2, %v1156_v15 }
  0x28   : > { %1109 = vmatmul.mubr.msk.bf16.gmra.mxu0 %vm329_vm2, %v1157_v16  ;;  %1125 = vmatmul.mubr.msk.bf16.gmra.mxu1 %vm329_vm2, %v1158_v17 }
  0x29   : > { %1112 = vmatprep.mubr.msk.bf16.mxu0 %vm329_vm2, %v1159_v18  ;;  %1128 = vmatprep.mubr.msk.bf16.mxu1 %vm329_vm2, %v1160_v19 }
  0x30   : > { %1113 = vmatmul.mubr.msk.bf16.gmra.mxu0 %vm329_vm2, %v1161_v20  ;;  %1129 = vmatmul.mubr.msk.bf16.gmra.mxu1 %vm329_vm2, %v1162_v21 }
  0xd8   : > { %v1102_v23 = vpop.f32.mrf.mxu0  ;;  %v1118_v24 = vpop.f32.mrf.mxu1 }
  0xd9   : > { %v555_v25 = vmul.f32 %v1102_v23, %v1256_v22  ;;  %v571_v26 = vmul.f32 %v1118_v24, %v1256_v22 }
  0xda   : > { %v419_v28 = vpop.f32.mrf.mxu0  ;;  %v483_v29 = vpop.f32.mrf.mxu1 }
  0xdb   : > { %v553_v30 = vmul.f32 %v1256_v22, %v419_v28  ;;  %v569_v31 = vmul.f32 %v1256_v22, %v483_v29  ;;  %v594_v34 = vadd.f32 %v1263_v27, %v555_v25  ;;  %v610_v35 = vadd.f32 %v1263_v27, %v571_v26 }
  0xdc   : > { %v1103_v32 = vpop.f32.mrf.mxu0  ;;  %v1119_v33 = vpop.f32.mrf.mxu1 }
  0xdd   : > { %v556_v36 = vmul.f32 %v1103_v32, %v1256_v22  ;;  %v572_v37 = vmul.f32 %v1119_v33, %v1256_v22  ;;  %v592_v40 = vadd.f32 %v1263_v27, %v553_v30  ;;  %v608_v41 = vadd.f32 %v1263_v27, %v569_v31 }
  0xde   : > { %v422_v38 = vpop.f32.mrf.mxu0  ;;  %v486_v39 = vpop.f32.mrf.mxu1  ;;  %v626_v48 = vmax.f32 %v594_v34, 0.0  ;;  %v642_v49 = vmax.f32 %v610_v35, 0.0 }
  0xdf   : > { %v554_v42 = vmul.f32 %v1256_v22, %v422_v38  ;;  %v570_v43 = vmul.f32 %v1256_v22, %v486_v39  ;;  %v595_v44 = vadd.f32 %v1263_v27, %v556_v36  ;;  %v611_v45 = vadd.f32 %v1263_v27, %v572_v37 }
  0xe0   : > { %v1106_v46 = vpop.f32.mrf.mxu0  ;;  %v1122_v47 = vpop.f32.mrf.mxu1  ;;  %v624_v58 = vmax.f32 %v592_v40, 0.0  ;;  %v640_v59 = vmax.f32 %v608_v41, 0.0 }
  0xe1   : > { %v593_v50 = vadd.f32 %v1263_v27, %v554_v42  ;;  %v609_v51 = vadd.f32 %v1263_v27, %v570_v43  ;;  %v627_v52 = vmax.f32 %v595_v44, 0.0  ;;  %v643_v53 = vmax.f32 %v611_v45, 0.0 }
  0xe2   : > { %v559_v54 = vmul.f32 %v1106_v46, %v1256_v22  ;;  %v575_v55 = vmul.f32 %v1122_v47, %v1256_v22  ;;  %v435_v56 = vpop.f32.mrf.mxu0  ;;  %v499_v57 = vpop.f32.mrf.mxu1 }
  0xe3   : > { %v625_v60 = vmax.f32 %v593_v50, 0.0  ;;  %v641_v61 = vmax.f32 %v609_v51, 0.0  ;;  %v991_v62 = vpack.c.bf16 %v627_v52, %v626_v48  ;;  %v1031_v63 = vpack.c.bf16 %v643_v53, %v642_v49 }
  0xe4   : > { %v557_v0 = vmul.f32 %v1256_v22, %v435_v56  ;;  %v573_v1 = vmul.f32 %v1256_v22, %v499_v57  ;;  %v1107_v2 = vpop.f32.mrf.mxu0  ;;  %v1123_v3 = vpop.f32.mrf.mxu1  ;;  %v598_v6 = vadd.f32 %v1263_v27, %v559_v54  ;;  %v614_v7 = vadd.f32 %v1263_v27, %v575_v55 }
  0xe5   : > { %v986_v4 = vpack.c.bf16 %v625_v60, %v624_v58  ;;  %v1026_v5 = vpack.c.bf16 %v641_v61, %v640_v59  ;;  %1063 = vst [vmem:[%s1286_s6 + $0x8] sm:$0xff] %v991_v62   ;;  %1071 = vst [vmem:[%s1286_s6 + $0x48] sm:$0xff] %v1031_v63   ;;  %v560_v8 = vmul.f32 %v1107_v2, %v1256_v22 }
  0xe6   : > { %v576_v9 = vmul.f32 %v1123_v3, %v1256_v22  ;;  %v438_v10 = vpop.f32.mrf.mxu0  ;;  %v502_v11 = vpop.f32.mrf.mxu1  ;;  %v596_v12 = vadd.f32 %v1263_v27, %v557_v0  ;;  %v612_v13 = vadd.f32 %v1263_v27, %v573_v1  ;;  %v630_v25 = vmax.f32 %v598_v6, 0.0 }
  0xe7   : > { %987 = vst [vmem:[%s1286_s6] sm:$0xff] %v986_v4   ;;  %1070 = vst [vmem:[%s1286_s6 + $0x40] sm:$0xff] %v1026_v5   ;;  %v558_v14 = vmul.f32 %v1256_v22, %v438_v10  ;;  %v574_v15 = vmul.f32 %v1256_v22, %v502_v11  ;;  %v599_v16 = vadd.f32 %v1263_v27, %v560_v8  ;;  %v646_v26 = vmax.f32 %v614_v7, 0.0 }
  0xe8   : > { %v615_v17 = vadd.f32 %v1263_v27, %v576_v9  ;;  %v1110_v18 = vpop.f32.mrf.mxu0  ;;  %v1126_v19 = vpop.f32.mrf.mxu1  ;;  %v628_v32 = vmax.f32 %v596_v12, 0.0  ;;  %v644_v33 = vmax.f32 %v612_v13, 0.0 }
  0xe9   : > { %v597_v20 = vadd.f32 %v1263_v27, %v558_v14  ;;  %v613_v21 = vadd.f32 %v1263_v27, %v574_v15  ;;  %v563_v23 = vmul.f32 %v1110_v18, %v1256_v22  ;;  %v579_v24 = vmul.f32 %v1126_v19, %v1256_v22 }
  0xea   : > { %v631_v28 = vmax.f32 %v599_v16, 0.0  ;;  %v647_v29 = vmax.f32 %v615_v17, 0.0  ;;  %v451_v30 = vpop.f32.mrf.mxu0  ;;  %v515_v31 = vpop.f32.mrf.mxu1 }
  0xeb   : > { %v629_v34 = vmax.f32 %v597_v20, 0.0  ;;  %v645_v35 = vmax.f32 %v613_v21, 0.0  ;;  %v561_v38 = vmul.f32 %v1256_v22, %v451_v30  ;;  %v577_v39 = vmul.f32 %v1256_v22, %v515_v31 }
  0xec   : > { %v1001_v36 = vpack.c.bf16 %v631_v28, %v630_v25  ;;  %v1041_v37 = vpack.c.bf16 %v647_v29, %v646_v26  ;;  %v1111_v40 = vpop.f32.mrf.mxu0  ;;  %v1127_v41 = vpop.f32.mrf.mxu1  ;;  %v602_v44 = vadd.f32 %v1263_v27, %v563_v23  ;;  %v618_v45 = vadd.f32 %v1263_v27, %v579_v24 }
  0xed   : > { %v996_v42 = vpack.c.bf16 %v629_v34, %v628_v32  ;;  %v1036_v43 = vpack.c.bf16 %v645_v35, %v644_v33  ;;  %v564_v46 = vmul.f32 %v1111_v40, %v1256_v22  ;;  %v580_v47 = vmul.f32 %v1127_v41, %v1256_v22 }
  0xee   : > { %1065 = vst [vmem:[%s1286_s6 + $0x18] sm:$0xff] %v1001_v36   ;;  %1073 = vst [vmem:[%s1286_s6 + $0x58] sm:$0xff] %v1041_v37   ;;  %v454_v48 = vpop.f32.mrf.mxu0  ;;  %v518_v49 = vpop.f32.mrf.mxu1  ;;  %v600_v50 = vadd.f32 %v1263_v27, %v561_v38  ;;  %v616_v51 = vadd.f32 %v1263_v27, %v577_v39  ;;  %v634_v58 = vmax.f32 %v602_v44, 0.0  ;;  %v650_v59 = vmax.f32 %v618_v45, 0.0 }
  0xef   : > { %1064 = vst [vmem:[%s1286_s6 + $0x10] sm:$0xff] %v996_v42   ;;  %1072 = vst [vmem:[%s1286_s6 + $0x50] sm:$0xff] %v1036_v43   ;;  %v562_v52 = vmul.f32 %v1256_v22, %v454_v48  ;;  %v578_v53 = vmul.f32 %v1256_v22, %v518_v49  ;;  %v603_v54 = vadd.f32 %v1263_v27, %v564_v46 }
  0xf0   : > { %v619_v55 = vadd.f32 %v1263_v27, %v580_v47  ;;  %v1114_v56 = vpop.f32.mrf.mxu0  ;;  %v1130_v57 = vpop.f32.mrf.mxu1  ;;  %v632_v4 = vmax.f32 %v600_v50, 0.0  ;;  %v648_v5 = vmax.f32 %v616_v51, 0.0 }
  0xf1   : > { %v601_v60 = vadd.f32 %v1263_v27, %v562_v52  ;;  %v617_v61 = vadd.f32 %v1263_v27, %v578_v53  ;;  %v635_v62 = vmax.f32 %v603_v54, 0.0  ;;  %v567_v0 = vmul.f32 %v1114_v56, %v1256_v22 }
  0xf2   : > { %v651_v63 = vmax.f32 %v619_v55, 0.0  ;;  %v583_v1 = vmul.f32 %v1130_v57, %v1256_v22  ;;  %v467_v2 = vpop.f32.mrf.mxu0  ;;  %v531_v3 = vpop.f32.mrf.mxu1 }
  0xf3   : > { %v633_v6 = vmax.f32 %v601_v60, 0.0  ;;  %v649_v7 = vmax.f32 %v617_v61, 0.0  ;;  %v1011_v8 = vpack.c.bf16 %v635_v62, %v634_v58  ;;  %v565_v10 = vmul.f32 %v1256_v22, %v467_v2 }
  0xf4   : > { %v1051_v9 = vpack.c.bf16 %v651_v63, %v650_v59  ;;  %v581_v11 = vmul.f32 %v1256_v22, %v531_v3  ;;  %v1115_v12 = vpop.f32.mrf.mxu0  ;;  %v1131_v13 = vpop.f32.mrf.mxu1  ;;  %v606_v16 = vadd.f32 %v1263_v27, %v567_v0  ;;  %v622_v17 = vadd.f32 %v1263_v27, %v583_v1 }
  0xf5   : > { %v1006_v14 = vpack.c.bf16 %v633_v6, %v632_v4  ;;  %v1046_v15 = vpack.c.bf16 %v649_v7, %v648_v5  ;;  %1067 = vst [vmem:[%s1286_s6 + $0x28] sm:$0xff] %v1011_v8   ;;  %v568_v18 = vmul.f32 %v1115_v12, %v1256_v22  ;;  %v584_v19 = vmul.f32 %v1131_v13, %v1256_v22 }
  0xf6   : > { %1075 = vst [vmem:[%s1286_s6 + $0x68] sm:$0xff] %v1051_v9   ;;  %v470_v20 = vpop.f32.mrf.mxu0  ;;  %v534_v21 = vpop.f32.mrf.mxu1  ;;  %v604_v23 = vadd.f32 %v1263_v27, %v565_v10  ;;  %v620_v24 = vadd.f32 %v1263_v27, %v581_v11  ;;  %v638_v32 = vmax.f32 %v606_v16, 0.0  ;;  %v654_v33 = vmax.f32 %v622_v17, 0.0 }
  0xf7   : > { %1066 = vst [vmem:[%s1286_s6 + $0x20] sm:$0xff] %v1006_v14   ;;  %1074 = vst [vmem:[%s1286_s6 + $0x60] sm:$0xff] %v1046_v15   ;;  %v566_v25 = vmul.f32 %v1256_v22, %v470_v20  ;;  %v582_v26 = vmul.f32 %v1256_v22, %v534_v21  ;;  %v607_v28 = vadd.f32 %v1263_v27, %v568_v18 }
  0xf8   : > { %v623_v29 = vadd.f32 %v1263_v27, %v584_v19  ;;  %v636_v36 = vmax.f32 %v604_v23, 0.0  ;;  %v652_v37 = vmax.f32 %v620_v24, 0.0 }
  0xf9   : > { %v605_v30 = vadd.f32 %v1263_v27, %v566_v25  ;;  %v621_v31 = vadd.f32 %v1263_v27, %v582_v26  ;;  %v639_v34 = vmax.f32 %v607_v28, 0.0 }
  0xfa   : > { %v655_v35 = vmax.f32 %v623_v29, 0.0 }
  0xfb   : > { %v637_v38 = vmax.f32 %v605_v30, 0.0  ;;  %v653_v22 = vmax.f32 %v621_v31, 0.0  ;;  %v1021_v39 = vpack.c.bf16 %v639_v34, %v638_v32 }
  0xfc   : > { %v1061_v40 = vpack.c.bf16 %v655_v35, %v654_v33 }
  0xfd   : > { %v1016_v41 = vpack.c.bf16 %v637_v38, %v636_v36  ;;  %v1056_v42 = vpack.c.bf16 %v653_v22, %v652_v37  ;;  %1069 = vst [vmem:[%s1286_s6 + $0x38] sm:$0xff] %v1021_v39  }
  0xfe   : > { %1077 = vst [vmem:[%s1286_s6 + $0x78] sm:$0xff] %v1061_v40  }
  0xff   : > { %1068 = vst [vmem:[%s1286_s6 + $0x30] sm:$0xff] %v1016_v41   ;;  %1076 = vst [vmem:[%s1286_s6 + $0x70] sm:$0xff] %v1056_v42  }
 0x100 PF: > { %s14_s15 = sadd.s32 1, %s1169_s15  }
 0x101   : > { %p11_p4 = scmp.ge.s32.totalorder %s14_s15, 4  }
 0x103   :  { %13 = sbr.rel (!%p11_p4) target bundleno = 1 (0x1), region = 66 }

// kernel: resnext_forward.21
= control target key start
LH: loop header
LB: loop body
LE: loop exit
PB: predicated region body
PF: predicated region fallthrough
CT: control target
= control target key end

     0   :  { %s357_s0 = inlined_call_operand.vmem [shape: bf16[128,128], index: 0, kind: input, shape index: {}]   ;;  %s358_s1 = inlined_call_operand.vmem [shape: bf16[128,128], index: 1, kind: input, shape index: {}]   ;;  %s359_s2 = inlined_call_operand.vmem [shape: bf16[128,128], index: 2, kind: input, shape index: {}]   ;;  %s360_s3 = inlined_call_operand.vmem [shape: bf16[128,128], index: 3, kind: output, shape index: {}]  }
   0x1   :  { %v14_v0 = vld [vmem:[%s357_s0] sm:$0xf]  ;;  %v15_v1 = vld [vmem:[%s357_s0 + $0x4] sm:$0xf]  ;;  %v16_v8 = vld [vmem:[%s357_s0 + $0x8] sm:$0xf] }
   0x2   :  { %v30_v2 = vld [vmem:[%s358_s1] sm:$0xf]  ;;  %v31_v3 = vld [vmem:[%s358_s1 + $0x4] sm:$0xf]  ;;  %v17_v9 = vld [vmem:[%s357_s0 + $0xc] sm:$0xf] }
   0x3   :  { %v46_v4 = vmax.bf16 %v30_v2, %v14_v0  ;;  %v62_v5 = vld [vmem:[%s359_s2] sm:$0xf]  ;;  %v63_v6 = vld [vmem:[%s359_s2 + $0x4] sm:$0xf]  ;;  %v47_v7 = vmax.bf16 %v31_v3, %v15_v1  ;;  %v32_v10 = vld [vmem:[%s358_s1 + $0x8] sm:$0xf] }
   0x4   :  { %v33_v12 = vld [vmem:[%s358_s1 + $0xc] sm:$0xf]  ;;  %v48_v13 = vmax.bf16 %v32_v10, %v16_v8  ;;  %v64_v14 = vld [vmem:[%s359_s2 + $0x8] sm:$0xf]  ;;  %v18_v18 = vld [vmem:[%s357_s0 + $0x10] sm:$0xf] }
   0x5   :  { %v78_v11 = vmax.bf16 %v62_v5, %v46_v4  ;;  %v65_v15 = vld [vmem:[%s359_s2 + $0xc] sm:$0xf]  ;;  %v79_v16 = vmax.bf16 %v63_v6, %v47_v7  ;;  %v49_v17 = vmax.bf16 %v33_v12, %v17_v9  ;;  %v19_v19 = vld [vmem:[%s357_s0 + $0x14] sm:$0xf]  ;;  %v34_v20 = vld [vmem:[%s358_s1 + $0x10] sm:$0xf] }
   0x6   :  { %v80_v21 = vmax.bf16 %v64_v14, %v48_v13  ;;  %v35_v22 = vld [vmem:[%s358_s1 + $0x14] sm:$0xf]  ;;  %v50_v23 = vmax.bf16 %v34_v20, %v18_v18  ;;  %v66_v24 = vld [vmem:[%s359_s2 + $0x10] sm:$0xf]  ;;  %v20_v29 = vld [vmem:[%s357_s0 + $0x18] sm:$0xf] }
   0x7   :  { %v67_v25 = vld [vmem:[%s359_s2 + $0x14] sm:$0xf]  ;;  %v154_v26 = vcombine.low %v78_v11, %v79_v16  ;;  %v81_v27 = vmax.bf16 %v65_v15, %v49_v17  ;;  %v51_v28 = vmax.bf16 %v35_v22, %v19_v19  ;;  %v21_v30 = vld [vmem:[%s357_s0 + $0x1c] sm:$0xf]  ;;  %v36_v31 = vld [vmem:[%s358_s1 + $0x18] sm:$0xf] }
   0x8   :  { %v82_v32 = vmax.bf16 %v66_v24, %v50_v23  ;;  %v37_v33 = vld [vmem:[%s358_s1 + $0x1c] sm:$0xf]  ;;  %v52_v34 = vmax.bf16 %v36_v31, %v20_v29  ;;  %v68_v35 = vld [vmem:[%s359_s2 + $0x18] sm:$0xf]  ;;  %v22_v40 = vld [vmem:[%s357_s0 + $0x20] sm:$0xf] }
   0x9   :  { %v69_v36 = vld [vmem:[%s359_s2 + $0x1c] sm:$0xf]  ;;  %118 = vst [vmem:[%s360_s3] sm:$0xff] %v154_v26   ;;  %v155_v37 = vcombine.low %v80_v21, %v81_v27  ;;  %v83_v38 = vmax.bf16 %v67_v25, %v51_v28  ;;  %v53_v39 = vmax.bf16 %v37_v33, %v21_v30  ;;  %v23_v41 = vld [vmem:[%s357_s0 + $0x24] sm:$0xf]  ;;  %v38_v42 = vld [vmem:[%s358_s1 + $0x20] sm:$0xf] }
   0xa   :  { %v84_v43 = vmax.bf16 %v68_v35, %v52_v34  ;;  %v39_v44 = vld [vmem:[%s358_s1 + $0x24] sm:$0xf]  ;;  %v54_v45 = vmax.bf16 %v38_v42, %v22_v40  ;;  %v70_v46 = vld [vmem:[%s359_s2 + $0x20] sm:$0xf]  ;;  %v24_v51 = vld [vmem:[%s357_s0 + $0x28] sm:$0xf] }
   0xb   :  { %v71_v47 = vld [vmem:[%s359_s2 + $0x24] sm:$0xf]  ;;  %156 = vst [vmem:[%s360_s3 + $0x8] sm:$0xff] %v155_v37   ;;  %v157_v48 = vcombine.low %v82_v32, %v83_v38  ;;  %v85_v49 = vmax.bf16 %v69_v36, %v53_v39  ;;  %v55_v50 = vmax.bf16 %v39_v44, %v23_v41  ;;  %v25_v52 = vld [vmem:[%s357_s0 + $0x2c] sm:$0xf] }
   0xc   :  { %v40_v53 = vld [vmem:[%s358_s1 + $0x28] sm:$0xf]  ;;  %v86_v54 = vmax.bf16 %v70_v46, %v54_v45  ;;  %v41_v55 = vld [vmem:[%s358_s1 + $0x2c] sm:$0xf]  ;;  %v26_v62 = vld [vmem:[%s357_s0 + $0x30] sm:$0xf] }
   0xd   :  { %v56_v56 = vmax.bf16 %v40_v53, %v24_v51  ;;  %v72_v57 = vld [vmem:[%s359_s2 + $0x28] sm:$0xf]  ;;  %v73_v58 = vld [vmem:[%s359_s2 + $0x2c] sm:$0xf]  ;;  %158 = vst [vmem:[%s360_s3 + $0x10] sm:$0xff] %v157_v48   ;;  %v159_v59 = vcombine.low %v84_v43, %v85_v49  ;;  %v87_v60 = vmax.bf16 %v71_v47, %v55_v50  ;;  %v57_v61 = vmax.bf16 %v41_v55, %v25_v52 }
   0xe   :  { %v27_v63 = vld [vmem:[%s357_s0 + $0x34] sm:$0xf]  ;;  %v42_v0 = vld [vmem:[%s358_s1 + $0x30] sm:$0xf]  ;;  %v28_v9 = vld [vmem:[%s357_s0 + $0x38] sm:$0xf] }
   0xf   :  { %v88_v1 = vmax.bf16 %v72_v57, %v56_v56  ;;  %v43_v2 = vld [vmem:[%s358_s1 + $0x34] sm:$0xf]  ;;  %v58_v3 = vmax.bf16 %v42_v0, %v26_v62  ;;  %v74_v4 = vld [vmem:[%s359_s2 + $0x30] sm:$0xf]  ;;  %160 = vst [vmem:[%s360_s3 + $0x18] sm:$0xff] %v159_v59   ;;  %v161_v6 = vcombine.low %v86_v54, %v87_v60  ;;  %v89_v7 = vmax.bf16 %v73_v58, %v57_v61 }
  0x10   :  { %v75_v5 = vld [vmem:[%s359_s2 + $0x34] sm:$0xf]  ;;  %v59_v8 = vmax.bf16 %v43_v2, %v27_v63  ;;  %v29_v10 = vld [vmem:[%s357_s0 + $0x3c] sm:$0xf]  ;;  %v44_v11 = vld [vmem:[%s358_s1 + $0x38] sm:$0xf] }
  0x11   :  { %v90_v12 = vmax.bf16 %v74_v4, %v58_v3  ;;  %v45_v13 = vld [vmem:[%s358_s1 + $0x3c] sm:$0xf]  ;;  %v60_v14 = vmax.bf16 %v44_v11, %v28_v9  ;;  %v76_v15 = vld [vmem:[%s359_s2 + $0x38] sm:$0xf]  ;;  %162 = vst [vmem:[%s360_s3 + $0x20] sm:$0xff] %v161_v6   ;;  %v163_v17 = vcombine.low %v88_v1, %v89_v7 }
  0x12   :  { %v77_v16 = vld [vmem:[%s359_s2 + $0x3c] sm:$0xf]  ;;  %v91_v18 = vmax.bf16 %v75_v5, %v59_v8  ;;  %v61_v19 = vmax.bf16 %v45_v13, %v29_v10 }
  0x13   :  { %v92_v20 = vmax.bf16 %v76_v15, %v60_v14  ;;  %164 = vst [vmem:[%s360_s3 + $0x28] sm:$0xff] %v163_v17  }
  0x14   :  { %v165_v21 = vcombine.low %v90_v12, %v91_v18  ;;  %v93_v22 = vmax.bf16 %v77_v16, %v61_v19 }
  0x16   :  { %166 = vst [vmem:[%s360_s3 + $0x30] sm:$0xff] %v165_v21   ;;  %v167_v23 = vcombine.low %v92_v20, %v93_v22 }
  0x18   :  { %168 = vst [vmem:[%s360_s3 + $0x38] sm:$0xff] %v167_v23  }

// kernel: resnext_forward.22
= control target key start
LH: loop header
LB: loop body
LE: loop exit
PB: predicated region body
PF: predicated region fallthrough
CT: control target
= control target key end

     0   :  { %s687_s1 = inlined_call_operand.vmem [shape: bf16[128,128], index: 1, kind: input, shape index: {}]   ;;  %s688_s0 = inlined_call_operand.vmem [shape: bf16[128,128], index: 0, kind: input, shape index: {}]   ;;  %s689_s2 = inlined_call_operand.vmem [shape: f32[1,128], index: 2, kind: input, shape index: {}]   ;;  %s690_s3 = inlined_call_operand.vmem [shape: f32[1,128], index: 3, kind: input, shape index: {}]   ;;  %s691_s4 = inlined_call_operand.vmem [shape: bf16[128,128], index: 4, kind: output, shape index: {}]  }
   0x1   :  { %v550_v0 = vld [vmem:[%s687_s1 + $0x38] sm:$0xff]   ;;  %v551_v1 = vld [vmem:[%s687_s1 + $0x30] sm:$0xff]   ;;  %v552_v2 = vld [vmem:[%s687_s1 + $0x28] sm:$0xff]  }
   0x2   :  { %502 = vmatprep.subr.bf16.mxu0 %v550_v0  ;;  %534 = vmatprep.subr.bf16.mxu1 %v550_v0  ;;  %v553_v3 = vld [vmem:[%s687_s1 + $0x20] sm:$0xff]   ;;  %v554_v6 = vld [vmem:[%s687_s1 + $0x18] sm:$0xff]   ;;  %v555_v7 = vld [vmem:[%s687_s1 + $0x10] sm:$0xff]  }
   0x3   :  { %503 = vmatpush3.bf16.msra.mxu0 %v550_v0  ;;  %542 = vmatpush3.bf16.msra.mxu1 %v550_v0  ;;  %v558_v4 = vld [vmem:[%s688_s0] sm:$0xff]   ;;  %v556_v8 = vld [vmem:[%s687_s1 + $0x8] sm:$0xff]   ;;  %v562_v12 = vld [vmem:[%s688_s0 + $0x10] sm:$0xff]  }
   0x4   :  { %504 = vmatprep.subr.bf16.mxu0 %v551_v1  ;;  %535 = vmatprep.subr.bf16.mxu1 %v551_v1  ;;  %v559_v5 = vld [vmem:[%s688_s0 + $0x20] sm:$0xff]   ;;  %v560_v10 = vld [vmem:[%s688_s0 + $0x8] sm:$0xff]   ;;  %v563_v13 = vld [vmem:[%s688_s0 + $0x30] sm:$0xff]  }
   0x5   :  { %518 = vmatprep.mubr.bf16.mxu0 %v558_v4  ;;  %526 = vmatprep.mubr.bf16.mxu1 %v559_v5  ;;  %v557_v9 = vld [vmem:[%s687_s1] sm:$0xff]   ;;  %v561_v11 = vld [vmem:[%s688_s0 + $0x28] sm:$0xff]   ;;  %v564_v14 = vld [vmem:[%s688_s0 + $0x18] sm:$0xff]  }
   0x6   :  { %v565_v15 = vld [vmem:[%s688_s0 + $0x38] sm:$0xff]   ;;  %v642_v16 = vld [vmem:[%s689_s2] ss:$0 sm:$0xff] }
   0x7   :  { %505 = vmatpush3.bf16.msra.mxu0 %v551_v1  ;;  %543 = vmatpush3.bf16.msra.mxu1 %v551_v1  ;;  %v406_v21 = vld [vmem:[%s690_s3] ss:$0 sm:$0xff] }
   0x8   :  { %506 = vmatprep.subr.bf16.mxu0 %v552_v2  ;;  %536 = vmatprep.subr.bf16.mxu1 %v552_v2 }
   0xb   :  { %507 = vmatpush3.bf16.msra.mxu0 %v552_v2  ;;  %544 = vmatpush3.bf16.msra.mxu1 %v552_v2 }
   0xc   :  { %508 = vmatprep.subr.bf16.mxu0 %v553_v3  ;;  %537 = vmatprep.subr.bf16.mxu1 %v553_v3 }
   0xf   :  { %509 = vmatpush3.bf16.msra.mxu0 %v553_v3  ;;  %545 = vmatpush3.bf16.msra.mxu1 %v553_v3 }
  0x10   :  { %510 = vmatprep.subr.bf16.mxu0 %v554_v6  ;;  %538 = vmatprep.subr.bf16.mxu1 %v554_v6 }
  0x13   :  { %511 = vmatpush3.bf16.msra.mxu0 %v554_v6  ;;  %546 = vmatpush3.bf16.msra.mxu1 %v554_v6 }
  0x14   :  { %512 = vmatprep.subr.bf16.mxu0 %v555_v7  ;;  %539 = vmatprep.subr.bf16.mxu1 %v555_v7 }
  0x17   :  { %513 = vmatpush3.bf16.msra.mxu0 %v555_v7  ;;  %547 = vmatpush3.bf16.msra.mxu1 %v555_v7 }
  0x18   :  { %514 = vmatprep.subr.bf16.mxu0 %v556_v8  ;;  %540 = vmatprep.subr.bf16.mxu1 %v556_v8 }
  0x1b   :  { %515 = vmatpush3.bf16.msra.mxu0 %v556_v8  ;;  %548 = vmatpush3.bf16.msra.mxu1 %v556_v8 }
  0x1c   :  { %516 = vmatprep.subr.bf16.mxu0 %v557_v9  ;;  %541 = vmatprep.subr.bf16.mxu1 %v557_v9 }
  0x1f   :  { %517 = vmatpush3.bf16.msra.mxu0 %v557_v9  ;;  %549 = vmatpush3.bf16.msra.mxu1 %v557_v9 }
  0x22   :  { %519 = vmatmul.mubr.bf16.vlgmr.msra.gmra.mxu0 %v560_v10  ;;  %527 = vmatmul.mubr.bf16.vlgmr.msra.gmra.mxu1 %v561_v11 }
  0x23   :  { %522 = vmatprep.mubr.bf16.mxu0 %v562_v12  ;;  %530 = vmatprep.mubr.bf16.mxu1 %v563_v13 }
  0x2a   :  { %523 = vmatmul.mubr.bf16.gmra.mxu0 %v564_v14  ;;  %531 = vmatmul.mubr.bf16.gmra.mxu1 %v565_v15 }
  0xe2   :  { %v520_v17 = vpop.f32.mrf.mxu0  ;;  %v528_v18 = vpop.f32.mrf.mxu1 }
  0xe3   :  { %v252_v19 = vmul.f32 %v520_v17, %v642_v16  ;;  %v260_v20 = vmul.f32 %v528_v18, %v642_v16 }
  0xe4   :  { %v180_v22 = vpop.f32.mrf.mxu0  ;;  %v212_v23 = vpop.f32.mrf.mxu1 }
  0xe5   :  { %v250_v24 = vmul.f32 %v642_v16, %v180_v22  ;;  %v258_v25 = vmul.f32 %v642_v16, %v212_v23  ;;  %v275_v28 = vadd.f32 %v406_v21, %v252_v19  ;;  %v283_v29 = vadd.f32 %v406_v21, %v260_v20 }
  0xe6   :  { %v521_v26 = vpop.f32.mrf.mxu0  ;;  %v529_v27 = vpop.f32.mrf.mxu1 }
  0xe7   :  { %v253_v30 = vmul.f32 %v521_v26, %v642_v16  ;;  %v261_v31 = vmul.f32 %v529_v27, %v642_v16  ;;  %v273_v34 = vadd.f32 %v406_v21, %v250_v24  ;;  %v281_v35 = vadd.f32 %v406_v21, %v258_v25 }
  0xe8   :  { %v183_v32 = vpop.f32.mrf.mxu0  ;;  %v215_v33 = vpop.f32.mrf.mxu1  ;;  %v291_v42 = vmax.f32 %v275_v28, 0.0  ;;  %v299_v43 = vmax.f32 %v283_v29, 0.0 }
  0xe9   :  { %v251_v36 = vmul.f32 %v642_v16, %v183_v32  ;;  %v259_v37 = vmul.f32 %v642_v16, %v215_v33  ;;  %v276_v38 = vadd.f32 %v406_v21, %v253_v30  ;;  %v284_v39 = vadd.f32 %v406_v21, %v261_v31 }
  0xea   :  { %v524_v40 = vpop.f32.mrf.mxu0  ;;  %v532_v41 = vpop.f32.mrf.mxu1  ;;  %v289_v52 = vmax.f32 %v273_v34, 0.0  ;;  %v297_v53 = vmax.f32 %v281_v35, 0.0 }
  0xeb   :  { %v274_v44 = vadd.f32 %v406_v21, %v251_v36  ;;  %v282_v45 = vadd.f32 %v406_v21, %v259_v37  ;;  %v292_v46 = vmax.f32 %v276_v38, 0.0  ;;  %v300_v47 = vmax.f32 %v284_v39, 0.0 }
  0xec   :  { %v256_v48 = vmul.f32 %v524_v40, %v642_v16  ;;  %v264_v49 = vmul.f32 %v532_v41, %v642_v16  ;;  %v196_v50 = vpop.f32.mrf.mxu0  ;;  %v228_v51 = vpop.f32.mrf.mxu1 }
  0xed   :  { %v290_v54 = vmax.f32 %v274_v44, 0.0  ;;  %v298_v55 = vmax.f32 %v282_v45, 0.0  ;;  %v447_v56 = vpack.c.bf16 %v292_v46, %v291_v42  ;;  %v467_v57 = vpack.c.bf16 %v300_v47, %v299_v43 }
  0xee   :  { %v254_v58 = vmul.f32 %v642_v16, %v196_v50  ;;  %v262_v59 = vmul.f32 %v642_v16, %v228_v51  ;;  %v525_v60 = vpop.f32.mrf.mxu0  ;;  %v533_v61 = vpop.f32.mrf.mxu1  ;;  %v279_v0 = vadd.f32 %v406_v21, %v256_v48  ;;  %v287_v1 = vadd.f32 %v406_v21, %v264_v49 }
  0xef   :  { %v442_v62 = vpack.c.bf16 %v290_v54, %v289_v52  ;;  %v462_v63 = vpack.c.bf16 %v298_v55, %v297_v53  ;;  %479 = vst [vmem:[%s691_s4 + $0x8] sm:$0xff] %v447_v56   ;;  %483 = vst [vmem:[%s691_s4 + $0x28] sm:$0xff] %v467_v57   ;;  %v257_v2 = vmul.f32 %v525_v60, %v642_v16 }
  0xf0   :  { %v265_v3 = vmul.f32 %v533_v61, %v642_v16  ;;  %v199_v4 = vpop.f32.mrf.mxu0  ;;  %v231_v5 = vpop.f32.mrf.mxu1  ;;  %v277_v6 = vadd.f32 %v406_v21, %v254_v58  ;;  %v285_v7 = vadd.f32 %v406_v21, %v262_v59  ;;  %v295_v14 = vmax.f32 %v279_v0, 0.0 }
  0xf1   :  { %443 = vst [vmem:[%s691_s4] sm:$0xff] %v442_v62   ;;  %482 = vst [vmem:[%s691_s4 + $0x20] sm:$0xff] %v462_v63   ;;  %v255_v8 = vmul.f32 %v642_v16, %v199_v4  ;;  %v263_v9 = vmul.f32 %v642_v16, %v231_v5  ;;  %v280_v10 = vadd.f32 %v406_v21, %v257_v2  ;;  %v303_v15 = vmax.f32 %v287_v1, 0.0 }
  0xf2   :  { %v288_v11 = vadd.f32 %v406_v21, %v265_v3  ;;  %v293_v19 = vmax.f32 %v277_v6, 0.0  ;;  %v301_v20 = vmax.f32 %v285_v7, 0.0 }
  0xf3   :  { %v278_v12 = vadd.f32 %v406_v21, %v255_v8  ;;  %v286_v13 = vadd.f32 %v406_v21, %v263_v9  ;;  %v296_v17 = vmax.f32 %v280_v10, 0.0 }
  0xf4   :  { %v304_v18 = vmax.f32 %v288_v11, 0.0 }
  0xf5   :  { %v294_v22 = vmax.f32 %v278_v12, 0.0  ;;  %v302_v23 = vmax.f32 %v286_v13, 0.0  ;;  %v457_v24 = vpack.c.bf16 %v296_v17, %v295_v14 }
  0xf6   :  { %v477_v25 = vpack.c.bf16 %v304_v18, %v303_v15 }
  0xf7   :  { %v452_v26 = vpack.c.bf16 %v294_v22, %v293_v19  ;;  %v472_v27 = vpack.c.bf16 %v302_v23, %v301_v20  ;;  %481 = vst [vmem:[%s691_s4 + $0x18] sm:$0xff] %v457_v24  }
  0xf8   :  { %485 = vst [vmem:[%s691_s4 + $0x38] sm:$0xff] %v477_v25  }
  0xf9   :  { %480 = vst [vmem:[%s691_s4 + $0x10] sm:$0xff] %v452_v26   ;;  %484 = vst [vmem:[%s691_s4 + $0x30] sm:$0xff] %v472_v27  }

// kernel: resnext_forward.23
= control target key start
LH: loop header
LB: loop body
LE: loop exit
PB: predicated region body
PF: predicated region fallthrough
CT: control target
= control target key end

     0   :  { %v612_v0 = vmov 0   ;;  %vm178_vm0 = vcmask 130048   ;;  %s787_s1 = inlined_call_operand.vmem [shape: bf16[144,128], index: 1, kind: input, shape index: {}]   ;;  %s788_s0 = inlined_call_operand.vmem [shape: bf16[128,144], index: 0, kind: input, shape index: {}]   ;;  %s789_s2 = inlined_call_operand.vmem [shape: f32[1,128], index: 2, kind: input, shape index: {}]   ;;  %s790_s3 = inlined_call_operand.vmem [shape: f32[1,128], index: 3, kind: input, shape index: {}]   ;;  %s791_s4 = inlined_call_operand.vmem [shape: bf16[128,128], index: 4, kind: output, shape index: {}]  }
   0x1   :  { %203 = vmatprep.subr.bf16.mxu0 %v612_v0  ;;  %560 = vmatprep.subr.bf16.mxu1 %v612_v0  ;;  %v579_v1 = vld [vmem:[%s787_s1 + $0x38] sm:$0xff]   ;;  %v580_v2 = vld [vmem:[%s787_s1 + $0x30] sm:$0xff]   ;;  %v581_v3 = vld [vmem:[%s787_s1 + $0x28] sm:$0xff]  }
   0x2   :  { %204 = vmatpush1.bf16.msra.mxu0 %v579_v1  ;;  %569 = vmatpush1.bf16.msra.mxu1 %v579_v1  ;;  %v582_v4 = vld [vmem:[%s787_s1 + $0x20] sm:$0xff]   ;;  %v583_v7 = vld [vmem:[%s787_s1 + $0x18] sm:$0xff]   ;;  %v584_v8 = vld [vmem:[%s787_s1 + $0x10] sm:$0xff]  }
   0x3   :  { %205 = vmatprep.subr.bf16.mxu0 %v612_v0  ;;  %561 = vmatprep.subr.bf16.mxu1 %v612_v0  ;;  %v590_v5 = vld [vmem:[%s788_s0 + $0x4] ss:$8 sps:$4 sm:$0xff]   ;;  %v588_v12 = vld [vmem:[%s788_s0] ss:$8 sps:$4 sm:$0xff]   ;;  %v594_v14 = vld [vmem:[%s788_s0 + $0x14] ss:$8 sps:$4 sm:$0xff]  }
   0x4   :  { %v593_v6 = vld [vmem:[%s788_s0 + $0x44] ss:$8 sps:$4 sm:$0xff]   ;;  %471 = vmatprep.mubr.msk.bf16.mxu0 %vm178_vm0, %v590_v5  ;;  %v591_v13 = vld [vmem:[%s788_s0 + $0x40] ss:$8 sps:$4 sm:$0xff]   ;;  %v596_v15 = vld [vmem:[%s788_s0 + $0x54] ss:$8 sps:$4 sm:$0xff]  }
   0x5   :  { %475 = vmatprep.mubr.msk.bf16.mxu1 %vm178_vm0, %v593_v6  ;;  %v585_v9 = vld [vmem:[%s787_s1 + $0x8] sm:$0xff]   ;;  %v586_v10 = vld [vmem:[%s787_s1] sm:$0xff]   ;;  %v598_v16 = vld [vmem:[%s788_s0 + $0x10] ss:$8 sps:$4 sm:$0xff]  }
   0x6   :  { %206 = vmatpush1.bf16.msra.mxu0 %v580_v2  ;;  %570 = vmatpush1.bf16.msra.mxu1 %v580_v2  ;;  %v587_v11 = vld [vmem:[%s787_s1 + $0x40] sm:$0xff]   ;;  %v599_v17 = vld [vmem:[%s788_s0 + $0x50] ss:$8 sps:$4 sm:$0xff]   ;;  %v606_v22 = vld [vmem:[%s788_s0 + $0x34] ss:$8 sps:$4 sm:$0xff]  }
   0x7   :  { %207 = vmatprep.subr.bf16.mxu0 %v612_v0  ;;  %562 = vmatprep.subr.bf16.mxu1 %v612_v0  ;;  %v600_v18 = vld [vmem:[%s788_s0 + $0x24] ss:$8 sps:$4 sm:$0xff]   ;;  %v604_v20 = vld [vmem:[%s788_s0 + $0x20] ss:$8 sps:$4 sm:$0xff]   ;;  %v608_v23 = vld [vmem:[%s788_s0 + $0x74] ss:$8 sps:$4 sm:$0xff]  }
   0x8   :  { %v602_v19 = vld [vmem:[%s788_s0 + $0x64] ss:$8 sps:$4 sm:$0xff]   ;;  %v605_v21 = vld [vmem:[%s788_s0 + $0x60] ss:$8 sps:$4 sm:$0xff]   ;;  %v610_v24 = vld [vmem:[%s788_s0 + $0x30] ss:$8 sps:$4 sm:$0xff]  }
   0x9   :  { %v611_v25 = vld [vmem:[%s788_s0 + $0x70] ss:$8 sps:$4 sm:$0xff]   ;;  %v724_v26 = vld [vmem:[%s789_s2] ss:$0 sm:$0xff] }
   0xa   :  { %208 = vmatpush1.bf16.msra.mxu0 %v581_v3  ;;  %571 = vmatpush1.bf16.msra.mxu1 %v581_v3  ;;  %v730_v30 = vld [vmem:[%s790_s3] ss:$0 sm:$0xff] }
   0xb   :  { %209 = vmatprep.subr.bf16.mxu0 %v612_v0  ;;  %563 = vmatprep.subr.bf16.mxu1 %v612_v0 }
   0xe   :  { %210 = vmatpush1.bf16.msra.mxu0 %v582_v4  ;;  %572 = vmatpush1.bf16.msra.mxu1 %v582_v4 }
   0xf   :  { %211 = vmatprep.subr.bf16.mxu0 %v612_v0  ;;  %564 = vmatprep.subr.bf16.mxu1 %v612_v0 }
  0x12   :  { %212 = vmatpush1.bf16.msra.mxu0 %v583_v7  ;;  %573 = vmatpush1.bf16.msra.mxu1 %v583_v7 }
  0x13   :  { %213 = vmatprep.subr.bf16.mxu0 %v612_v0  ;;  %565 = vmatprep.subr.bf16.mxu1 %v612_v0 }
  0x16   :  { %214 = vmatpush1.bf16.msra.mxu0 %v584_v8  ;;  %574 = vmatpush1.bf16.msra.mxu1 %v584_v8 }
  0x17   :  { %215 = vmatprep.subr.bf16.mxu0 %v612_v0  ;;  %566 = vmatprep.subr.bf16.mxu1 %v612_v0 }
  0x1a   :  { %216 = vmatpush1.bf16.msra.mxu0 %v585_v9  ;;  %575 = vmatpush1.bf16.msra.mxu1 %v585_v9 }
  0x1b   :  { %217 = vmatprep.subr.bf16.mxu0 %v612_v0  ;;  %567 = vmatprep.subr.bf16.mxu1 %v612_v0 }
  0x1e   :  { %218 = vmatpush1.bf16.msra.mxu0 %v586_v10  ;;  %576 = vmatpush1.bf16.msra.mxu1 %v586_v10 }
  0x1f   :  { %233 = vmatprep.subr.bf16.mxu0 %v612_v0  ;;  %568 = vmatprep.subr.bf16.mxu1 %v612_v0 }
  0x22   :  { %234 = vmatpush2.bf16.msra.mxu0 %v587_v11  ;;  %577 = vmatpush2.bf16.msra.mxu1 %v587_v11 }
  0x25   :  { %236 = vmatmul.mubr.bf16.vlgmr.msra.gmra.mxu0 %v588_v12  ;;  %268 = vmatmul.mubr.bf16.vlgmr.msra.gmra.mxu1 %v591_v13 }
  0x26   :  { %472 = vmatprep.mubr.msk.bf16.mxu0 %vm178_vm0, %v594_v14  ;;  %476 = vmatprep.mubr.msk.bf16.mxu1 %vm178_vm0, %v596_v15 }
  0x2d   :  { %244 = vmatmul.mubr.bf16.gmra.mxu0 %v598_v16  ;;  %276 = vmatmul.mubr.bf16.gmra.mxu1 %v599_v17 }
  0x2e   :  { %473 = vmatprep.mubr.msk.bf16.mxu0 %vm178_vm0, %v600_v18  ;;  %477 = vmatprep.mubr.msk.bf16.mxu1 %vm178_vm0, %v602_v19 }
  0x35   :  { %252 = vmatmul.mubr.bf16.gmra.mxu0 %v604_v20  ;;  %284 = vmatmul.mubr.bf16.gmra.mxu1 %v605_v21 }
  0x36   :  { %474 = vmatprep.mubr.msk.bf16.mxu0 %vm178_vm0, %v606_v22  ;;  %478 = vmatprep.mubr.msk.bf16.mxu1 %vm178_vm0, %v608_v23 }
  0x3d   :  { %260 = vmatmul.mubr.bf16.gmra.mxu0 %v610_v24  ;;  %292 = vmatmul.mubr.bf16.gmra.mxu1 %v611_v25 }
  0xe5   :  { %v237_v27 = vpop.f32.mrf.mxu0  ;;  %v269_v28 = vpop.f32.mrf.mxu1 }
  0xe6   :  { %v307_v29 = vmul.f32 %v724_v26, %v237_v27  ;;  %v315_v31 = vmul.f32 %v724_v26, %v269_v28 }
  0xe7   :  { %v239_v32 = vpop.f32.mrf.mxu0  ;;  %v271_v33 = vpop.f32.mrf.mxu1 }
  0xe8   :  { %v330_v34 = vadd.f32 %v730_v30, %v307_v29  ;;  %v338_v35 = vadd.f32 %v730_v30, %v315_v31 }
  0xe9   :  { %v240_v36 = vpop.f32.mrf.mxu0  ;;  %v272_v37 = vpop.f32.mrf.mxu1 }
  0xea   :  { %v308_v38 = vmul.f32 %v724_v26, %v240_v36  ;;  %v316_v39 = vmul.f32 %v724_v26, %v272_v37  ;;  %v346_v44 = vmax.f32 %v330_v34, 0.0  ;;  %v354_v45 = vmax.f32 %v338_v35, 0.0 }
  0xeb   :  { %v242_v40 = vpop.f32.mrf.mxu0  ;;  %v274_v41 = vpop.f32.mrf.mxu1 }
  0xec   :  { %v331_v42 = vadd.f32 %v730_v30, %v308_v38  ;;  %v339_v43 = vadd.f32 %v730_v30, %v316_v39 }
  0xed   :  { %v245_v46 = vpop.f32.mrf.mxu0  ;;  %v277_v47 = vpop.f32.mrf.mxu1 }
  0xee   :  { %v347_v48 = vmax.f32 %v331_v42, 0.0  ;;  %v355_v49 = vmax.f32 %v339_v43, 0.0  ;;  %v309_v50 = vmul.f32 %v724_v26, %v245_v46  ;;  %v317_v51 = vmul.f32 %v724_v26, %v277_v47 }
  0xef   :  { %v247_v52 = vpop.f32.mrf.mxu0  ;;  %v279_v53 = vpop.f32.mrf.mxu1 }
  0xf0   :  { %v516_v54 = vpack.c.bf16 %v347_v48, %v346_v44  ;;  %v536_v55 = vpack.c.bf16 %v355_v49, %v354_v45  ;;  %v332_v56 = vadd.f32 %v730_v30, %v309_v50  ;;  %v340_v57 = vadd.f32 %v730_v30, %v317_v51 }
  0xf1   :  { %v248_v58 = vpop.f32.mrf.mxu0  ;;  %v280_v59 = vpop.f32.mrf.mxu1 }
  0xf2   :  { %517 = vst [vmem:[%s791_s4] sm:$0xff] %v516_v54   ;;  %556 = vst [vmem:[%s791_s4 + $0x20] sm:$0xff] %v536_v55   ;;  %v310_v60 = vmul.f32 %v724_v26, %v248_v58  ;;  %v318_v61 = vmul.f32 %v724_v26, %v280_v59  ;;  %v348_v2 = vmax.f32 %v332_v56, 0.0  ;;  %v356_v3 = vmax.f32 %v340_v57, 0.0 }
  0xf3   :  { %v250_v62 = vpop.f32.mrf.mxu0  ;;  %v282_v63 = vpop.f32.mrf.mxu1 }
  0xf4   :  { %v333_v0 = vadd.f32 %v730_v30, %v310_v60  ;;  %v341_v1 = vadd.f32 %v730_v30, %v318_v61 }
  0xf5   :  { %v253_v4 = vpop.f32.mrf.mxu0  ;;  %v285_v5 = vpop.f32.mrf.mxu1 }
  0xf6   :  { %v349_v6 = vmax.f32 %v333_v0, 0.0  ;;  %v357_v7 = vmax.f32 %v341_v1, 0.0  ;;  %v311_v8 = vmul.f32 %v724_v26, %v253_v4  ;;  %v319_v9 = vmul.f32 %v724_v26, %v285_v5 }
  0xf7   :  { %v255_v10 = vpop.f32.mrf.mxu0  ;;  %v287_v11 = vpop.f32.mrf.mxu1 }
  0xf8   :  { %v521_v12 = vpack.c.bf16 %v349_v6, %v348_v2  ;;  %v541_v13 = vpack.c.bf16 %v357_v7, %v356_v3  ;;  %v334_v14 = vadd.f32 %v730_v30, %v311_v8  ;;  %v342_v15 = vadd.f32 %v730_v30, %v319_v9 }
  0xf9   :  { %v256_v16 = vpop.f32.mrf.mxu0  ;;  %v288_v17 = vpop.f32.mrf.mxu1 }
  0xfa   :  { %553 = vst [vmem:[%s791_s4 + $0x8] sm:$0xff] %v521_v12   ;;  %557 = vst [vmem:[%s791_s4 + $0x28] sm:$0xff] %v541_v13   ;;  %v312_v18 = vmul.f32 %v724_v26, %v256_v16  ;;  %v320_v19 = vmul.f32 %v724_v26, %v288_v17  ;;  %v350_v24 = vmax.f32 %v334_v14, 0.0  ;;  %v358_v25 = vmax.f32 %v342_v15, 0.0 }
  0xfb   :  { %v258_v20 = vpop.f32.mrf.mxu0  ;;  %v290_v21 = vpop.f32.mrf.mxu1 }
  0xfc   :  { %v335_v22 = vadd.f32 %v730_v30, %v312_v18  ;;  %v343_v23 = vadd.f32 %v730_v30, %v320_v19 }
  0xfd   :  { %v261_v27 = vpop.f32.mrf.mxu0  ;;  %v293_v28 = vpop.f32.mrf.mxu1 }
  0xfe   :  { %v351_v29 = vmax.f32 %v335_v22, 0.0  ;;  %v359_v31 = vmax.f32 %v343_v23, 0.0  ;;  %v313_v32 = vmul.f32 %v724_v26, %v261_v27  ;;  %v321_v33 = vmul.f32 %v724_v26, %v293_v28 }
  0xff   :  { %v263_v34 = vpop.f32.mrf.mxu0  ;;  %v295_v35 = vpop.f32.mrf.mxu1 }
 0x100   :  { %v526_v36 = vpack.c.bf16 %v351_v29, %v350_v24  ;;  %v546_v37 = vpack.c.bf16 %v359_v31, %v358_v25  ;;  %v336_v40 = vadd.f32 %v730_v30, %v313_v32  ;;  %v344_v41 = vadd.f32 %v730_v30, %v321_v33 }
 0x101   :  { %v264_v38 = vpop.f32.mrf.mxu0  ;;  %v296_v39 = vpop.f32.mrf.mxu1 }
 0x102   :  { %554 = vst [vmem:[%s791_s4 + $0x10] sm:$0xff] %v526_v36   ;;  %558 = vst [vmem:[%s791_s4 + $0x30] sm:$0xff] %v546_v37   ;;  %v314_v42 = vmul.f32 %v724_v26, %v264_v38  ;;  %v322_v43 = vmul.f32 %v724_v26, %v296_v39  ;;  %v352_v48 = vmax.f32 %v336_v40, 0.0  ;;  %v360_v49 = vmax.f32 %v344_v41, 0.0 }
 0x103   :  { %v266_v44 = vpop.f32.mrf.mxu0  ;;  %v298_v45 = vpop.f32.mrf.mxu1 }
 0x104   :  { %v337_v46 = vadd.f32 %v730_v30, %v314_v42  ;;  %v345_v47 = vadd.f32 %v730_v30, %v322_v43 }
 0x106   :  { %v353_v50 = vmax.f32 %v337_v46, 0.0  ;;  %v361_v51 = vmax.f32 %v345_v47, 0.0 }
 0x108   :  { %v531_v52 = vpack.c.bf16 %v353_v50, %v352_v48  ;;  %v551_v53 = vpack.c.bf16 %v361_v51, %v360_v49 }
 0x10a   :  { %555 = vst [vmem:[%s791_s4 + $0x18] sm:$0xff] %v531_v52   ;;  %559 = vst [vmem:[%s791_s4 + $0x38] sm:$0xff] %v551_v53  }

// kernel: resnext_forward.24
= control target key start
LH: loop header
LB: loop body
LE: loop exit
PB: predicated region body
PF: predicated region fallthrough
CT: control target
= control target key end

     0   :  { %s653_s1 = inlined_call_operand.vmem [shape: bf16[128,128], index: 1, kind: input, shape index: {}]   ;;  %s654_s0 = inlined_call_operand.vmem [shape: bf16[128,128], index: 0, kind: input, shape index: {}]   ;;  %s655_s2 = inlined_call_operand.vmem [shape: f32[1,128], index: 2, kind: input, shape index: {}]   ;;  %s656_s3 = inlined_call_operand.vmem [shape: f32[1,128], index: 3, kind: input, shape index: {}]   ;;  %s657_s4 = inlined_call_operand.vmem [shape: bf16[128,128], index: 4, kind: output, shape index: {}]  }
   0x1   :  { %v534_v0 = vld [vmem:[%s653_s1 + $0x38] sm:$0xff]   ;;  %v535_v1 = vld [vmem:[%s653_s1 + $0x30] sm:$0xff]   ;;  %v536_v2 = vld [vmem:[%s653_s1 + $0x28] sm:$0xff]  }
   0x2   :  { %486 = vmatprep.subr.bf16.mxu0 %v534_v0  ;;  %518 = vmatprep.subr.bf16.mxu1 %v534_v0  ;;  %v537_v3 = vld [vmem:[%s653_s1 + $0x20] sm:$0xff]   ;;  %v538_v6 = vld [vmem:[%s653_s1 + $0x18] sm:$0xff]   ;;  %v539_v7 = vld [vmem:[%s653_s1 + $0x10] sm:$0xff]  }
   0x3   :  { %487 = vmatpush3.bf16.msra.mxu0 %v534_v0  ;;  %526 = vmatpush3.bf16.msra.mxu1 %v534_v0  ;;  %v542_v4 = vld [vmem:[%s654_s0] sm:$0xff]   ;;  %v540_v8 = vld [vmem:[%s653_s1 + $0x8] sm:$0xff]   ;;  %v546_v12 = vld [vmem:[%s654_s0 + $0x10] sm:$0xff]  }
   0x4   :  { %488 = vmatprep.subr.bf16.mxu0 %v535_v1  ;;  %519 = vmatprep.subr.bf16.mxu1 %v535_v1  ;;  %v543_v5 = vld [vmem:[%s654_s0 + $0x20] sm:$0xff]   ;;  %v544_v10 = vld [vmem:[%s654_s0 + $0x8] sm:$0xff]   ;;  %v547_v13 = vld [vmem:[%s654_s0 + $0x30] sm:$0xff]  }
   0x5   :  { %502 = vmatprep.mubr.bf16.mxu0 %v542_v4  ;;  %510 = vmatprep.mubr.bf16.mxu1 %v543_v5  ;;  %v541_v9 = vld [vmem:[%s653_s1] sm:$0xff]   ;;  %v545_v11 = vld [vmem:[%s654_s0 + $0x28] sm:$0xff]   ;;  %v548_v14 = vld [vmem:[%s654_s0 + $0x18] sm:$0xff]  }
   0x6   :  { %v549_v15 = vld [vmem:[%s654_s0 + $0x38] sm:$0xff]   ;;  %v389_v16 = vld [vmem:[%s655_s2] ss:$0 sm:$0xff] }
   0x7   :  { %489 = vmatpush3.bf16.msra.mxu0 %v535_v1  ;;  %527 = vmatpush3.bf16.msra.mxu1 %v535_v1  ;;  %v390_v23 = vld [vmem:[%s656_s3] ss:$0 sm:$0xff] }
   0x8   :  { %490 = vmatprep.subr.bf16.mxu0 %v536_v2  ;;  %520 = vmatprep.subr.bf16.mxu1 %v536_v2 }
   0xb   :  { %491 = vmatpush3.bf16.msra.mxu0 %v536_v2  ;;  %528 = vmatpush3.bf16.msra.mxu1 %v536_v2 }
   0xc   :  { %492 = vmatprep.subr.bf16.mxu0 %v537_v3  ;;  %521 = vmatprep.subr.bf16.mxu1 %v537_v3 }
   0xf   :  { %493 = vmatpush3.bf16.msra.mxu0 %v537_v3  ;;  %529 = vmatpush3.bf16.msra.mxu1 %v537_v3 }
  0x10   :  { %494 = vmatprep.subr.bf16.mxu0 %v538_v6  ;;  %522 = vmatprep.subr.bf16.mxu1 %v538_v6 }
  0x13   :  { %495 = vmatpush3.bf16.msra.mxu0 %v538_v6  ;;  %530 = vmatpush3.bf16.msra.mxu1 %v538_v6 }
  0x14   :  { %496 = vmatprep.subr.bf16.mxu0 %v539_v7  ;;  %523 = vmatprep.subr.bf16.mxu1 %v539_v7 }
  0x17   :  { %497 = vmatpush3.bf16.msra.mxu0 %v539_v7  ;;  %531 = vmatpush3.bf16.msra.mxu1 %v539_v7 }
  0x18   :  { %498 = vmatprep.subr.bf16.mxu0 %v540_v8  ;;  %524 = vmatprep.subr.bf16.mxu1 %v540_v8 }
  0x1b   :  { %499 = vmatpush3.bf16.msra.mxu0 %v540_v8  ;;  %532 = vmatpush3.bf16.msra.mxu1 %v540_v8 }
  0x1c   :  { %500 = vmatprep.subr.bf16.mxu0 %v541_v9  ;;  %525 = vmatprep.subr.bf16.mxu1 %v541_v9 }
  0x1f   :  { %501 = vmatpush3.bf16.msra.mxu0 %v541_v9  ;;  %533 = vmatpush3.bf16.msra.mxu1 %v541_v9 }
  0x22   :  { %503 = vmatmul.mubr.bf16.vlgmr.msra.gmra.mxu0 %v544_v10  ;;  %511 = vmatmul.mubr.bf16.vlgmr.msra.gmra.mxu1 %v545_v11 }
  0x23   :  { %506 = vmatprep.mubr.bf16.mxu0 %v546_v12  ;;  %514 = vmatprep.mubr.bf16.mxu1 %v547_v13 }
  0x2a   :  { %507 = vmatmul.mubr.bf16.gmra.mxu0 %v548_v14  ;;  %515 = vmatmul.mubr.bf16.gmra.mxu1 %v549_v15 }
  0xe2   :  { %v504_v17 = vpop.f32.mrf.mxu0  ;;  %v512_v18 = vpop.f32.mrf.mxu1 }
  0xe3   :  { %v252_v19 = vmul.f32 %v504_v17, %v389_v16  ;;  %v260_v20 = vmul.f32 %v512_v18, %v389_v16 }
  0xe4   :  { %v180_v21 = vpop.f32.mrf.mxu0  ;;  %v212_v22 = vpop.f32.mrf.mxu1 }
  0xe5   :  { %v250_v24 = vmul.f32 %v389_v16, %v180_v21  ;;  %v258_v25 = vmul.f32 %v389_v16, %v212_v22  ;;  %v275_v30 = vadd.f32 %v390_v23, %v252_v19  ;;  %v283_v31 = vadd.f32 %v390_v23, %v260_v20 }
  0xe6   :  { %v505_v26 = vpop.f32.mrf.mxu0  ;;  %v513_v27 = vpop.f32.mrf.mxu1 }
  0xe7   :  { %v253_v28 = vmul.f32 %v505_v26, %v389_v16  ;;  %v261_v29 = vmul.f32 %v513_v27, %v389_v16  ;;  %v273_v38 = vadd.f32 %v390_v23, %v250_v24  ;;  %v281_v39 = vadd.f32 %v390_v23, %v258_v25 }
  0xe8   :  { %v183_v32 = vpop.f32.mrf.mxu0  ;;  %v215_v33 = vpop.f32.mrf.mxu1 }
  0xe9   :  { %v276_v34 = vadd.f32 %v390_v23, %v253_v28  ;;  %v284_v35 = vadd.f32 %v390_v23, %v261_v29  ;;  %v251_v36 = vmul.f32 %v389_v16, %v183_v32  ;;  %v259_v37 = vmul.f32 %v389_v16, %v215_v33 }
  0xea   :  { %v508_v40 = vpop.f32.mrf.mxu0  ;;  %v516_v41 = vpop.f32.mrf.mxu1 }
  0xeb   :  { %v431_v42 = vpack.c.bf16 %v276_v34, %v275_v30  ;;  %v451_v43 = vpack.c.bf16 %v284_v35, %v283_v31  ;;  %v274_v44 = vadd.f32 %v390_v23, %v251_v36  ;;  %v282_v45 = vadd.f32 %v390_v23, %v259_v37 }
  0xec   :  { %v256_v46 = vmul.f32 %v508_v40, %v389_v16  ;;  %v264_v47 = vmul.f32 %v516_v41, %v389_v16  ;;  %v196_v48 = vpop.f32.mrf.mxu0  ;;  %v228_v49 = vpop.f32.mrf.mxu1 }
  0xed   :  { %463 = vst [vmem:[%s657_s4 + $0x8] sm:$0xff] %v431_v42   ;;  %467 = vst [vmem:[%s657_s4 + $0x28] sm:$0xff] %v451_v43   ;;  %v426_v50 = vpack.c.bf16 %v274_v44, %v273_v38  ;;  %v446_v51 = vpack.c.bf16 %v282_v45, %v281_v39  ;;  %v254_v52 = vmul.f32 %v389_v16, %v196_v48 }
  0xee   :  { %v262_v53 = vmul.f32 %v389_v16, %v228_v49  ;;  %v509_v54 = vpop.f32.mrf.mxu0  ;;  %v517_v55 = vpop.f32.mrf.mxu1  ;;  %v279_v58 = vadd.f32 %v390_v23, %v256_v46  ;;  %v287_v59 = vadd.f32 %v390_v23, %v264_v47 }
  0xef   :  { %427 = vst [vmem:[%s657_s4] sm:$0xff] %v426_v50   ;;  %466 = vst [vmem:[%s657_s4 + $0x20] sm:$0xff] %v446_v51   ;;  %v257_v56 = vmul.f32 %v509_v54, %v389_v16  ;;  %v265_v57 = vmul.f32 %v517_v55, %v389_v16  ;;  %v277_v2 = vadd.f32 %v390_v23, %v254_v52 }
  0xf0   :  { %v199_v60 = vpop.f32.mrf.mxu0  ;;  %v231_v61 = vpop.f32.mrf.mxu1  ;;  %v285_v3 = vadd.f32 %v390_v23, %v262_v53 }
  0xf1   :  { %v280_v62 = vadd.f32 %v390_v23, %v257_v56  ;;  %v288_v63 = vadd.f32 %v390_v23, %v265_v57  ;;  %v255_v0 = vmul.f32 %v389_v16, %v199_v60  ;;  %v263_v1 = vmul.f32 %v389_v16, %v231_v61 }
  0xf3   :  { %v441_v4 = vpack.c.bf16 %v280_v62, %v279_v58  ;;  %v461_v5 = vpack.c.bf16 %v288_v63, %v287_v59  ;;  %v278_v6 = vadd.f32 %v390_v23, %v255_v0  ;;  %v286_v7 = vadd.f32 %v390_v23, %v263_v1 }
  0xf5   :  { %465 = vst [vmem:[%s657_s4 + $0x18] sm:$0xff] %v441_v4   ;;  %469 = vst [vmem:[%s657_s4 + $0x38] sm:$0xff] %v461_v5   ;;  %v436_v8 = vpack.c.bf16 %v278_v6, %v277_v2  ;;  %v456_v9 = vpack.c.bf16 %v286_v7, %v285_v3 }
  0xf7   :  { %464 = vst [vmem:[%s657_s4 + $0x10] sm:$0xff] %v436_v8   ;;  %468 = vst [vmem:[%s657_s4 + $0x30] sm:$0xff] %v456_v9  }

// kernel: resnext_forward.25
= control target key start
LH: loop header
LB: loop body
LE: loop exit
PB: predicated region body
PF: predicated region fallthrough
CT: control target
= control target key end

     0   :  { %s840_s1 = inlined_call_operand.vmem [shape: bf16[128,128], index: 1, kind: input, shape index: {}]   ;;  %s841_s0 = inlined_call_operand.vmem [shape: bf16[128,128], index: 0, kind: input, shape index: {}]   ;;  %s842_s2 = inlined_call_operand.vmem [shape: f32[1,128], index: 2, kind: input, shape index: {}]   ;;  %s843_s4 = inlined_call_operand.vmem [shape: bf16[128,128], index: 4, kind: input, shape index: {}]   ;;  %s844_s3 = inlined_call_operand.vmem [shape: f32[1,128], index: 3, kind: input, shape index: {}]   ;;  %s845_s5 = inlined_call_operand.vmem [shape: bf16[128,128], index: 5, kind: output, shape index: {}]  }
   0x1   :  { %v640_v0 = vld [vmem:[%s840_s1 + $0x38] sm:$0xff]   ;;  %v641_v1 = vld [vmem:[%s840_s1 + $0x30] sm:$0xff]   ;;  %v642_v2 = vld [vmem:[%s840_s1 + $0x28] sm:$0xff]  }
   0x2   :  { %592 = vmatprep.subr.bf16.mxu0 %v640_v0  ;;  %624 = vmatprep.subr.bf16.mxu1 %v640_v0  ;;  %v643_v3 = vld [vmem:[%s840_s1 + $0x20] sm:$0xff]   ;;  %v644_v6 = vld [vmem:[%s840_s1 + $0x18] sm:$0xff]   ;;  %v645_v7 = vld [vmem:[%s840_s1 + $0x10] sm:$0xff]  }
   0x3   :  { %593 = vmatpush3.bf16.msra.mxu0 %v640_v0  ;;  %632 = vmatpush3.bf16.msra.mxu1 %v640_v0  ;;  %v648_v4 = vld [vmem:[%s841_s0] sm:$0xff]   ;;  %v646_v8 = vld [vmem:[%s840_s1 + $0x8] sm:$0xff]   ;;  %v652_v12 = vld [vmem:[%s841_s0 + $0x10] sm:$0xff]  }
   0x4   :  { %594 = vmatprep.subr.bf16.mxu0 %v641_v1  ;;  %625 = vmatprep.subr.bf16.mxu1 %v641_v1  ;;  %v649_v5 = vld [vmem:[%s841_s0 + $0x20] sm:$0xff]   ;;  %v650_v10 = vld [vmem:[%s841_s0 + $0x8] sm:$0xff]   ;;  %v653_v13 = vld [vmem:[%s841_s0 + $0x30] sm:$0xff]  }
   0x5   :  { %608 = vmatprep.mubr.bf16.mxu0 %v648_v4  ;;  %616 = vmatprep.mubr.bf16.mxu1 %v649_v5  ;;  %v647_v9 = vld [vmem:[%s840_s1] sm:$0xff]   ;;  %v651_v11 = vld [vmem:[%s841_s0 + $0x28] sm:$0xff]   ;;  %v654_v14 = vld [vmem:[%s841_s0 + $0x18] sm:$0xff]  }
   0x6   :  { %v655_v15 = vld [vmem:[%s841_s0 + $0x38] sm:$0xff]   ;;  %v737_v16 = vld [vmem:[%s842_s2] ss:$0 sm:$0xff]  ;;  %v562_v17 = vld [vmem:[%s843_s4 + $0x8] sm:$0xff]  }
   0x7   :  { %595 = vmatpush3.bf16.msra.mxu0 %v641_v1  ;;  %633 = vmatpush3.bf16.msra.mxu1 %v641_v1  ;;  %v566_v18 = vld [vmem:[%s843_s4 + $0x28] sm:$0xff]   ;;  %v748_v20 = vld [vmem:[%s844_s3] ss:$0 sm:$0xff]  ;;  %v496_v26 = vunpack.c.l.bf16 %v562_v17  ;;  %v765_v34 = vld [vmem:[%s843_s4 + $0x18] sm:$0xff]   ;;  %v497_v39 = vunpack.c.h.bf16 %v562_v17 }
   0x8   :  { %596 = vmatprep.subr.bf16.mxu0 %v642_v2  ;;  %626 = vmatprep.subr.bf16.mxu1 %v642_v2  ;;  %v491_v24 = vld [vmem:[%s843_s4] sm:$0xff]   ;;  %v512_v27 = vunpack.c.l.bf16 %v566_v18  ;;  %v770_v35 = vld [vmem:[%s843_s4 + $0x38] sm:$0xff]   ;;  %v513_v41 = vunpack.c.h.bf16 %v566_v18  ;;  %v775_v42 = vld [vmem:[%s843_s4 + $0x10] sm:$0xff]   ;;  %v504_v52 = vunpack.c.l.bf16 %v765_v34 }
   0x9   :  { %v565_v25 = vld [vmem:[%s843_s4 + $0x20] sm:$0xff]   ;;  %v492_v36 = vunpack.c.l.bf16 %v491_v24  ;;  %v780_v43 = vld [vmem:[%s843_s4 + $0x30] sm:$0xff]   ;;  %v493_v46 = vunpack.c.h.bf16 %v491_v24  ;;  %v520_v53 = vunpack.c.l.bf16 %v770_v35  ;;  %v500_v56 = vunpack.c.l.bf16 %v775_v42 }
   0xa   :  { %v508_v37 = vunpack.c.l.bf16 %v565_v25  ;;  %v509_v47 = vunpack.c.h.bf16 %v565_v25  ;;  %v516_v57 = vunpack.c.l.bf16 %v780_v43 }
   0xb   :  { %597 = vmatpush3.bf16.msra.mxu0 %v642_v2  ;;  %634 = vmatpush3.bf16.msra.mxu1 %v642_v2 }
   0xc   :  { %598 = vmatprep.subr.bf16.mxu0 %v643_v3  ;;  %627 = vmatprep.subr.bf16.mxu1 %v643_v3 }
   0xf   :  { %599 = vmatpush3.bf16.msra.mxu0 %v643_v3  ;;  %635 = vmatpush3.bf16.msra.mxu1 %v643_v3 }
  0x10   :  { %600 = vmatprep.subr.bf16.mxu0 %v644_v6  ;;  %628 = vmatprep.subr.bf16.mxu1 %v644_v6 }
  0x13   :  { %601 = vmatpush3.bf16.msra.mxu0 %v644_v6  ;;  %636 = vmatpush3.bf16.msra.mxu1 %v644_v6 }
  0x14   :  { %602 = vmatprep.subr.bf16.mxu0 %v645_v7  ;;  %629 = vmatprep.subr.bf16.mxu1 %v645_v7 }
  0x17   :  { %603 = vmatpush3.bf16.msra.mxu0 %v645_v7  ;;  %637 = vmatpush3.bf16.msra.mxu1 %v645_v7 }
  0x18   :  { %604 = vmatprep.subr.bf16.mxu0 %v646_v8  ;;  %630 = vmatprep.subr.bf16.mxu1 %v646_v8 }
  0x1b   :  { %605 = vmatpush3.bf16.msra.mxu0 %v646_v8  ;;  %638 = vmatpush3.bf16.msra.mxu1 %v646_v8 }
  0x1c   :  { %606 = vmatprep.subr.bf16.mxu0 %v647_v9  ;;  %631 = vmatprep.subr.bf16.mxu1 %v647_v9 }
  0x1f   :  { %607 = vmatpush3.bf16.msra.mxu0 %v647_v9  ;;  %639 = vmatpush3.bf16.msra.mxu1 %v647_v9 }
  0x22   :  { %609 = vmatmul.mubr.bf16.vlgmr.msra.gmra.mxu0 %v650_v10  ;;  %617 = vmatmul.mubr.bf16.vlgmr.msra.gmra.mxu1 %v651_v11 }
  0x23   :  { %612 = vmatprep.mubr.bf16.mxu0 %v652_v12  ;;  %620 = vmatprep.mubr.bf16.mxu1 %v653_v13 }
  0x2a   :  { %613 = vmatmul.mubr.bf16.gmra.mxu0 %v654_v14  ;;  %621 = vmatmul.mubr.bf16.gmra.mxu1 %v655_v15 }
  0xe2   :  { %v610_v19 = vpop.f32.mrf.mxu0  ;;  %v618_v21 = vpop.f32.mrf.mxu1 }
  0xe3   :  { %v255_v22 = vmul.f32 %v610_v19, %v737_v16  ;;  %v263_v23 = vmul.f32 %v618_v21, %v737_v16 }
  0xe4   :  { %v183_v28 = vpop.f32.mrf.mxu0  ;;  %v215_v29 = vpop.f32.mrf.mxu1 }
  0xe5   :  { %v278_v30 = vadd.f32 %v748_v20, %v255_v22  ;;  %v286_v31 = vadd.f32 %v748_v20, %v263_v23  ;;  %v253_v32 = vmul.f32 %v737_v16, %v183_v28  ;;  %v261_v33 = vmul.f32 %v737_v16, %v215_v29 }
  0xe6   :  { %v611_v38 = vpop.f32.mrf.mxu0  ;;  %v619_v40 = vpop.f32.mrf.mxu1 }
  0xe7   :  { %v276_v44 = vadd.f32 %v748_v20, %v253_v32  ;;  %v284_v45 = vadd.f32 %v748_v20, %v261_v33  ;;  %v256_v48 = vmul.f32 %v611_v38, %v737_v16  ;;  %v264_v49 = vmul.f32 %v619_v40, %v737_v16 }
  0xe8   :  { %v186_v50 = vpop.f32.mrf.mxu0  ;;  %v218_v51 = vpop.f32.mrf.mxu1  ;;  %v326_v54 = vadd.f32 %v496_v26, %v278_v30  ;;  %v334_v55 = vadd.f32 %v512_v27, %v286_v31 }
  0xe9   :  { %v279_v58 = vadd.f32 %v748_v20, %v256_v48  ;;  %v287_v59 = vadd.f32 %v748_v20, %v264_v49  ;;  %v254_v60 = vmul.f32 %v737_v16, %v186_v50  ;;  %v262_v61 = vmul.f32 %v737_v16, %v218_v51 }
  0xea   :  { %v614_v62 = vpop.f32.mrf.mxu0  ;;  %v622_v63 = vpop.f32.mrf.mxu1  ;;  %v324_v0 = vadd.f32 %v492_v36, %v276_v44  ;;  %v332_v1 = vadd.f32 %v508_v37, %v284_v45  ;;  %v342_v10 = vmax.f32 %v326_v54, 0.0  ;;  %v350_v11 = vmax.f32 %v334_v55, 0.0 }
  0xeb   :  { %v259_v2 = vmul.f32 %v614_v62, %v737_v16  ;;  %v267_v3 = vmul.f32 %v622_v63, %v737_v16  ;;  %v327_v4 = vadd.f32 %v497_v39, %v279_v58  ;;  %v335_v5 = vadd.f32 %v513_v41, %v287_v59 }
  0xec   :  { %v277_v6 = vadd.f32 %v748_v20, %v254_v60  ;;  %v285_v7 = vadd.f32 %v748_v20, %v262_v61  ;;  %v199_v8 = vpop.f32.mrf.mxu0  ;;  %v231_v9 = vpop.f32.mrf.mxu1  ;;  %v340_v22 = vmax.f32 %v324_v0, 0.0  ;;  %v348_v23 = vmax.f32 %v332_v1, 0.0 }
  0xed   :  { %v257_v12 = vmul.f32 %v737_v16, %v199_v8  ;;  %v265_v13 = vmul.f32 %v737_v16, %v231_v9  ;;  %v343_v14 = vmax.f32 %v327_v4, 0.0  ;;  %v351_v15 = vmax.f32 %v335_v5, 0.0 }
  0xee   :  { %v325_v17 = vadd.f32 %v493_v46, %v277_v6  ;;  %v333_v18 = vadd.f32 %v509_v47, %v285_v7  ;;  %v615_v19 = vpop.f32.mrf.mxu0  ;;  %v623_v21 = vpop.f32.mrf.mxu1  ;;  %v282_v24 = vadd.f32 %v748_v20, %v259_v2  ;;  %v290_v25 = vadd.f32 %v748_v20, %v267_v3 }
  0xef   :  { %v530_v26 = vpack.c.bf16 %v343_v14, %v342_v10  ;;  %v550_v27 = vpack.c.bf16 %v351_v15, %v350_v11  ;;  %v280_v32 = vadd.f32 %v748_v20, %v257_v12  ;;  %v288_v33 = vadd.f32 %v748_v20, %v265_v13 }
  0xf0   :  { %v341_v28 = vmax.f32 %v325_v17, 0.0  ;;  %v349_v29 = vmax.f32 %v333_v18, 0.0  ;;  %v202_v30 = vpop.f32.mrf.mxu0  ;;  %v234_v31 = vpop.f32.mrf.mxu1  ;;  %v505_v36 = vunpack.c.h.bf16 %v765_v34  ;;  %v521_v37 = vunpack.c.h.bf16 %v770_v35 }
  0xf1   :  { %569 = vst [vmem:[%s845_s5 + $0x8] sm:$0xff] %v530_v26   ;;  %573 = vst [vmem:[%s845_s5 + $0x28] sm:$0xff] %v550_v27   ;;  %v260_v40 = vmul.f32 %v615_v19, %v737_v16  ;;  %v268_v41 = vmul.f32 %v623_v21, %v737_v16  ;;  %v258_v44 = vmul.f32 %v737_v16, %v202_v30  ;;  %v501_v34 = vunpack.c.h.bf16 %v775_v42 }
  0xf2   :  { %v525_v38 = vpack.c.bf16 %v341_v28, %v340_v22  ;;  %v545_v39 = vpack.c.bf16 %v349_v29, %v348_v23  ;;  %v266_v35 = vmul.f32 %v737_v16, %v234_v31  ;;  %v517_v45 = vunpack.c.h.bf16 %v780_v43 }
  0xf3   :  { %v330_v46 = vadd.f32 %v504_v52, %v282_v24  ;;  %v338_v47 = vadd.f32 %v520_v53, %v290_v25  ;;  %v283_v48 = vadd.f32 %v748_v20, %v260_v40  ;;  %v291_v49 = vadd.f32 %v748_v20, %v268_v41 }
  0xf4   :  { %526 = vst [vmem:[%s845_s5] sm:$0xff] %v525_v38   ;;  %572 = vst [vmem:[%s845_s5 + $0x20] sm:$0xff] %v545_v39   ;;  %v328_v50 = vadd.f32 %v500_v56, %v280_v32  ;;  %v336_v42 = vadd.f32 %v516_v57, %v288_v33  ;;  %v281_v16 = vadd.f32 %v748_v20, %v258_v44 }
  0xf5   :  { %v289_v43 = vadd.f32 %v748_v20, %v266_v35  ;;  %v331_v51 = vadd.f32 %v505_v36, %v283_v48  ;;  %v339_v54 = vadd.f32 %v521_v37, %v291_v49  ;;  %v346_v59 = vmax.f32 %v330_v46, 0.0 }
  0xf6   :  { %v329_v55 = vadd.f32 %v501_v34, %v281_v16  ;;  %v354_v60 = vmax.f32 %v338_v47, 0.0  ;;  %v344_v52 = vmax.f32 %v328_v50, 0.0  ;;  %v352_v53 = vmax.f32 %v336_v42, 0.0 }
  0xf7   :  { %v337_v58 = vadd.f32 %v517_v45, %v289_v43  ;;  %v347_v61 = vmax.f32 %v331_v51, 0.0  ;;  %v355_v62 = vmax.f32 %v339_v54, 0.0 }
  0xf8   :  { %v345_v63 = vmax.f32 %v329_v55, 0.0 }
  0xf9   :  { %v353_v0 = vmax.f32 %v337_v58, 0.0  ;;  %v540_v1 = vpack.c.bf16 %v347_v61, %v346_v59  ;;  %v560_v2 = vpack.c.bf16 %v355_v62, %v354_v60 }
  0xfa   :  { %v535_v56 = vpack.c.bf16 %v345_v63, %v344_v52 }
  0xfb   :  { %v555_v57 = vpack.c.bf16 %v353_v0, %v352_v53  ;;  %571 = vst [vmem:[%s845_s5 + $0x18] sm:$0xff] %v540_v1   ;;  %575 = vst [vmem:[%s845_s5 + $0x38] sm:$0xff] %v560_v2  }
  0xfc   :  { %570 = vst [vmem:[%s845_s5 + $0x10] sm:$0xff] %v535_v56  }
  0xfd   :  { %574 = vst [vmem:[%s845_s5 + $0x30] sm:$0xff] %v555_v57  }

// kernel: resnext_forward.30
= control target key start
LH: loop header
LB: loop body
LE: loop exit
PB: predicated region body
PF: predicated region fallthrough
CT: control target
= control target key end

     0   :  { %vm200_vm0 = vcmask 261120   ;;  %s577_s1 = inlined_call_operand.vmem [shape: bf16[288,128], index: 1, kind: input, shape index: {}]   ;;  %s578_s0 = inlined_call_operand.vmem [shape: bf16[32,288], index: 0, kind: input, shape index: {}]   ;;  %s579_s2 = inlined_call_operand.vmem [shape: f32[1,128], index: 2, kind: input, shape index: {}]   ;;  %s580_s3 = inlined_call_operand.vmem [shape: f32[1,128], index: 3, kind: input, shape index: {}]   ;;  %s581_s4 = inlined_call_operand.vmem [shape: bf16[32,128], index: 4, kind: output, shape index: {}]  }
   0x1   :  { %v442_v0 = vld [vmem:[%s577_s1 + $0x78] sm:$0xff]   ;;  %v444_v2 = vld [vmem:[%s577_s1 + $0x70] sm:$0xff]   ;;  %v446_v4 = vld [vmem:[%s577_s1 + $0x68] sm:$0xff]  }
   0x2   :  { %v443_v1 = vld [vmem:[%s577_s1 + $0x38] sm:$0xff]   ;;  %402 = vmatprep.subr.bf16.mxu0 %v442_v0  ;;  %v445_v3 = vld [vmem:[%s577_s1 + $0x30] sm:$0xff]   ;;  %v447_v5 = vld [vmem:[%s577_s1 + $0x28] sm:$0xff]  }
   0x3   :  { %403 = vmatpush3.bf16.msra.mxu0 %v443_v1  ;;  %v448_v6 = vld [vmem:[%s577_s1 + $0x60] sm:$0xff]   ;;  %v450_v8 = vld [vmem:[%s577_s1 + $0x58] sm:$0xff]   ;;  %v456_v9 = vld [vmem:[%s577_s1 + $0x88] sm:$0xff]  }
   0x4   :  { %404 = vmatprep.subr.bf16.mxu0 %v444_v2  ;;  %v449_v7 = vld [vmem:[%s577_s1 + $0x20] sm:$0xff]   ;;  %v451_v10 = vld [vmem:[%s577_s1 + $0x18] sm:$0xff]   ;;  %v452_v11 = vld [vmem:[%s577_s1 + $0x50] sm:$0xff]   ;;  %434 = vmatprep.subr.bf16.mxu1 %v456_v9 }
   0x5   :  { %v453_v12 = vld [vmem:[%s577_s1 + $0x10] sm:$0xff]   ;;  %435 = vmatpush3.bf16.msra.mxu1 %v456_v9  ;;  %v459_v13 = vld [vmem:[%s577_s1 + $0x80] sm:$0xff]   ;;  %v454_v14 = vld [vmem:[%s577_s1 + $0x48] sm:$0xff]  }
   0x6   :  { %436 = vmatprep.subr.bf16.mxu1 %v459_v13  ;;  %v462_v15 = vld [vmem:[%s578_s0 + $0x4] ss:$12 sps:$4 sm:$0xff]   ;;  %v463_v16 = vld [vmem:[%s578_s0 + $0x8] ss:$12 sps:$4 sm:$0xff]   ;;  %v464_v17 = vld [vmem:[%s578_s0 + $0x20] ss:$12 sps:$4 sm:$0xff]  }
   0x7   :  { %405 = vmatpush3.bf16.msra.mxu0 %v445_v3  ;;  %239 = vmatprep.mubr.bf16.mxu0 %v462_v15  ;;  %v455_v18 = vld [vmem:[%s577_s1 + $0x8] sm:$0xff]   ;;  %v457_v19 = vld [vmem:[%s577_s1 + $0x40] sm:$0xff]  }
   0x8   :  { %406 = vmatprep.subr.bf16.mxu0 %v446_v4  ;;  %438 = vmatprep.mubr.msk.bf16.mxu1 %vm200_vm0, %v463_v16  ;;  %v458_v20 = vld [vmem:[%s577_s1] sm:$0xff]   ;;  %v465_v22 = vld [vmem:[%s578_s0 + $0x1c] ss:$12 sps:$4 sm:$0xff]  }
   0x9   :  { %437 = vmatpush3.bf16.msra.mxu1 %v459_v13  ;;  %v460_v21 = vld [vmem:[%s578_s0] ss:$12 sps:$4 sm:$0xff]   ;;  %v467_v23 = vld [vmem:[%s578_s0 + $0x18] ss:$12 sps:$4 sm:$0xff]  }
   0xa   :  { %v381_v31 = vld [vmem:[%s579_s2] ss:$0 sm:$0xff] }
   0xb   :  { %407 = vmatpush3.bf16.msra.mxu0 %v447_v5  ;;  %v382_v37 = vld [vmem:[%s580_s3] ss:$0 sm:$0xff] }
   0xc   :  { %408 = vmatprep.subr.bf16.mxu0 %v448_v6  ;;  %439 = vmatmul.mubr.msk.bf16.vlgmr.msra.gmra.mxu1 %vm200_vm0, %v464_v17 }
   0xf   :  { %409 = vmatpush3.bf16.msra.mxu0 %v449_v7 }
  0x10   :  { %410 = vmatprep.subr.bf16.mxu0 %v450_v8 }
  0x13   :  { %411 = vmatpush3.bf16.msra.mxu0 %v451_v10 }
  0x14   :  { %412 = vmatprep.subr.bf16.mxu0 %v452_v11 }
  0x17   :  { %413 = vmatpush3.bf16.msra.mxu0 %v453_v12 }
  0x18   :  { %414 = vmatprep.subr.bf16.mxu0 %v454_v14 }
  0x1b   :  { %415 = vmatpush3.bf16.msra.mxu0 %v455_v18 }
  0x1c   :  { %416 = vmatprep.subr.bf16.mxu0 %v457_v19 }
  0x1f   :  { %417 = vmatpush3.bf16.msra.mxu0 %v458_v20 }
  0x22   :  { %240 = vmatmul.mubr.bf16.vlgmr.msra.gmra.mxu0 %v460_v21 }
  0x23   :  { %247 = vmatprep.mubr.bf16.mxu0 %v465_v22 }
  0x2a   :  { %248 = vmatmul.mubr.bf16.gmra.mxu0 %v467_v23 }
  0xcc   :  { %v440_v24 = vpop.f32.mrf.mxu1 }
  0xce   :  { %v290_v25 = vpop.f32.mrf.mxu1 }
  0xd0   :  { %v441_v28 = vpop.f32.mrf.mxu1 }
  0xd2   :  { %v293_v34 = vpop.f32.mrf.mxu1 }
  0xe2   :  { %v418_v26 = vpop.f32.mrf.mxu0 }
  0xe4   :  { %v419_v27 = vpop.f32.mrf.mxu0 }
  0xe5   :  { %v420_v29 = vadd.f32 %v419_v27, %v418_v26 }
  0xe6   :  { %v421_v30 = vpop.f32.mrf.mxu0 }
  0xe7   :  { %v291_v32 = vadd.f32 %v420_v29, %v290_v25 }
  0xe8   :  { %v422_v33 = vpop.f32.mrf.mxu0 }
  0xe9   :  { %v312_v35 = vmul.f32 %v381_v31, %v291_v32  ;;  %v423_v36 = vadd.f32 %v422_v33, %v421_v30 }
  0xea   :  { %v424_v38 = vpop.f32.mrf.mxu0 }
  0xeb   :  { %v294_v39 = vadd.f32 %v423_v36, %v293_v34  ;;  %v323_v41 = vadd.f32 %v382_v37, %v312_v35 }
  0xec   :  { %v425_v40 = vpop.f32.mrf.mxu0 }
  0xed   :  { %v313_v42 = vmul.f32 %v381_v31, %v294_v39  ;;  %v426_v43 = vadd.f32 %v425_v40, %v424_v38  ;;  %v327_v48 = vmax.f32 %v323_v41, 0.0 }
  0xee   :  { %v427_v44 = vpop.f32.mrf.mxu0 }
  0xef   :  { %v324_v45 = vadd.f32 %v382_v37, %v313_v42  ;;  %v299_v46 = vadd.f32 %v440_v24, %v426_v43 }
  0xf0   :  { %v428_v47 = vpop.f32.mrf.mxu0 }
  0xf1   :  { %v328_v49 = vmax.f32 %v324_v45, 0.0  ;;  %v314_v50 = vmul.f32 %v381_v31, %v299_v46  ;;  %v429_v51 = vadd.f32 %v428_v47, %v427_v44 }
  0xf3   :  { %v394_v52 = vpack.c.bf16 %v328_v49, %v327_v48  ;;  %v302_v53 = vadd.f32 %v441_v28, %v429_v51  ;;  %v325_v54 = vadd.f32 %v382_v37, %v314_v50 }
  0xf5   :  { %395 = vst [vmem:[%s581_s4] sm:$0xff] %v394_v52   ;;  %v315_v55 = vmul.f32 %v381_v31, %v302_v53  ;;  %v329_v57 = vmax.f32 %v325_v54, 0.0 }
  0xf7   :  { %v326_v56 = vadd.f32 %v382_v37, %v315_v55 }
  0xf9   :  { %v330_v58 = vmax.f32 %v326_v56, 0.0 }
  0xfb   :  { %v399_v59 = vpack.c.bf16 %v330_v58, %v329_v57 }
  0xfd   :  { %401 = vst [vmem:[%s581_s4 + $0x8] sm:$0xff] %v399_v59  }

// kernel: resnext_forward.31
= control target key start
LH: loop header
LB: loop body
LE: loop exit
PB: predicated region body
PF: predicated region fallthrough
CT: control target
= control target key end

     0   :  { %s331_s1 = inlined_call_operand.vmem [shape: bf16[128,128], index: 1, kind: input, shape index: {}]   ;;  %s332_s0 = inlined_call_operand.vmem [shape: bf16[32,128], index: 0, kind: input, shape index: {}]   ;;  %s333_s2 = inlined_call_operand.vmem [shape: f32[1,128], index: 2, kind: input, shape index: {}]   ;;  %s334_s3 = inlined_call_operand.vmem [shape: f32[1,128], index: 3, kind: input, shape index: {}]   ;;  %s335_s4 = inlined_call_operand.vmem [shape: bf16[32,128], index: 4, kind: output, shape index: {}]  }
   0x1   :  { %v254_v0 = vld [vmem:[%s331_s1 + $0x38] sm:$0xff]   ;;  %v255_v1 = vld [vmem:[%s331_s1 + $0x30] sm:$0xff]   ;;  %v256_v2 = vld [vmem:[%s331_s1 + $0x28] sm:$0xff]  }
   0x2   :  { %234 = vmatprep.subr.bf16.mxu0 %v254_v0  ;;  %v257_v3 = vld [vmem:[%s331_s1 + $0x20] sm:$0xff]   ;;  %v258_v5 = vld [vmem:[%s331_s1 + $0x18] sm:$0xff]   ;;  %v259_v6 = vld [vmem:[%s331_s1 + $0x10] sm:$0xff]  }
   0x3   :  { %235 = vmatpush3.bf16.msra.mxu0 %v254_v0  ;;  %v262_v4 = vld [vmem:[%s332_s0] sm:$0xff]   ;;  %v260_v7 = vld [vmem:[%s331_s1 + $0x8] sm:$0xff]  }
   0x4   :  { %236 = vmatprep.subr.bf16.mxu0 %v255_v1  ;;  %250 = vmatprep.mubr.bf16.mxu0 %v262_v4  ;;  %v261_v8 = vld [vmem:[%s331_s1] sm:$0xff]   ;;  %v263_v9 = vld [vmem:[%s332_s0 + $0x8] sm:$0xff]  }
   0x5   :  { %v203_v11 = vld [vmem:[%s333_s2] ss:$0 sm:$0xff] }
   0x6   :  { %v204_v14 = vld [vmem:[%s334_s3] ss:$0 sm:$0xff] }
   0x7   :  { %237 = vmatpush3.bf16.msra.mxu0 %v255_v1 }
   0x8   :  { %238 = vmatprep.subr.bf16.mxu0 %v256_v2 }
   0xb   :  { %239 = vmatpush3.bf16.msra.mxu0 %v256_v2 }
   0xc   :  { %240 = vmatprep.subr.bf16.mxu0 %v257_v3 }
   0xf   :  { %241 = vmatpush3.bf16.msra.mxu0 %v257_v3 }
  0x10   :  { %242 = vmatprep.subr.bf16.mxu0 %v258_v5 }
  0x13   :  { %243 = vmatpush3.bf16.msra.mxu0 %v258_v5 }
  0x14   :  { %244 = vmatprep.subr.bf16.mxu0 %v259_v6 }
  0x17   :  { %245 = vmatpush3.bf16.msra.mxu0 %v259_v6 }
  0x18   :  { %246 = vmatprep.subr.bf16.mxu0 %v260_v7 }
  0x1b   :  { %247 = vmatpush3.bf16.msra.mxu0 %v260_v7 }
  0x1c   :  { %248 = vmatprep.subr.bf16.mxu0 %v261_v8 }
  0x1f   :  { %249 = vmatpush3.bf16.msra.mxu0 %v261_v8 }
  0x22   :  { %251 = vmatmul.mubr.bf16.vlgmr.msra.gmra.mxu0 %v263_v9 }
  0xe2   :  { %v252_v10 = vpop.f32.mrf.mxu0 }
  0xe3   :  { %v156_v13 = vmul.f32 %v252_v10, %v203_v11 }
  0xe4   :  { %v132_v12 = vpop.f32.mrf.mxu0 }
  0xe5   :  { %v154_v16 = vmul.f32 %v203_v11, %v132_v12  ;;  %v167_v19 = vadd.f32 %v204_v14, %v156_v13 }
  0xe6   :  { %v253_v15 = vpop.f32.mrf.mxu0 }
  0xe7   :  { %v157_v17 = vmul.f32 %v253_v15, %v203_v11  ;;  %v165_v22 = vadd.f32 %v204_v14, %v154_v16 }
  0xe8   :  { %v135_v18 = vpop.f32.mrf.mxu0 }
  0xe9   :  { %v168_v20 = vadd.f32 %v204_v14, %v157_v17  ;;  %v155_v21 = vmul.f32 %v203_v11, %v135_v18 }
  0xeb   :  { %v221_v23 = vpack.c.bf16 %v168_v20, %v167_v19  ;;  %v166_v24 = vadd.f32 %v204_v14, %v155_v21 }
  0xed   :  { %223 = vst [vmem:[%s335_s4 + $0x8] sm:$0xff] %v221_v23   ;;  %v216_v25 = vpack.c.bf16 %v166_v24, %v165_v22 }
  0xef   :  { %217 = vst [vmem:[%s335_s4] sm:$0xff] %v216_v25  }

// kernel: resnext_forward.32
= control target key start
LH: loop header
LB: loop body
LE: loop exit
PB: predicated region body
PF: predicated region fallthrough
CT: control target
= control target key end

     0   :  { %s370_s1 = inlined_call_operand.vmem [shape: bf16[128,128], index: 1, kind: input, shape index: {}]   ;;  %s371_s0 = inlined_call_operand.vmem [shape: bf16[32,128], index: 0, kind: input, shape index: {}]   ;;  %s372_s2 = inlined_call_operand.vmem [shape: f32[1,128], index: 2, kind: input, shape index: {}]   ;;  %s373_s3 = inlined_call_operand.vmem [shape: f32[1,128], index: 3, kind: input, shape index: {}]   ;;  %s374_s4 = inlined_call_operand.vmem [shape: bf16[32,128], index: 4, kind: input, shape index: {}]   ;;  %s375_s5 = inlined_call_operand.vmem [shape: bf16[32,128], index: 5, kind: output, shape index: {}]  }
   0x1   :  { %v282_v0 = vld [vmem:[%s370_s1 + $0x38] sm:$0xff]   ;;  %v283_v1 = vld [vmem:[%s370_s1 + $0x30] sm:$0xff]   ;;  %v284_v2 = vld [vmem:[%s370_s1 + $0x28] sm:$0xff]  }
   0x2   :  { %262 = vmatprep.subr.bf16.mxu0 %v282_v0  ;;  %v285_v3 = vld [vmem:[%s370_s1 + $0x20] sm:$0xff]   ;;  %v286_v5 = vld [vmem:[%s370_s1 + $0x18] sm:$0xff]   ;;  %v287_v6 = vld [vmem:[%s370_s1 + $0x10] sm:$0xff]  }
   0x3   :  { %263 = vmatpush3.bf16.msra.mxu0 %v282_v0  ;;  %v290_v4 = vld [vmem:[%s371_s0] sm:$0xff]   ;;  %v288_v7 = vld [vmem:[%s370_s1 + $0x8] sm:$0xff]  }
   0x4   :  { %264 = vmatprep.subr.bf16.mxu0 %v283_v1  ;;  %278 = vmatprep.mubr.bf16.mxu0 %v290_v4  ;;  %v289_v8 = vld [vmem:[%s370_s1] sm:$0xff]   ;;  %v291_v9 = vld [vmem:[%s371_s0 + $0x8] sm:$0xff]  }
   0x5   :  { %v222_v10 = vld [vmem:[%s372_s2] ss:$0 sm:$0xff]  ;;  %v250_v13 = vld [vmem:[%s374_s4 + $0x8] sm:$0xff]  }
   0x6   :  { %v223_v12 = vld [vmem:[%s373_s3] ss:$0 sm:$0xff]  ;;  %v238_v18 = vunpack.c.l.bf16 %v250_v13  ;;  %v239_v24 = vunpack.c.h.bf16 %v250_v13 }
   0x7   :  { %265 = vmatpush3.bf16.msra.mxu0 %v283_v1  ;;  %v233_v16 = vld [vmem:[%s374_s4] sm:$0xff]  }
   0x8   :  { %266 = vmatprep.subr.bf16.mxu0 %v284_v2  ;;  %v234_v22 = vunpack.c.l.bf16 %v233_v16  ;;  %v235_v29 = vunpack.c.h.bf16 %v233_v16 }
   0xb   :  { %267 = vmatpush3.bf16.msra.mxu0 %v284_v2 }
   0xc   :  { %268 = vmatprep.subr.bf16.mxu0 %v285_v3 }
   0xf   :  { %269 = vmatpush3.bf16.msra.mxu0 %v285_v3 }
  0x10   :  { %270 = vmatprep.subr.bf16.mxu0 %v286_v5 }
  0x13   :  { %271 = vmatpush3.bf16.msra.mxu0 %v286_v5 }
  0x14   :  { %272 = vmatprep.subr.bf16.mxu0 %v287_v6 }
  0x17   :  { %273 = vmatpush3.bf16.msra.mxu0 %v287_v6 }
  0x18   :  { %274 = vmatprep.subr.bf16.mxu0 %v288_v7 }
  0x1b   :  { %275 = vmatpush3.bf16.msra.mxu0 %v288_v7 }
  0x1c   :  { %276 = vmatprep.subr.bf16.mxu0 %v289_v8 }
  0x1f   :  { %277 = vmatpush3.bf16.msra.mxu0 %v289_v8 }
  0x22   :  { %279 = vmatmul.mubr.bf16.vlgmr.msra.gmra.mxu0 %v291_v9 }
  0xe2   :  { %v280_v11 = vpop.f32.mrf.mxu0 }
  0xe3   :  { %v159_v14 = vmul.f32 %v280_v11, %v222_v10 }
  0xe4   :  { %v135_v15 = vpop.f32.mrf.mxu0 }
  0xe5   :  { %v170_v17 = vadd.f32 %v223_v12, %v159_v14  ;;  %v157_v19 = vmul.f32 %v222_v10, %v135_v15 }
  0xe6   :  { %v281_v20 = vpop.f32.mrf.mxu0 }
  0xe7   :  { %v168_v21 = vadd.f32 %v223_v12, %v157_v19  ;;  %v160_v23 = vmul.f32 %v281_v20, %v222_v10  ;;  %v182_v26 = vadd.f32 %v238_v18, %v170_v17 }
  0xe8   :  { %v138_v25 = vpop.f32.mrf.mxu0 }
  0xe9   :  { %v171_v27 = vadd.f32 %v223_v12, %v160_v23  ;;  %v158_v28 = vmul.f32 %v222_v10, %v138_v25  ;;  %v180_v30 = vadd.f32 %v234_v22, %v168_v21  ;;  %v186_v33 = vmax.f32 %v182_v26, 0.0 }
  0xeb   :  { %v183_v31 = vadd.f32 %v239_v24, %v171_v27  ;;  %v169_v32 = vadd.f32 %v223_v12, %v158_v28  ;;  %v184_v36 = vmax.f32 %v180_v30, 0.0 }
  0xed   :  { %v187_v34 = vmax.f32 %v183_v31, 0.0  ;;  %v181_v35 = vadd.f32 %v235_v29, %v169_v32 }
  0xef   :  { %v248_v37 = vpack.c.bf16 %v187_v34, %v186_v33  ;;  %v185_v38 = vmax.f32 %v181_v35, 0.0 }
  0xf1   :  { %251 = vst [vmem:[%s375_s5 + $0x8] sm:$0xff] %v248_v37   ;;  %v243_v39 = vpack.c.bf16 %v185_v38, %v184_v36 }
  0xf3   :  { %244 = vst [vmem:[%s375_s5] sm:$0xff] %v243_v39  }

// kernel: resnext_forward.33
= control target key start
LH: loop header
LB: loop body
LE: loop exit
PB: predicated region body
PF: predicated region fallthrough
CT: control target
= control target key end

     0   :  { %s335_s1 = inlined_call_operand.vmem [shape: bf16[128,128], index: 1, kind: input, shape index: {}]   ;;  %s336_s0 = inlined_call_operand.vmem [shape: bf16[32,128], index: 0, kind: input, shape index: {}]   ;;  %s337_s2 = inlined_call_operand.vmem [shape: f32[1,128], index: 2, kind: input, shape index: {}]   ;;  %s338_s3 = inlined_call_operand.vmem [shape: f32[1,128], index: 3, kind: input, shape index: {}]   ;;  %s339_s4 = inlined_call_operand.vmem [shape: bf16[32,128], index: 4, kind: output, shape index: {}]  }
   0x1   :  { %v258_v0 = vld [vmem:[%s335_s1 + $0x38] sm:$0xff]   ;;  %v259_v1 = vld [vmem:[%s335_s1 + $0x30] sm:$0xff]   ;;  %v260_v2 = vld [vmem:[%s335_s1 + $0x28] sm:$0xff]  }
   0x2   :  { %238 = vmatprep.subr.bf16.mxu0 %v258_v0  ;;  %v261_v3 = vld [vmem:[%s335_s1 + $0x20] sm:$0xff]   ;;  %v262_v5 = vld [vmem:[%s335_s1 + $0x18] sm:$0xff]   ;;  %v263_v6 = vld [vmem:[%s335_s1 + $0x10] sm:$0xff]  }
   0x3   :  { %239 = vmatpush3.bf16.msra.mxu0 %v258_v0  ;;  %v266_v4 = vld [vmem:[%s336_s0] sm:$0xff]   ;;  %v264_v7 = vld [vmem:[%s335_s1 + $0x8] sm:$0xff]  }
   0x4   :  { %240 = vmatprep.subr.bf16.mxu0 %v259_v1  ;;  %254 = vmatprep.mubr.bf16.mxu0 %v266_v4  ;;  %v265_v8 = vld [vmem:[%s335_s1] sm:$0xff]   ;;  %v267_v9 = vld [vmem:[%s336_s0 + $0x8] sm:$0xff]  }
   0x5   :  { %v207_v10 = vld [vmem:[%s337_s2] ss:$0 sm:$0xff] }
   0x6   :  { %v208_v13 = vld [vmem:[%s338_s3] ss:$0 sm:$0xff] }
   0x7   :  { %241 = vmatpush3.bf16.msra.mxu0 %v259_v1 }
   0x8   :  { %242 = vmatprep.subr.bf16.mxu0 %v260_v2 }
   0xb   :  { %243 = vmatpush3.bf16.msra.mxu0 %v260_v2 }
   0xc   :  { %244 = vmatprep.subr.bf16.mxu0 %v261_v3 }
   0xf   :  { %245 = vmatpush3.bf16.msra.mxu0 %v261_v3 }
  0x10   :  { %246 = vmatprep.subr.bf16.mxu0 %v262_v5 }
  0x13   :  { %247 = vmatpush3.bf16.msra.mxu0 %v262_v5 }
  0x14   :  { %248 = vmatprep.subr.bf16.mxu0 %v263_v6 }
  0x17   :  { %249 = vmatpush3.bf16.msra.mxu0 %v263_v6 }
  0x18   :  { %250 = vmatprep.subr.bf16.mxu0 %v264_v7 }
  0x1b   :  { %251 = vmatpush3.bf16.msra.mxu0 %v264_v7 }
  0x1c   :  { %252 = vmatprep.subr.bf16.mxu0 %v265_v8 }
  0x1f   :  { %253 = vmatpush3.bf16.msra.mxu0 %v265_v8 }
  0x22   :  { %255 = vmatmul.mubr.bf16.vlgmr.msra.gmra.mxu0 %v267_v9 }
  0xe2   :  { %v256_v11 = vpop.f32.mrf.mxu0 }
  0xe3   :  { %v156_v12 = vmul.f32 %v256_v11, %v207_v10 }
  0xe4   :  { %v132_v14 = vpop.f32.mrf.mxu0 }
  0xe5   :  { %v154_v15 = vmul.f32 %v207_v10, %v132_v14  ;;  %v167_v17 = vadd.f32 %v208_v13, %v156_v12 }
  0xe6   :  { %v257_v16 = vpop.f32.mrf.mxu0 }
  0xe7   :  { %v157_v18 = vmul.f32 %v257_v16, %v207_v10  ;;  %v165_v20 = vadd.f32 %v208_v13, %v154_v15  ;;  %v171_v23 = vmax.f32 %v167_v17, 0.0 }
  0xe8   :  { %v135_v19 = vpop.f32.mrf.mxu0 }
  0xe9   :  { %v168_v21 = vadd.f32 %v208_v13, %v157_v18  ;;  %v155_v22 = vmul.f32 %v207_v10, %v135_v19  ;;  %v169_v26 = vmax.f32 %v165_v20, 0.0 }
  0xeb   :  { %v172_v24 = vmax.f32 %v168_v21, 0.0  ;;  %v166_v25 = vadd.f32 %v208_v13, %v155_v22 }
  0xed   :  { %v225_v27 = vpack.c.bf16 %v172_v24, %v171_v23  ;;  %v170_v28 = vmax.f32 %v166_v25, 0.0 }
  0xef   :  { %227 = vst [vmem:[%s339_s4 + $0x8] sm:$0xff] %v225_v27   ;;  %v220_v29 = vpack.c.bf16 %v170_v28, %v169_v26 }
  0xf1   :  { %221 = vst [vmem:[%s339_s4] sm:$0xff] %v220_v29  }

// kernel: resnext_forward.36
= control target key start
LH: loop header
LB: loop body
LE: loop exit
PB: predicated region body
PF: predicated region fallthrough
CT: control target
= control target key end

     0   :  { %vm35_vm0 = vcmask 1041409   ;;  %s71_s0 = inlined_call_operand.vmem [shape: bf16[2,16,128], index: 0, kind: input, shape index: {}]   ;;  %s72_s1 = inlined_call_operand.vmem [shape: f32[2,128], index: 1, kind: output, shape index: {}]  }
   0x1   :  { %v44_v0 = vld [vmem:[%s71_s0] sm:$0xff]   ;;  %v51_v1 = vld [vmem:[%s71_s0 + $0x8] sm:$0xff]  }
   0x2   :  { %v45_v2 = vunpack.c.l.bf16 %v44_v0  ;;  %v46_v3 = vunpack.c.h.bf16 %v44_v0  ;;  %v49_v4 = vunpack.c.l.bf16 %v51_v1  ;;  %v50_v5 = vunpack.c.h.bf16 %v51_v1 }
   0x4   :  { %v16_v6 = vadd.f32 %v46_v3, %v45_v2  ;;  %v23_v7 = vadd.f32 %v50_v5, %v49_v4 }
   0x6   :  { %v17_v8 = vrot.slane %v16_v6, 4  ;;  %v24_v9 = vrot.slane %v23_v7, 4 }
   0x8   :  { %v18_v10 = vadd.f32 %v17_v8, %v16_v6  ;;  %v25_v11 = vadd.f32 %v24_v9, %v23_v7 }
   0xa   :  { %v19_v12 = vrot.slane %v18_v10, 2  ;;  %v26_v13 = vrot.slane %v25_v11, 2 }
   0xc   :  { %v20_v14 = vadd.f32 %v19_v12, %v18_v10  ;;  %v27_v15 = vadd.f32 %v26_v13, %v25_v11 }
   0xe   :  { %v21_v16 = vrot.slane %v20_v14, 1  ;;  %v28_v17 = vrot.slane %v27_v15, 1 }
  0x10   :  { %v22_v18 = vadd.f32 %v21_v16, %v20_v14  ;;  %v29_v19 = vadd.f32 %v28_v17, %v27_v15 }
  0x12   :  { %v31_v20 = vmul.f32 0.0625, %v22_v18  ;;  %v32_v21 = vmul.f32 0.0625, %v29_v19 }
  0x14   :  { %v36_v22 = vsel %vm35_vm0, %v32_v21, %v31_v20 }
  0x15   :  { %38 = vst [vmem:[%s72_s1] sm:$0x3] %v36_v22 }

// kernel: resnext_forward.37
= control target key start
LH: loop header
LB: loop body
LE: loop exit
PB: predicated region body
PF: predicated region fallthrough
CT: control target
= control target key end

     0   :  { %v228_v1 = vmov 0.0   ;;  %vm229_vm0 = vmmov 0   ;;  %s292_s0 = inlined_call_operand.vmem [shape: f32[2,128], index: 0, kind: input, shape index: {}]   ;;  %s293_s1 = inlined_call_operand.vmem [shape: bf16[128,128], index: 1, kind: input, shape index: {}]   ;;  %s294_s2 = inlined_call_operand.vmem [shape: f32[1,128], index: 2, kind: input, shape index: {}]   ;;  %s295_s3 = inlined_call_operand.vmem [shape: f32[1,128], index: 3, kind: input, shape index: {}]   ;;  %s296_s4 = inlined_call_operand.hbm [shape: f32[2,128], index: 4, kind: output, shape index: {}]  }
   0x1   :  { %v198_v0 = vld [vmem:[%s293_s1 + $0x38] sm:$0xff]   ;;  %175 = vmatprep.subr.bf16.mxu0 %v228_v1  ;;  %v199_v2 = vld [vmem:[%s293_s1 + $0x30] sm:$0xff]   ;;  %191 = vmatprep.mubr.msk.bf16.mxu0 %vm229_vm0, %v228_v1  ;;  %v200_v3 = vld [vmem:[%s293_s1 + $0x28] sm:$0xff]  }
   0x2   :  { %176 = vmatpush3.bf16.msra.mxu0 %v198_v0 }
   0x3   :  { %177 = vmatprep.subr.bf16.mxu0 %v228_v1 }
   0x6   :  { %178 = vmatpush3.bf16.msra.mxu0 %v199_v2 }
   0x7   :  { %179 = vmatprep.subr.bf16.mxu0 %v228_v1 }
   0x8   :  { %9 = vsyncpa [#allocation3], 0  ;;  %v201_v4 = vld [vmem:[%s293_s1 + $0x20] sm:$0xff]   ;;  %v202_v5 = vld [vmem:[%s293_s1 + $0x18] sm:$0xff]   ;;  %s230_s11 = smov [#allocation2]  }
   0x9   :  { %v203_v6 = vld [vmem:[%s293_s1 + $0x10] sm:$0xff]   ;;  %v204_v7 = vld [vmem:[%s293_s1 + $0x8] sm:$0xff]   ;;  %v205_v8 = vld [vmem:[%s293_s1] sm:$0xff]   ;;  %s148_s12 = sshll.u32 %s230_s11, 4  ;;  %s149_s12 = int_to_ptr.vmem [resolvable:$true] %s148_s12 }
   0xa   :  { %180 = vmatpush3.bf16.msra.mxu0 %v200_v3  ;;  %v19_v9 = vld [vmem:[%s292_s0] sm:$0x3]  ;;  %s206_s0 = scalar_lea.vmem %s149_s12, 32  ;;  %p211_p1 = scmp.lt.s32.totalorder %s149_s12, %s149_s12 }
   0xb   :  { %181 = vmatprep.subr.bf16.mxu0 %v228_v1  ;;  %v20_v10 = vpack.c.bf16 %v19_v9, %v19_v9  ;;  %v164_v11 = vld [vmem:[%s294_s2] ss:$0 sm:$0xff]  ;;  %p207_p0 = scmp.ne.s32.totalorder %s149_s12, %s206_s0  ;;  %p212_p2 = scmp.lt.s32.totalorder %s206_s0, %s206_s0 }
   0xc   :  { %v165_v13 = vld [vmem:[%s295_s3] ss:$0 sm:$0xff] }
   0xd   :  { %p213_p3 = por %p212_p2, %p211_p1 }
   0xe   :  { %182 = vmatpush3.bf16.msra.mxu0 %v201_v4 }
   0xf   :  { %183 = vmatprep.subr.bf16.mxu0 %v228_v1  ;;  %p214_p4 = pnand %p213_p3, %p207_p0 }
  0x12   :  { %184 = vmatpush3.bf16.msra.mxu0 %v202_v5 }
  0x13   :  { %185 = vmatprep.subr.bf16.mxu0 %v228_v1 }
  0x16   :  { %186 = vmatpush3.bf16.msra.mxu0 %v203_v6 }
  0x17   :  { %187 = vmatprep.subr.bf16.mxu0 %v228_v1 }
  0x1a   :  { %188 = vmatpush3.bf16.msra.mxu0 %v204_v7 }
  0x1b   :  { %189 = vmatprep.subr.bf16.mxu0 %v228_v1 }
  0x1e   :  { %190 = vmatpush3.bf16.msra.mxu0 %v205_v8 }
  0x21   :  { %192 = vmatmul.mubr.bf16.vlgmr.msra.gmra.mxu0 %v20_v10 }
  0xe1   :  { %v119_v12 = vpop.f32.mrf.mxu0 }
  0xe2   :  { %v132_v14 = vmul.f32 %v164_v11, %v119_v12 }
  0xe3   :  { %v193_v15 = vpop.f32.mrf.mxu0 }
  0xe4   :  { %v140_v16 = vadd.f32 %v165_v13, %v132_v14 }
  0xe5   :  { %v122_v17 = vpop.f32.mrf.mxu0 }
  0xe6   :  { %141 = vst [vmem:[#allocation2] sm:$0x3] %v140_v16 }
  0xe7   :  { %v194_v18 = vpop.f32.mrf.mxu0 }
  0xe8   :  { %217 = shalt.err (!%p214_p4)
}
  0xe9   :  { %151 = dma.vmem_to_hbm [thread:$0]  %s149_s12, 32, %s296_s4, [#allocation3]  }
  0xea   :  { %226 = dma.done.wait [#allocation3], 32  }
  0xeb   :  { %227 = vsyncadd [#allocation3], 4294967264 }
  0xec   :  { %155 = vsyncpa [#allocation3], 1 }

</bundles_post_ra>
